<compile_context>
chip_gen: v7x
topology: tpu7x:2x2x1
jax: 0.10.0
libtpu: 0.0.40
codegen_flags: <defaults>
</compile_context>

<pallas_src>
from functools import partial

import jax
import jax.numpy as jnp
from jax import lax
from jax.experimental import pallas as pl
from jax.experimental.pallas import tpu as pltpu


def convlstm_seq_kernel(x_ref, h0_ref, c0_ref, w_ref, b_ref,
                        h_seq_ref, state_ref,
                        h_pad, c_scr,
                        *, H, W, kh, kw, cin, hidden_dim):
    """One ConvLSTM step for one (batch, timestep) grid point.

    x_ref    : (HP, WP, Cin)          spatially padded input x[t], bf16
    h0_ref   : (H, W, hid)            initial hidden state, f32 (read at t==0)
    c0_ref   : (H, W, hid)            initial cell state,   f32 (read at t==0)
    w_ref    : (kh, kw*(Cin+hid), 4*hid)  conv weight, bf16
    b_ref    : (1, 4*hid)             conv bias, f32
    h_seq_ref: (H, W, hid)            per-step hidden output, bf16
    state_ref: (H, W, 2*hid)          packed [h_last, c_last], f32 (written at t==T-1)
    h_pad    : VMEM scratch (HP, WP, hid) bf16 — recurrent h with zero halo
    c_scr    : VMEM scratch (H*W, hid) f32    — recurrent c
    """
    hid = hidden_dim
    four_hd = 4 * hid
    HW = H * W
    HP = H + kh - 1
    ph, pw = kh // 2, kw // 2
    t = pl.program_id(1)

    # ---- initialize the VMEM-resident recurrent state at the first timestep.
    @pl.when(t == 0)
    def _init():
        h_pad[...] = jnp.zeros_like(h_pad)
        h_pad[ph:ph + H, pw:pw + W, :] = h0_ref[...].astype(jnp.bfloat16)
        c_scr[...] = c0_ref[...].reshape(HW, hid).astype(jnp.float32)

    # ---- conv([x_t, h_{t-1}]) with padding='same' as kh matmuls of depth
    #      K = kw*(Cin+hid): build the widened operand once per step (lane
    #      concat of the kx-shifted x / h windows, kx-major channel order
    #      matching the OIHW->(kh, kw*C, 4*hid) weight reshape below).
    slabs = []
    for kx in range(kw):
        slabs.append(x_ref[:, kx:kx + W, :].reshape(HP * W, cin))   # bf16
        slabs.append(h_pad[:, kx:kx + W, :].reshape(HP * W, hid))   # bf16
    wide = jnp.concatenate(slabs, axis=-1)                          # (HP*W, kw*C)

    # Bias folded into the f32 accumulator init (single broadcast, no zero-fill).
    acc = jnp.broadcast_to(b_ref[...].astype(jnp.float32), (HW, four_hd))
    for ky in range(kh):
        # ky*W is a multiple of 8 (W % 8 == 0) -> tile-aligned row slice.
        acc = acc + jnp.dot(wide[ky * W: ky * W + HW, :], w_ref[ky],
                            preferred_element_type=jnp.float32)

    # ---- gate nonlinearities in a single full-vreg tanh pass (EUP):
    #   gates i, f, o (lanes < 3*hid) use sigmoid(x) = 0.5*(1 + tanh(x/2)),
    #   gate g (lanes >= 3*hid) uses tanh(x).
    lane = lax.broadcasted_iota(jnp.int32, (HW, four_hd), 1)
    is_sig = lane < 3 * hid
    th = jnp.tanh(jnp.where(is_sig, 0.5 * acc, acc))
    act = jnp.where(is_sig, 0.5 * (th + 1.0), th)

    # Same split order as torch.split: i, f, o, g.
    i = act[:, 0 * hid:1 * hid]
    f = act[:, 1 * hid:2 * hid]
    o = act[:, 2 * hid:3 * hid]
    g = act[:, 3 * hid:4 * hid]

    c_next = f * c_scr[...] + i * g
    h_next = o * jnp.tanh(c_next)

    # ---- update VMEM-resident recurrent state (halo already zero).
    c_scr[...] = c_next
    h_pad[ph:ph + H, pw:pw + W, :] = h_next.reshape(H, W, hid).astype(jnp.bfloat16)

    # ---- per-step hidden output (bf16: exactly what the next step consumes).
    h_seq_ref[...] = h_next.reshape(H, W, hid).astype(h_seq_ref.dtype)

    # ---- final (h, c) packed into one f32 block, written once.
    @pl.when(t == pl.num_programs(1) - 1)
    def _finalize():
        state_ref[...] = jnp.concatenate([h_next, c_next],
                                         axis=-1).reshape(H, W, 2 * hid)


def conv_lstm_seq_nhwc(x_seq, h0, c0, weight, bias, kernel_size):
    """Fused multi-timestep ConvLSTM in NHWC (preferred driver for sequences).

    x_seq : (B, T, H, W, Cin)     h0 / c0 : (B, H, W, hid)
    weight: (4*hid, Cin+hid, kh, kw)  (nn.Conv2d OIHW)     bias: (4*hid,)
    Returns (h_seq bf16 (B, T, H, W, hid), (h_last f32, c_last f32) NHWC).
    """
    B, T, H, W, Cin = x_seq.shape
    hid = h0.shape[-1]
    kh, kw = kernel_size
    # PyTorch Conv2d with padding=k//2 is "same" only for odd kernels.
    assert kh % 2 == 1 and kw % 2 == 1, "only odd kernel sizes supported"
    assert W % 8 == 0, "W must be a multiple of 8 for aligned ky row slices"
    ph, pw = kh // 2, kw // 2
    HP, WP = H + kh - 1, W + kw - 1
    C = Cin + hid

    # OIHW -> (kh, kw*(Cin+hid), 4*hid), kx-major over channels (matches the
    # in-kernel lane order of the widened operand); bf16 MXU operands.
    w = jnp.transpose(weight, (2, 3, 1, 0)).reshape(kh, kw * C, 4 * hid)
    w = w.astype(jnp.bfloat16)
    b = bias.reshape(1, 4 * hid).astype(jnp.float32)

    # x is padded once for the whole sequence (the recurrent h never leaves the
    # kernel, so it is never re-padded).
    xpad = jnp.pad(x_seq.astype(jnp.bfloat16),
                   ((0, 0), (0, 0), (ph, ph), (pw, pw), (0, 0)))
    h0f = h0.astype(jnp.float32)
    c0f = c0.astype(jnp.float32)

    kernel = partial(convlstm_seq_kernel, H=H, W=W, kh=kh, kw=kw,
                     cin=Cin, hidden_dim=hid)

    h_seq, state = pl.pallas_call(
        kernel,
        out_shape=(jax.ShapeDtypeStruct((B, T, H, W, hid), jnp.bfloat16),
                   jax.ShapeDtypeStruct((B, H, W, 2 * hid), jnp.float32)),
        grid=(B, T),
        in_specs=[
            pl.BlockSpec((None, None, HP, WP, Cin),
                         lambda b_, t_: (b_, t_, 0, 0, 0)),
            pl.BlockSpec((None, H, W, hid), lambda b_, t_: (b_, 0, 0, 0)),
            pl.BlockSpec((None, H, W, hid), lambda b_, t_: (b_, 0, 0, 0)),
            pl.BlockSpec((kh, kw * C, 4 * hid), lambda b_, t_: (0, 0, 0)),
            pl.BlockSpec((1, 4 * hid), lambda b_, t_: (0, 0)),
        ],
        out_specs=(
            pl.BlockSpec((None, None, H, W, hid),
                         lambda b_, t_: (b_, t_, 0, 0, 0)),
            pl.BlockSpec((None, H, W, 2 * hid), lambda b_, t_: (b_, 0, 0, 0)),
        ),
        scratch_shapes=[pltpu.VMEM((HP, WP, hid), jnp.bfloat16),
                        pltpu.VMEM((H * W, hid), jnp.float32)],
        compiler_params=pltpu.CompilerParams(
            # batch axis is megacore-parallel on v7x; timestep axis is a true
            # recurrence, hence "arbitrary" (sequential, innermost).
            dimension_semantics=("parallel", "arbitrary")),
    )(xpad, h0f, c0f, w, b)

    h_last = state[..., :hid]
    c_last = state[..., hid:]
    return h_seq, (h_last, c_last)


def conv_lstm_cell_nhwc(x_nhwc, h_nhwc, c_nhwc, weight, bias, kernel_size):
    """Single ConvLSTM cell step (NHWC) = T=1 case of the fused kernel."""
    _, (h_next, c_next) = conv_lstm_seq_nhwc(x_nhwc[:, None], h_nhwc, c_nhwc,
                                             weight, bias, kernel_size)
    return h_next, c_next


def conv_lstm_cell(x, h_cur, c_cur, weight, bias, kernel_size):
    """PyTorch-layout (NCHW) adapter matching ConvLSTMCell.forward exactly."""
    x_nhwc = jnp.transpose(x, (0, 2, 3, 1))
    h_nhwc = jnp.transpose(h_cur, (0, 2, 3, 1))
    c_nhwc = jnp.transpose(c_cur, (0, 2, 3, 1))
    h_out, c_out = conv_lstm_cell_nhwc(x_nhwc, h_nhwc, c_nhwc,
                                       weight, bias, kernel_size)
    return (jnp.transpose(h_out, (0, 3, 1, 2)),
            jnp.transpose(c_out, (0, 3, 1, 2)))


def conv_lstm_forward(x, hidden_state, weight, bias, kernel_size=(3, 3)):
    """Matches ConvLSTM.forward (NCHW); hidden_state=None -> zeros (init_hidden)."""
    B, _, H, W = x.shape
    hid = weight.shape[0] // 4
    if hidden_state is None:
        h0 = jnp.zeros((B, hid, H, W), jnp.float32)
        c0 = jnp.zeros((B, hid, H, W), jnp.float32)
    else:
        h0, c0 = hidden_state
    return conv_lstm_cell(x, h0, c0, weight, bias, kernel_size)


def _reference(x, h_cur, c_cur, weight, bias):
    """Pure-JAX f32 reference matching the PyTorch ConvLSTMCell.forward."""
    combined = jnp.concatenate([x, h_cur], axis=1)
    conv = lax.conv_general_dilated(
        combined, weight, window_strides=(1, 1),
        padding=((weight.shape[2] // 2,) * 2, (weight.shape[3] // 2,) * 2),
        dimension_numbers=("NCHW", "OIHW", "NCHW"),
        precision=lax.Precision.HIGHEST)
    conv = conv + bias[None, :, None, None]
    cc_i, cc_f, cc_o, cc_g = jnp.split(conv, 4, axis=1)
    i = jax.nn.sigmoid(cc_i)
    f = jax.nn.sigmoid(cc_f)
    o = jax.nn.sigmoid(cc_o)
    g = jnp.tanh(cc_g)
    c_next = f * c_cur + i * g
    h_next = o * jnp.tanh(c_next)
    return h_next, c_next


if __name__ == "__main__":
    key = jax.random.PRNGKey(0)
    # Shapes implied by the Network: moduleLSTM = ConvLSTM(input_dim=6, hidden_dim=16)
    # fed with cat([residual_f, residual_b], dim=1) (3 + 3 channels).
    B, Cin, H, W = 2, 6, 16, 16
    hidden = 16
    kh, kw = 3, 3
    T = 4  # frames the external training loop would iterate over

    k1, k2, k3, k4, k5 = jax.random.split(key, 5)
    x_seq_nchw = jax.random.normal(k1, (B, T, Cin, H, W), jnp.float32)
    h0 = jax.random.normal(k2, (B, hidden, H, W), jnp.float32)
    c0 = jax.random.normal(k3, (B, hidden, H, W), jnp.float32)

    # Deterministic nn.Conv2d-style init: U(-1/sqrt(fan_in), 1/sqrt(fan_in)).
    fan_in = (Cin + hidden) * kh * kw
    bound = 1.0 / (fan_in ** 0.5)
    weight = jax.random.uniform(k4, (4 * hidden, Cin + hidden, kh, kw),
                                jnp.float32, -bound, bound)
    bias = jax.random.uniform(k5, (4 * hidden,), jnp.float32, -bound, bound)

    # ---- single-step path (exact ConvLSTMCell.forward / per-frame Network use)
    step = jax.jit(lambda xx, hh, cc, ww, bb:
                   conv_lstm_cell(xx, hh, cc, ww, bb, (kh, kw)))
    h1, c1 = step(x_seq_nchw[:, 0], h0, c0, weight, bias)
    jax.block_until_ready((h1, c1))

    h1_ref, c1_ref = _reference(x_seq_nchw[:, 0], h0, c0, weight, bias)
    assert h1.shape == (B, hidden, H, W) and c1.shape == (B, hidden, H, W)
    # bf16 MXU operands + f32 accumulate vs. pure-f32 reference.
    assert jnp.allclose(h1, h1_ref, rtol=2e-2, atol=2e-2), \
        float(jnp.max(jnp.abs(h1 - h1_ref)))
    assert jnp.allclose(c1, c1_ref, rtol=2e-2, atol=2e-2), \
        float(jnp.max(jnp.abs(c1 - c1_ref)))

    # ---- fused multi-timestep path: one pallas_call, (h, c) VMEM-resident.
    x_seq_nhwc = jnp.transpose(x_seq_nchw, (0, 1, 3, 4, 2))
    h0_nhwc = jnp.transpose(h0, (0, 2, 3, 1))
    c0_nhwc = jnp.transpose(c0, (0, 2, 3, 1))
    seq = jax.jit(lambda xs, hh, cc, ww, bb:
                  conv_lstm_seq_nhwc(xs, hh, cc, ww, bb, (kh, kw)))
    h_seq, (h_last, c_last) = seq(x_seq_nhwc, h0_nhwc, c0_nhwc, weight, bias)
    jax.block_until_ready((h_seq, h_last, c_last))

    # Pure-JAX reference scan over timesteps.
    h_ref, c_ref = h0, c0
    hs_ref = []
    for t in range(T):
        h_ref, c_ref = _reference(x_seq_nchw[:, t], h_ref, c_ref, weight, bias)
        hs_ref.append(h_ref)
    hseq_ref = jnp.transpose(jnp.stack(hs_ref, axis=1), (0, 1, 3, 4, 2))
    hlast_ref = jnp.transpose(h_ref, (0, 2, 3, 1))
    clast_ref = jnp.transpose(c_ref, (0, 2, 3, 1))

    # bf16 per-step hidden + bf16 recurrent feedback accumulate a bit of error
    # over T steps vs. the pure-f32 reference.
    assert jnp.allclose(h_seq.astype(jnp.float32), hseq_ref, rtol=6e-2, atol=6e-2), \
        float(jnp.max(jnp.abs(h_seq.astype(jnp.float32) - hseq_ref)))
    assert jnp.allclose(h_last, hlast_ref, rtol=6e-2, atol=6e-2), \
        float(jnp.max(jnp.abs(h_last - hlast_ref)))
    assert jnp.allclose(c_last, clast_ref, rtol=6e-2, atol=6e-2), \
        float(jnp.max(jnp.abs(c_last - clast_ref)))

    print("KERNEL_OK")
</pallas_src>

<mosaic_0001>
module attributes {stable_mosaic.version = 11 : i64} {
  func.func @convlstm_seq_kernel(%arg0: i32, %arg1: i32, %arg2: memref<1x1x18x18x6xbf16, #tpu.memory_space<vmem>>, %arg3: memref<1x16x16x16xf32, #tpu.memory_space<vmem>>, %arg4: memref<1x16x16x16xf32, #tpu.memory_space<vmem>>, %arg5: memref<3x66x64xbf16, #tpu.memory_space<vmem>>, %arg6: memref<1x64xf32, #tpu.memory_space<vmem>>, %arg7: memref<1x1x16x16x16xbf16, #tpu.memory_space<vmem>>, %arg8: memref<1x16x16x32xf32, #tpu.memory_space<vmem>>, %arg9: memref<18x18x16xbf16, #tpu.memory_space<vmem>>, %arg10: memref<256x16xf32, #tpu.memory_space<vmem>>) attributes {dimension_semantics = [#tpu.dimension_semantics<parallel>, #tpu.dimension_semantics<arbitrary>], iteration_bounds = array<i64: 2, 1>, scalar_prefetch = 0 : i64, scratch_operands = 2 : i64, tpu.core_type = #tpu.core_type<tc>, window_params = [{transform_indices = @transform_0, window_bounds = array<i64: 1, 1, 18, 18, 6>}, {transform_indices = @transform_1, window_bounds = array<i64: 1, 16, 16, 16>}, {transform_indices = @transform_2, window_bounds = array<i64: 1, 16, 16, 16>}, {pipeline_mode = #tpu.pipeline_mode<synchronous>, transform_indices = @transform_3, window_bounds = array<i64: 3, 66, 64>}, {pipeline_mode = #tpu.pipeline_mode<synchronous>, transform_indices = @transform_4, window_bounds = array<i64: 1, 64>}, {transform_indices = @transform_5, window_bounds = array<i64: 1, 1, 16, 16, 16>}, {transform_indices = @transform_6, window_bounds = array<i64: 1, 16, 16, 32>}]} {
    %c0_i32 = arith.constant 0 : i32
    %0 = arith.cmpi eq, %arg1, %c0_i32 : i32
    %1 = arith.extui %0 : i1 to i32
    %c0_i32_0 = arith.constant 0 : i32
    %2 = arith.cmpi ne, %1, %c0_i32_0 : i32
    scf.if %2 {
      %cst_52 = arith.constant 0.000000e+00 : bf16
      %71 = vector.broadcast %cst_52 : bf16 to vector<18x18x16xbf16>
      %c0_53 = arith.constant 0 : index
      %c0_54 = arith.constant 0 : index
      %c0_55 = arith.constant 0 : index
      %72 = vector.load %arg9[%c0_53, %c0_54, %c0_55] : memref<18x18x16xbf16, #tpu.memory_space<vmem>>, vector<18x18x16xbf16>
      tpu.vector_store %arg9[%c0_53, %c0_54, %c0_55], %71 {strides = array<i32>} : memref<18x18x16xbf16, #tpu.memory_space<vmem>>, vector<18x18x16xbf16>,
      %c0_56 = arith.constant 0 : index
      %c0_57 = arith.constant 0 : index
      %c0_58 = arith.constant 0 : index
      %c0_59 = arith.constant 0 : index
      %73 = vector.load %arg3[%c0_56, %c0_57, %c0_58, %c0_59] : memref<1x16x16x16xf32, #tpu.memory_space<vmem>>, vector<1x16x16x16xf32>
      %74 = vector.shape_cast %73 : vector<1x16x16x16xf32> to vector<16x16x16xf32>
      %75 = arith.truncf %74 : vector<16x16x16xf32> to vector<16x16x16xbf16>
      %c1_60 = arith.constant 1 : index
      %c1_61 = arith.constant 1 : index
      %c0_62 = arith.constant 0 : index
      %76 = vector.load %arg9[%c1_60, %c1_61, %c0_62] : memref<18x18x16xbf16, #tpu.memory_space<vmem>>, vector<16x16x16xbf16>
      tpu.vector_store %arg9[%c1_60, %c1_61, %c0_62], %75 {strides = array<i32>} : memref<18x18x16xbf16, #tpu.memory_space<vmem>>, vector<16x16x16xbf16>,
      %c0_63 = arith.constant 0 : index
      %c0_64 = arith.constant 0 : index
      %c0_65 = arith.constant 0 : index
      %c0_66 = arith.constant 0 : index
      %77 = vector.load %arg4[%c0_63, %c0_64, %c0_65, %c0_66] : memref<1x16x16x16xf32, #tpu.memory_space<vmem>>, vector<1x16x16x16xf32>
      %78 = vector.shape_cast %77 : vector<1x16x16x16xf32> to vector<16x16x16xf32>
      %79 = vector.shape_cast %78 : vector<16x16x16xf32> to vector<256x16xf32>
      %c0_67 = arith.constant 0 : index
      %c0_68 = arith.constant 0 : index
      %80 = vector.load %arg10[%c0_67, %c0_68] : memref<256x16xf32, #tpu.memory_space<vmem>>, vector<256x16xf32>
      tpu.vector_store %arg10[%c0_67, %c0_68], %79 {strides = array<i32>} : memref<256x16xf32, #tpu.memory_space<vmem>>, vector<256x16xf32>,
    } else {
    }
    %c0 = arith.constant 0 : index
    %c0_1 = arith.constant 0 : index
    %c0_2 = arith.constant 0 : index
    %c0_3 = arith.constant 0 : index
    %c0_4 = arith.constant 0 : index
    %3 = vector.load %arg2[%c0, %c0_1, %c0_2, %c0_3, %c0_4] : memref<1x1x18x18x6xbf16, #tpu.memory_space<vmem>>, vector<1x1x18x16x6xbf16>
    %4 = vector.shape_cast %3 : vector<1x1x18x16x6xbf16> to vector<18x16x6xbf16>
    %5 = vector.shape_cast %4 : vector<18x16x6xbf16> to vector<288x6xbf16>
    %c0_5 = arith.constant 0 : index
    %c0_6 = arith.constant 0 : index
    %c0_7 = arith.constant 0 : index
    %6 = vector.load %arg9[%c0_5, %c0_6, %c0_7] : memref<18x18x16xbf16, #tpu.memory_space<vmem>>, vector<18x16x16xbf16>
    %7 = vector.shape_cast %6 : vector<18x16x16xbf16> to vector<288x16xbf16>
    %c0_8 = arith.constant 0 : index
    %c0_9 = arith.constant 0 : index
    %c0_10 = arith.constant 0 : index
    %c1 = arith.constant 1 : index
    %c0_11 = arith.constant 0 : index
    %8 = vector.load %arg2[%c0_8, %c0_9, %c0_10, %c1, %c0_11] : memref<1x1x18x18x6xbf16, #tpu.memory_space<vmem>>, vector<1x1x18x16x6xbf16>
    %9 = vector.shape_cast %8 : vector<1x1x18x16x6xbf16> to vector<18x16x6xbf16>
    %10 = vector.shape_cast %9 : vector<18x16x6xbf16> to vector<288x6xbf16>
    %c0_12 = arith.constant 0 : index
    %c1_13 = arith.constant 1 : index
    %c0_14 = arith.constant 0 : index
    %11 = vector.load %arg9[%c0_12, %c1_13, %c0_14] : memref<18x18x16xbf16, #tpu.memory_space<vmem>>, vector<18x16x16xbf16>
    %12 = vector.shape_cast %11 : vector<18x16x16xbf16> to vector<288x16xbf16>
    %c0_15 = arith.constant 0 : index
    %c0_16 = arith.constant 0 : index
    %c0_17 = arith.constant 0 : index
    %c2 = arith.constant 2 : index
    %c0_18 = arith.constant 0 : index
    %13 = vector.load %arg2[%c0_15, %c0_16, %c0_17, %c2, %c0_18] : memref<1x1x18x18x6xbf16, #tpu.memory_space<vmem>>, vector<1x1x18x16x6xbf16>
    %14 = vector.shape_cast %13 : vector<1x1x18x16x6xbf16> to vector<18x16x6xbf16>
    %15 = vector.shape_cast %14 : vector<18x16x6xbf16> to vector<288x6xbf16>
    %c0_19 = arith.constant 0 : index
    %c2_20 = arith.constant 2 : index
    %c0_21 = arith.constant 0 : index
    %16 = vector.load %arg9[%c0_19, %c2_20, %c0_21] : memref<18x18x16xbf16, #tpu.memory_space<vmem>>, vector<18x16x16xbf16>
    %17 = vector.shape_cast %16 : vector<18x16x16xbf16> to vector<288x16xbf16>
    %18 = tpu.concatenate %5, %7, %10, %12, %15, %17 in 1 : vector<288x6xbf16>, vector<288x16xbf16>, vector<288x6xbf16>, vector<288x16xbf16>, vector<288x6xbf16>, vector<288x16xbf16> -> vector<288x66xbf16>
    %c0_22 = arith.constant 0 : index
    %c0_23 = arith.constant 0 : index
    %19 = vector.load %arg6[%c0_22, %c0_23] : memref<1x64xf32, #tpu.memory_space<vmem>>, vector<1x64xf32>
    %20 = vector.shape_cast %19 : vector<1x64xf32> to vector<1x64xf32>
    %21 = vector.broadcast %20 : vector<1x64xf32> to vector<256x64xf32>
    %22 = vector.extract_strided_slice %18 {offsets = [0, 0], sizes = [256, 66], strides = [1, 1]} : vector<288x66xbf16> to vector<256x66xbf16>
    %c0_24 = arith.constant 0 : index
    %c0_25 = arith.constant 0 : index
    %c0_26 = arith.constant 0 : index
    %23 = vector.load %arg5[%c0_24, %c0_25, %c0_26] : memref<3x66x64xbf16, #tpu.memory_space<vmem>>, vector<1x66x64xbf16>
    %24 = vector.shape_cast %23 : vector<1x66x64xbf16> to vector<66x64xbf16>
    %cst = arith.constant dense<0.000000e+00> : vector<256x64xf32>
    %25 = tpu.matmul %22, %24, %cst {dimension_numbers = #tpu.dot_dimension_numbers<[1], [0], [0], [1], [0, 0, 1, 1], [], []>} : vector<256x66xbf16>, vector<66x64xbf16>, vector<256x64xf32> -> vector<256x64xf32>
    %26 = arith.addf %21, %25 : vector<256x64xf32>
    %27 = vector.extract_strided_slice %18 {offsets = [16, 0], sizes = [256, 66], strides = [1, 1]} : vector<288x66xbf16> to vector<256x66xbf16>
    %c1_27 = arith.constant 1 : index
    %c0_28 = arith.constant 0 : index
    %c0_29 = arith.constant 0 : index
    %28 = vector.load %arg5[%c1_27, %c0_28, %c0_29] : memref<3x66x64xbf16, #tpu.memory_space<vmem>>, vector<1x66x64xbf16>
    %29 = vector.shape_cast %28 : vector<1x66x64xbf16> to vector<66x64xbf16>
    %cst_30 = arith.constant dense<0.000000e+00> : vector<256x64xf32>
    %30 = tpu.matmul %27, %29, %cst_30 {dimension_numbers = #tpu.dot_dimension_numbers<[1], [0], [0], [1], [0, 0, 1, 1], [], []>} : vector<256x66xbf16>, vector<66x64xbf16>, vector<256x64xf32> -> vector<256x64xf32>
    %31 = arith.addf %26, %30 : vector<256x64xf32>
    %32 = vector.extract_strided_slice %18 {offsets = [32, 0], sizes = [256, 66], strides = [1, 1]} : vector<288x66xbf16> to vector<256x66xbf16>
    %c2_31 = arith.constant 2 : index
    %c0_32 = arith.constant 0 : index
    %c0_33 = arith.constant 0 : index
    %33 = vector.load %arg5[%c2_31, %c0_32, %c0_33] : memref<3x66x64xbf16, #tpu.memory_space<vmem>>, vector<1x66x64xbf16>
    %34 = vector.shape_cast %33 : vector<1x66x64xbf16> to vector<66x64xbf16>
    %cst_34 = arith.constant dense<0.000000e+00> : vector<256x64xf32>
    %35 = tpu.matmul %32, %34, %cst_34 {dimension_numbers = #tpu.dot_dimension_numbers<[1], [0], [0], [1], [0, 0, 1, 1], [], []>} : vector<256x66xbf16>, vector<66x64xbf16>, vector<256x64xf32> -> vector<256x64xf32>
    %36 = arith.addf %31, %35 : vector<256x64xf32>
    %37 = tpu.iota {dimensions = array<i32: 1>} : vector<256x64xi32>
    %c48_i32 = arith.constant 48 : i32
    %38 = vector.broadcast %c48_i32 : i32 to vector<256x64xi32>
    %39 = arith.cmpi slt, %37, %38 : vector<256x64xi32>
    %cst_35 = arith.constant 5.000000e-01 : f32
    %40 = vector.broadcast %cst_35 : f32 to vector<256x64xf32>
    %41 = arith.mulf %40, %36 : vector<256x64xf32>
    %42 = arith.select %39, %41, %36 : vector<256x64xi1>, vector<256x64xf32>
    %43 = math.tanh %42 : vector<256x64xf32>
    %cst_36 = arith.constant 1.000000e+00 : f32
    %44 = vector.broadcast %cst_36 : f32 to vector<256x64xf32>
    %45 = arith.addf %43, %44 : vector<256x64xf32>
    %cst_37 = arith.constant 5.000000e-01 : f32
    %46 = vector.broadcast %cst_37 : f32 to vector<256x64xf32>
    %47 = arith.mulf %46, %45 : vector<256x64xf32>
    %48 = arith.select %39, %47, %43 : vector<256x64xi1>, vector<256x64xf32>
    %49 = vector.extract_strided_slice %48 {offsets = [0, 0], sizes = [256, 16], strides = [1, 1]} : vector<256x64xf32> to vector<256x16xf32>
    %50 = vector.extract_strided_slice %48 {offsets = [0, 16], sizes = [256, 16], strides = [1, 1]} : vector<256x64xf32> to vector<256x16xf32>
    %51 = vector.extract_strided_slice %48 {offsets = [0, 32], sizes = [256, 16], strides = [1, 1]} : vector<256x64xf32> to vector<256x16xf32>
    %52 = vector.extract_strided_slice %48 {offsets = [0, 48], sizes = [256, 16], strides = [1, 1]} : vector<256x64xf32> to vector<256x16xf32>
    %c0_38 = arith.constant 0 : index
    %c0_39 = arith.constant 0 : index
    %53 = vector.load %arg10[%c0_38, %c0_39] : memref<256x16xf32, #tpu.memory_space<vmem>>, vector<256x16xf32>
    %54 = arith.mulf %50, %53 : vector<256x16xf32>
    %55 = arith.mulf %49, %52 : vector<256x16xf32>
    %56 = arith.addf %54, %55 : vector<256x16xf32>
    %57 = math.tanh %56 : vector<256x16xf32>
    %58 = arith.mulf %51, %57 : vector<256x16xf32>
    %c0_40 = arith.constant 0 : index
    %c0_41 = arith.constant 0 : index
    %59 = vector.load %arg10[%c0_40, %c0_41] : memref<256x16xf32, #tpu.memory_space<vmem>>, vector<256x16xf32>
    tpu.vector_store %arg10[%c0_40, %c0_41], %56 {strides = array<i32>} : memref<256x16xf32, #tpu.memory_space<vmem>>, vector<256x16xf32>,
    %60 = vector.shape_cast %58 : vector<256x16xf32> to vector<16x16x16xf32>
    %61 = arith.truncf %60 : vector<16x16x16xf32> to vector<16x16x16xbf16>
    %c1_42 = arith.constant 1 : index
    %c1_43 = arith.constant 1 : index
    %c0_44 = arith.constant 0 : index
    %62 = vector.load %arg9[%c1_42, %c1_43, %c0_44] : memref<18x18x16xbf16, #tpu.memory_space<vmem>>, vector<16x16x16xbf16>
    tpu.vector_store %arg9[%c1_42, %c1_43, %c0_44], %61 {strides = array<i32>} : memref<18x18x16xbf16, #tpu.memory_space<vmem>>, vector<16x16x16xbf16>,
    %63 = vector.shape_cast %58 : vector<256x16xf32> to vector<16x16x16xf32>
    %64 = arith.truncf %63 : vector<16x16x16xf32> to vector<16x16x16xbf16>
    %c0_45 = arith.constant 0 : index
    %c0_46 = arith.constant 0 : index
    %c0_47 = arith.constant 0 : index
    %c0_48 = arith.constant 0 : index
    %c0_49 = arith.constant 0 : index
    %65 = vector.load %arg7[%c0_45, %c0_46, %c0_47, %c0_48, %c0_49] : memref<1x1x16x16x16xbf16, #tpu.memory_space<vmem>>, vector<1x1x16x16x16xbf16>
    %66 = vector.shape_cast %65 : vector<1x1x16x16x16xbf16> to vector<16x16x16xbf16>
    %67 = vector.shape_cast %64 : vector<16x16x16xbf16> to vector<1x1x16x16x16xbf16>
    tpu.vector_store %arg7[%c0_45, %c0_46, %c0_47, %c0_48, %c0_49], %67 {strides = array<i32>} : memref<1x1x16x16x16xbf16, #tpu.memory_space<vmem>>, vector<1x1x16x16x16xbf16>,
    %c0_i32_50 = arith.constant 0 : i32
    %68 = arith.cmpi eq, %arg1, %c0_i32_50 : i32
    %69 = arith.extui %68 : i1 to i32
    %c0_i32_51 = arith.constant 0 : i32
    %70 = arith.cmpi ne, %69, %c0_i32_51 : i32
    scf.if %70 {
      %71 = tpu.concatenate %58, %56 in 1 : vector<256x16xf32>, vector<256x16xf32> -> vector<256x32xf32>
      %72 = vector.shape_cast %71 : vector<256x32xf32> to vector<16x16x32xf32>
      %c0_52 = arith.constant 0 : index
      %c0_53 = arith.constant 0 : index
      %c0_54 = arith.constant 0 : index
      %c0_55 = arith.constant 0 : index
      %73 = vector.load %arg8[%c0_52, %c0_53, %c0_54, %c0_55] : memref<1x16x16x32xf32, #tpu.memory_space<vmem>>, vector<1x16x16x32xf32>
      %74 = vector.shape_cast %73 : vector<1x16x16x32xf32> to vector<16x16x32xf32>
      %75 = vector.shape_cast %72 : vector<16x16x32xf32> to vector<1x16x16x32xf32>
      tpu.vector_store %arg8[%c0_52, %c0_53, %c0_54, %c0_55], %75 {strides = array<i32>} : memref<1x16x16x32xf32, #tpu.memory_space<vmem>>, vector<1x16x16x32xf32>,
    } else {
    }
    return
  }
  func.func @transform_0(%arg0: i32, %arg1: i32) -> (i32, i32, i32, i32, i32) {
    %c0_i32 = arith.constant 0 : i32
    %c0_i32_0 = arith.constant 0 : i32
    %c0_i32_1 = arith.constant 0 : i32
    %c0_i32_2 = arith.constant 0 : i32
    return %arg0, %arg1, %c0_i32, %c0_i32_0, %c0_i32_1 : i32, i32, i32, i32, i32
  }
  func.func @transform_1(%arg0: i32, %arg1: i32) -> (i32, i32, i32, i32) {
    %c0_i32 = arith.constant 0 : i32
    %c0_i32_0 = arith.constant 0 : i32
    %c0_i32_1 = arith.constant 0 : i32
    %c0_i32_2 = arith.constant 0 : i32
    return %arg0, %c0_i32, %c0_i32_0, %c0_i32_1 : i32, i32, i32, i32
  }
  func.func @transform_2(%arg0: i32, %arg1: i32) -> (i32, i32, i32, i32) {
    %c0_i32 = arith.constant 0 : i32
    %c0_i32_0 = arith.constant 0 : i32
    %c0_i32_1 = arith.constant 0 : i32
    %c0_i32_2 = arith.constant 0 : i32
    return %arg0, %c0_i32, %c0_i32_0, %c0_i32_1 : i32, i32, i32, i32
  }
  func.func @transform_3(%arg0: i32, %arg1: i32) -> (i32, i32, i32) {
    %c0_i32 = arith.constant 0 : i32
    %c0_i32_0 = arith.constant 0 : i32
    %c0_i32_1 = arith.constant 0 : i32
    %c0_i32_2 = arith.constant 0 : i32
    return %c0_i32, %c0_i32_0, %c0_i32_1 : i32, i32, i32
  }
  func.func @transform_4(%arg0: i32, %arg1: i32) -> (i32, i32) {
    %c0_i32 = arith.constant 0 : i32
    %c0_i32_0 = arith.constant 0 : i32
    %c0_i32_1 = arith.constant 0 : i32
    return %c0_i32, %c0_i32_0 : i32, i32
  }
  func.func @transform_5(%arg0: i32, %arg1: i32) -> (i32, i32, i32, i32, i32) {
    %c0_i32 = arith.constant 0 : i32
    %c0_i32_0 = arith.constant 0 : i32
    %c0_i32_1 = arith.constant 0 : i32
    %c0_i32_2 = arith.constant 0 : i32
    return %arg0, %arg1, %c0_i32, %c0_i32_0, %c0_i32_1 : i32, i32, i32, i32, i32
  }
  func.func @transform_6(%arg0: i32, %arg1: i32) -> (i32, i32, i32, i32) {
    %c0_i32 = arith.constant 0 : i32
    %c0_i32_0 = arith.constant 0 : i32
    %c0_i32_1 = arith.constant 0 : i32
    %c0_i32_2 = arith.constant 0 : i32
    return %arg0, %c0_i32, %c0_i32_0, %c0_i32_1 : i32, i32, i32, i32
  }
}

</mosaic_0001>

<bundles_post_ra>
// kernel: _lambda_.1
= control target key start
LH: loop header
LB: loop body
LE: loop exit
PB: predicated region body
PF: predicated region fallthrough
CT: control target
= control target key end

     0   :  { %12 = vsyncpa [#allocation5], 0  ;;  %s10503_s0 = inlined_call_operand.vmem [shape: bf16[2,1,18,18,6], index: 0, kind: input, shape index: {}]   ;;  %s10504_s1 = inlined_call_operand.vmem [shape: f32[2,16,16,16], index: 1, kind: input, shape index: {}]   ;;  %s10505_s2 = inlined_call_operand.vmem [shape: f32[2,16,16,16], index: 2, kind: input, shape index: {}]   ;;  %s10506_s3 = inlined_call_operand.vmem [shape: bf16[3,66,64], index: 3, kind: input, shape index: {}]   ;;  %s10507_s4 = inlined_call_operand.vmem [shape: f32[1,64], index: 4, kind: input, shape index: {}]   ;;  %s10508_s5 = inlined_call_operand.hbm [shape: bf16[2,1,16,16,16], index: 5, kind: output, shape index: {0}]   ;;  %s10509_s6 = inlined_call_operand.vmem [shape: f32[2,16,16,32], index: 6, kind: output, shape index: {1}]  }
   0x1   :  { %14 = vsyncpa [#allocation5 + $0x1], 0  ;;  %s7175_s21 = smov 0   ;;  %s7177_s22 = smov 0  }
   0x2   :  { %s7179_s23 = smov 0   ;;  %s7181_s24 = smov 0  }
   0x3   :  { %s7183_s25 = smov 0   ;;  %s7185_s26 = smov 0  }
   0x4 LB: > { %s6059_s27 = sadd.s32 4294967295, %s7125_s26   ;;  %s6060_s28 = sadd.s32 4294967294, %s7125_s26   ;;  %s7125_s26 = sphi %s7185_s26, %s20_s26   ;;  %s7121_s25 = sphi %s7183_s25, %s10684_s25   ;;  %s7117_s24 = sphi %s7181_s24, %s10683_s24   ;;  %s7113_s23 = sphi %s7179_s23, %s10682_s23   ;;  %s7109_s22 = sphi %s7177_s22, %s10681_s22   ;;  %s7105_s21 = sphi %s7175_s21, %s10680_s21  }
   0x5   : > { %s32_s29 = sadd.s32 1, %s7121_s25  ;;  %s163_s30 = sadd.s32 1, %s7113_s23 }
   0x6   : > { %p34_p0 = scmp.ge.s32.totalorder %s32_s29, 2  ;;  %p173_p1 = scmp.ne.s32.totalorder %s7113_s23, %s7109_s22 }
   0x7   : > { %p174_p2 = scmp.eq.s32.totalorder %s6059_s27, 1  ;;  %p179_p3 = scmp.ne.s32.totalorder %s7109_s22, %s7105_s21 }
   0x8   : > { %s10686_s29 = smov (%p34_p0, %s32_s29), 0  ;;  %p180_p5 = scmp.eq.s32.totalorder %s6060_s28, 1 }
   0x9   : > { %p7215_p4 = por %p174_p2, %p173_p1  ;;  %s158_s8 = ssub.s32 %s7121_s25, %s10686_s29 }
   0xa   : > { %p6063_p6 = scmp.ge.s32.totalorder %s7125_s26, 1  ;;  %p161_p7 = scmp.eq.s32.totalorder %s158_s8, 0 }
   0xb   : > { %p7222_p8 = por %p180_p5, %p179_p3  ;;  %p258_p9 = scmp.lt.s32.totalorder %s7125_s26, 3 }
   0xc   : > { %s7228_s10 = scalar_select %p161_p7, %s7113_s23, %s163_s30  }
   0xd   : > { %p259_p10 = pnand %p6063_p6, %p258_p9 }
   0xf   : > { %262 = sbr.rel (%p259_p10) target bundleno = 1344 (0x540), region = 40 }
  0x16   : > { %vm336_vm0 = vcmask 125952   ;;  %p307_p11 = scmp.lt.s32.totalorder %s7117_s24, 1  ;;  %v10510_v0 = vmov 0   ;;  %vm520_vm1 = vsmask.f32 256  ;;  %s7128_s16 = smov 6  }
  0x17   : > { %337 = vst.msk [vmem:[#allocation2] sm:$0xf] %vm336_vm0, %v10510_v0  ;;  %338 = vst.msk [vmem:[#allocation2 + $0x4] sm:$0xf] %vm336_vm0, %v10510_v0  ;;  %vm521_vm2 = vsmask.f32 4368 }
  0x18   : > { %341 = vst.msk [vmem:[#allocation2 + $0xc] sm:$0xf] %vm336_vm0, %v10510_v0  ;;  %342 = vst.msk [vmem:[#allocation2 + $0x10] sm:$0xf] %vm336_vm0, %v10510_v0  ;;  %s7306_s11 = scalar_select %p307_p11, %s7117_s24, 1  ;;  %v10545_v20 = vmov 0 }
  0x19   : > { %344 = vst.msk [vmem:[#allocation2 + $0x18] sm:$0xf] %vm336_vm0, %v10510_v0  ;;  %345 = vst.msk [vmem:[#allocation2 + $0x1c] sm:$0xf] %vm336_vm0, %v10510_v0  ;;  %vm845_vm3 = vsmask.f32 7938 }
  0x1a   : > { %347 = vst.msk [vmem:[#allocation2 + $0x24] sm:$0xf] %vm336_vm0, %v10510_v0  ;;  %348 = vst.msk [vmem:[#allocation2 + $0x28] sm:$0xf] %vm336_vm0, %v10510_v0  ;;  %s7309_s12 = sshll.u32 %s7306_s11, 8  ;;  %v10548_v25 = vmov 0 }
  0x1b   : > { %350 = vst.msk [vmem:[#allocation2 + $0x30] sm:$0xf] %vm336_vm0, %v10510_v0  ;;  %351 = vst.msk [vmem:[#allocation2 + $0x34] sm:$0xf] %vm336_vm0, %v10510_v0  ;;  %s7315_s15 = scalar_lea.vmem %s10504_s1, %s7309_s12  ;;  %s6734_s17 = smul.u32 216, %s7306_s11  ;;  %vm339_vm9 = vcmask 122880  }
  0x1c   : > { %353 = vst.msk [vmem:[#allocation2 + $0x3c] sm:$0xf] %vm336_vm0, %v10510_v0  ;;  %354 = vst.msk [vmem:[#allocation2 + $0x40] sm:$0xf] %vm336_vm0, %v10510_v0  ;;  %v394_v1 = vld [vmem:[%s7315_s15 + $0x10] sm:$0xff]  ;;  %v395_v2 = vld [vmem:[%s7315_s15 + $0x18] sm:$0xff]  ;;  %s8832_s14 = scalar_lea.vmem %s10505_s2, %s7309_s12 }
  0x1d   : > { %356 = vst.msk [vmem:[#allocation2 + $0x48] sm:$0xf] %vm336_vm0, %v10510_v0  ;;  %357 = vst.msk [vmem:[#allocation2 + $0x4c] sm:$0xf] %vm336_vm0, %v10510_v0  ;;  %v392_v3 = vld [vmem:[%s7315_s15] sm:$0xff]  ;;  %v6372_v4 = vpack.c.bf16 %v394_v1, %v394_v1  ;;  %v6373_v5 = vpack.c.bf16 %v395_v2, %v395_v2  ;;  %v393_v6 = vld [vmem:[%s7315_s15 + $0x8] sm:$0xff]  ;;  %s7547_s20 = scalar_lea.vmem %s10503_s0, %s6734_s17 }
  0x1e   : > { %359 = vst.msk [vmem:[#allocation2 + $0x54] sm:$0xf] %vm336_vm0, %v10510_v0  ;;  %360 = vst.msk [vmem:[#allocation2 + $0x58] sm:$0xf] %vm336_vm0, %v10510_v0  ;;  %v6370_v7 = vpack.c.bf16 %v392_v3, %v392_v3  ;;  %v396_v8 = vld [vmem:[%s7315_s15 + $0x20] sm:$0xff]  ;;  %v6371_v12 = vpack.c.bf16 %v393_v6, %v393_v6  ;;  %v397_v13 = vld [vmem:[%s7315_s15 + $0x28] sm:$0xff] }
  0x1f   : > { %362 = vst.msk [vmem:[#allocation2 + $0x60] sm:$0xf] %vm336_vm0, %v10510_v0  ;;  %363 = vst.msk [vmem:[#allocation2 + $0x64] sm:$0xf] %vm336_vm0, %v10510_v0  ;;  %v7322_v9 = vld [vmem:[#allocation2] sm:$0xf]  ;;  %v6374_v14 = vpack.c.bf16 %v396_v8, %v396_v8  ;;  %v6375_v24 = vpack.c.bf16 %v397_v13, %v397_v13 }
  0x20   : > { %365 = vst.msk [vmem:[#allocation2 + $0x6c] sm:$0xf] %vm336_vm0, %v10510_v0  ;;  %366 = vst.msk [vmem:[#allocation2 + $0x70] sm:$0xf] %vm336_vm0, %v10510_v0  ;;  %v7324_v10 = vld [vmem:[#allocation2 + $0x4] sm:$0xf] }
  0x21   : > { %368 = vst.msk [vmem:[#allocation2 + $0x78] sm:$0xf] %vm336_vm0, %v10510_v0  ;;  %369 = vst.msk [vmem:[#allocation2 + $0x7c] sm:$0xf] %vm336_vm0, %v10510_v0  ;;  %v6158_v11 = vcombine.low %v7322_v9, %v7324_v10  ;;  %v541_v15 = vshrl.u32 %v6372_v4, 16  ;;  %v544_v16 = vshll.u32 %v6372_v4, 16 }
  0x22   : > { %371 = vst.msk [vmem:[#allocation2 + $0x84] sm:$0xf] %vm336_vm0, %v10510_v0  ;;  %372 = vst.msk [vmem:[#allocation2 + $0x88] sm:$0xf] %vm336_vm0, %v10510_v0  ;;  %v549_v17 = vshrl.u32 %v6373_v5, 16  ;;  %v552_v18 = vshll.u32 %v6373_v5, 16 }
  0x23   : > { %374 = vst.msk [vmem:[#allocation2 + $0x90] sm:$0xf] %vm336_vm0, %v10510_v0  ;;  %375 = vst.msk [vmem:[#allocation2 + $0x94] sm:$0xf] %vm336_vm0, %v10510_v0  ;;  %2544 = vrot.lane.b32.xlu0 %v6158_v11, %s7128_s16  ;;  %v524_v19 = vshrl.u32 %v6370_v7, 16  ;;  %v543_v21 = vrot.slane %v541_v15, 7 }
  0x24   : > { %377 = vst.msk [vmem:[#allocation2 + $0x9c] sm:$0xf] %vm336_vm0, %v10510_v0  ;;  %378 = vst.msk [vmem:[#allocation2 + $0xa0] sm:$0xf] %vm336_vm0, %v10510_v0  ;;  %v7335_v22 = vrot.slane %v549_v17, 7  ;;  %v527_v23 = vshll.u32 %v6370_v7, 16 }
  0x25   : > { %380 = vst.msk [vmem:[#allocation2 + $0xa8] sm:$0xf] %vm336_vm0, %v10510_v0  ;;  %381 = vst.msk [vmem:[#allocation2 + $0xac] sm:$0xf] %vm336_vm0, %v10510_v0  ;;  %v856_v26 = vld [vmem:[#allocation2 + $0x18] sm:$0xf]  ;;  %v546_v31 = vor.u32 %v544_v16, %v543_v21 }
  0x26   : > { %383 = vst.msk [vmem:[#allocation2 + $0xb4] sm:$0xf] %vm336_vm0, %v10510_v0  ;;  %384 = vst.msk [vmem:[#allocation2 + $0xb8] sm:$0xf] %vm336_vm0, %v10510_v0  ;;  %v526_v27 = vrot.slane %v524_v19, 7  ;;  %v532_v28 = vshrl.u32 %v6371_v12, 16  ;;  %v554_v33 = vor.u32 %v552_v18, %v7335_v22 }
  0x27   : > { %386 = vst.msk [vmem:[#allocation2 + $0xc0] sm:$0xf] %vm336_vm0, %v10510_v0  ;;  %387 = vst.msk [vmem:[#allocation2 + $0xc4] sm:$0xf] %vm336_vm0, %v10510_v0  ;;  %v535_v29 = vshll.u32 %v6371_v12, 16  ;;  %v558_v30 = vshrl.u32 %v6374_v14, 16 }
  0x28   : > { %389 = vst.msk [vmem:[#allocation2 + $0xcc] sm:$0xf] %vm336_vm0, %v10510_v0  ;;  %390 = vst.msk [vmem:[#allocation2 + $0xd0] sm:$0xf] %vm336_vm0, %v10510_v0  ;;  %v547_v32 = vrot.slane %v543_v21, 4  ;;  %v529_v35 = vor.u32 %v527_v23, %v526_v27  ;;  %v530_v36 = vrot.slane %v526_v27, 4 }
  0x29   : > { %vm7331_vm4 = vmor %vm520_vm1, %vm521_vm2  ;;  %v847_v34 = vld [vmem:[#allocation2 + $0xc] sm:$0xf]  ;;  %v7343_v37 = vrot.slane %v532_v28, 7  ;;  %v398_v38 = vld [vmem:[%s7315_s15 + $0x30] sm:$0xff]  ;;  %v560_v42 = vrot.slane %v558_v30, 7  ;;  %v561_v46 = vshll.u32 %v6374_v14, 16 }
  0x2a   : > { %v10546_v20 = vsel %vm7331_vm4, 4294967295, %v10545_v20  ;;  %vm7338_vm5 = vmand %vm336_vm0, %vm845_vm3  ;;  %v399_v39 = vld [vmem:[%s7315_s15 + $0x38] sm:$0xff]  ;;  %v555_v40 = vsel %vm7331_vm4, %v547_v32, %v554_v33  ;;  %v400_v43 = vld [vmem:[%s7315_s15 + $0x40] sm:$0xff]  ;;  %v566_v47 = vshrl.u32 %v6375_v24, 16  ;;  %v569_v49 = vshll.u32 %v6375_v24, 16  ;;  %s7129_s27 = smov 22  }
  0x2b   : > { %10547 = vst [vmem:[#allocation7_spill] sm:$0xff] %v10546_v20  ;;  %v10549_v25 = vsel %vm7338_vm5, 4294967295, %v10548_v25  ;;  %v857_v41 = vsel %vm7338_vm5, %v546_v31, %v856_v26  ;;  %859 = vst.msk [vmem:[#allocation2 + $0x1c] sm:$0xf] %vm336_vm0, %v555_v40  ;;  %v537_v44 = vor.u32 %v535_v29, %v7343_v37  ;;  %v848_v45 = vsel %vm7338_vm5, %v529_v35, %v847_v34  ;;  %v863_v50 = vld [vmem:[#allocation2 + $0x24] sm:$0xf] }
  0x2c   : > { %10550 = vst [vmem:[#allocation8_spill] sm:$0xff] %v10549_v25  ;;  %858 = vst [vmem:[#allocation2 + $0x18] sm:$0xf] %v857_v41  ;;  %v564_v48 = vrot.slane %v560_v42, 4  ;;  %v6376_v51 = vpack.c.bf16 %v398_v38, %v398_v38  ;;  %v6377_v52 = vpack.c.bf16 %v399_v39, %v399_v39  ;;  %v401_v53 = vld [vmem:[%s7315_s15 + $0x48] sm:$0xff]  ;;  %v563_v55 = vor.u32 %v561_v46, %v560_v42  ;;  %v402_v3 = vld [vmem:[%s7315_s15 + $0x50] sm:$0xff] }
  0x2d   : > { %849 = vst [vmem:[#allocation2 + $0xc] sm:$0xf] %v848_v45  ;;  %v538_v54 = vsel %vm7331_vm4, %v530_v36, %v537_v44  ;;  %v7359_v56 = vrot.slane %v566_v47, 7  ;;  %v6378_v57 = vpack.c.bf16 %v400_v43, %v400_v43  ;;  %v6379_v1 = vpack.c.bf16 %v401_v53, %v401_v53  ;;  %v403_v7 = vld [vmem:[%s7315_s15 + $0x58] sm:$0xff]  ;;  %v870_v11 = vld [vmem:[#allocation2 + $0x30] sm:$0xf]  ;;  %vm7830_vm10 = vmand %vm339_vm9, %vm520_vm1 }
  0x2e   : > { %850 = vst.msk [vmem:[#allocation2 + $0x10] sm:$0xf] %vm336_vm0, %v538_v54  ;;  %v575_v58 = vshrl.u32 %v6376_v51, 16  ;;  %v578_v59 = vshll.u32 %v6376_v51, 16  ;;  %v583_v60 = vshrl.u32 %v6377_v52, 16  ;;  %v586_v61 = vshll.u32 %v6377_v52, 16 }
  0x2f   : > { %v571_v62 = vor.u32 %v569_v49, %v7359_v56  ;;  %v864_v63 = vsel %vm7338_vm5, %v563_v55, %v863_v50  ;;  %v592_v2 = vshrl.u32 %v6378_v57, 16  ;;  %v595_v6 = vshll.u32 %v6378_v57, 16  ;;  %v877_v27 = vld [vmem:[#allocation2 + $0x3c] sm:$0xf]  ;;  %v404_v33 = vld [vmem:[%s7315_s15 + $0x60] sm:$0xff]  ;;  %v405_v38 = vld [vmem:[%s7315_s15 + $0x68] sm:$0xff] }
  0x30   : > { %865 = vst [vmem:[#allocation2 + $0x24] sm:$0xf] %v864_v63  ;;  %v577_v4 = vrot.slane %v575_v58, 7  ;;  %v7366_v5 = vrot.slane %v583_v60, 7  ;;  %v600_v13 = vshrl.u32 %v6379_v1, 16  ;;  %v6380_v19 = vpack.c.bf16 %v402_v3, %v402_v3  ;;  %v406_v52 = vld [vmem:[%s7315_s15 + $0x70] sm:$0xff] }
  0x31   : > { %v572_v8 = vsel %vm7331_vm4, %v564_v48, %v571_v62  ;;  %v594_v12 = vrot.slane %v592_v2, 7  ;;  %v603_v26 = vshll.u32 %v6379_v1, 16  ;;  %v6381_v28 = vpack.c.bf16 %v403_v7, %v403_v7  ;;  %v884_v50 = vld [vmem:[#allocation2 + $0x48] sm:$0xf]  ;;  %v408_v1 = vld [vmem:[%s7315_s15 + $0x80] sm:$0xff]  ;;  %s7130_s28 = smov 28  }
  0x32   : > { %v1067_v15 = vld [vmem:[#allocation2 + $0x1c] sm:$0xf]  ;;  %866 = vst.msk [vmem:[#allocation2 + $0x28] sm:$0xf] %vm336_vm0, %v572_v8  ;;  %v580_v16 = vor.u32 %v578_v59, %v577_v4  ;;  %v581_v17 = vrot.slane %v577_v4, 4  ;;  %v588_v18 = vor.u32 %v586_v61, %v7366_v5  ;;  %v1570_v29 = vshrl.u32 %v7322_v9, 16 }
  0x33   : > { %v7371_v14 = vld [vmem:[#allocation2 + $0x18] sm:$0xf]  ;;  %v597_v24 = vor.u32 %v595_v6, %v594_v12  ;;  %v1573_v30 = vshll.u32 %v7322_v9, 16  ;;  %v598_v35 = vrot.slane %v594_v12, 4  ;;  %v7387_v36 = vrot.slane %v600_v13, 7  ;;  %s7131_s30 = smov 44  }
  0x34   : > { %v6160_v21 = vcombine.low %v7371_v14, %v1067_v15  ;;  %v7376_v23 = vld [vmem:[#allocation2 + $0xc] sm:$0xf]  ;;  %v589_v31 = vsel %vm7331_vm4, %v581_v17, %v588_v18  ;;  %v871_v32 = vsel %vm7338_vm5, %v580_v16, %v870_v11  ;;  %v609_v40 = vshrl.u32 %v6380_v19, 16  ;;  %v407_v59 = vld [vmem:[%s7315_s15 + $0x78] sm:$0xff]  ;;  %v891_v18 = vld [vmem:[#allocation2 + $0x54] sm:$0xf] }
  0x35   : > { %v1065_v34 = vld [vmem:[#allocation2 + $0x10] sm:$0xf]  ;;  %872 = vst [vmem:[#allocation2 + $0x30] sm:$0xf] %v871_v32  ;;  %873 = vst.msk [vmem:[#allocation2 + $0x34] sm:$0xf] %vm336_vm0, %v589_v31  ;;  %v878_v9 = vsel %vm7338_vm5, %v597_v24, %v877_v27  ;;  %v605_v43 = vor.u32 %v603_v26, %v7387_v36  ;;  %v6382_v46 = vpack.c.bf16 %v404_v33, %v404_v33 }
  0x36   : > { %2548 = vrot.lane.b32.xlu1 %v6160_v21, %s7128_s16  ;;  %v6159_v39 = vcombine.low %v7376_v23, %v1065_v34  ;;  %v612_v41 = vshll.u32 %v6380_v19, 16  ;;  %879 = vst [vmem:[#allocation2 + $0x3c] sm:$0xf] %v878_v9  ;;  %v617_v44 = vshrl.u32 %v6381_v28, 16  ;;  %v620_v45 = vshll.u32 %v6381_v28, 16  ;;  %v409_v28 = vld [vmem:[%s7315_s15 + $0x88] sm:$0xff] }
  0x37   : > { %v7393_v42 = vld [vmem:[#allocation2 + $0x24] sm:$0xf]  ;;  %v7396_v47 = vrot.slane %v1570_v29, 4  ;;  %v7398_v48 = vrot.slane %v1573_v30, 5  ;;  %v611_v49 = vrot.slane %v609_v40, 7  ;;  %v6383_v51 = vpack.c.bf16 %v405_v38, %v405_v38  ;;  %v410_v34 = vld [vmem:[%s7315_s15 + $0x90] sm:$0xff] }
  0x38   : > { %2546 = vrot.lane.b32.xlu0 %v6159_v39, %s7128_s16  ;;  %v606_v54 = vsel %vm7331_vm4, %v598_v35, %v605_v43  ;;  %v7404_v55 = vrot.slane %v617_v44, 7  ;;  %v626_v57 = vshrl.u32 %v6382_v46, 16  ;;  %v629_v58 = vshll.u32 %v6382_v46, 16  ;;  %v898_v40 = vld [vmem:[#allocation2 + $0x60] sm:$0xf]  ;;  %s7132_s17 = smov 50  }
  0x39   : > { %v1069_v53 = vld [vmem:[#allocation2 + $0x28] sm:$0xf]  ;;  %880 = vst.msk [vmem:[#allocation2 + $0x40] sm:$0xf] %vm336_vm0, %v606_v54  ;;  %v614_v61 = vor.u32 %v612_v41, %v611_v49  ;;  %v615_v62 = vrot.slane %v611_v49, 4  ;;  %v634_v63 = vshrl.u32 %v6383_v51, 16  ;;  %v6384_v6 = vpack.c.bf16 %v406_v52, %v406_v52 }
  0x3a   : > { %v6161_v60 = vcombine.low %v7393_v42, %v1069_v53  ;;  %v622_v2 = vor.u32 %v620_v45, %v7404_v55  ;;  %v628_v3 = vrot.slane %v626_v57, 7  ;;  %v637_v4 = vshll.u32 %v6383_v51, 16  ;;  %s7134_s11 = smov 80   ;;  %s7136_s13 = smov 96  }
  0x3b   : > { %v885_v11 = vsel %vm7338_vm5, %v614_v61, %v884_v50  ;;  %v7416_v12 = vrot.slane %v634_v63, 7  ;;  %v6385_v13 = vpack.c.bf16 %v407_v59, %v407_v59  ;;  %v6386_v19 = vpack.c.bf16 %v408_v1, %v408_v1  ;;  %v412_v1 = vld [vmem:[%s7315_s15 + $0xa0] sm:$0xff]  ;;  %s6434_s18 = sshll.u32 %s7117_s24, 11 }
  0x3c   : > { %2550 = vrot.lane.b32.xlu1 %v6161_v60, %s7128_s16  ;;  %v7412_v7 = vld [vmem:[#allocation2 + $0x30] sm:$0xf]  ;;  %v1071_v8 = vld [vmem:[#allocation2 + $0x34] sm:$0xf]  ;;  %v623_v17 = vsel %vm7331_vm4, %v615_v62, %v622_v2  ;;  %886 = vst [vmem:[#allocation2 + $0x48] sm:$0xf] %v885_v11  ;;  %v631_v21 = vor.u32 %v629_v58, %v628_v3  ;;  %v1576_v30 = vor.u32 %v7398_v48, %v7396_v47  ;;  %s10431_s8 = scalar_lea.hbm %s10508_s5, %s6434_s18 }
  0x3d   : > { %v6162_v16 = vcombine.low %v7412_v7, %v1071_v8  ;;  %887 = vst.msk [vmem:[#allocation2 + $0x4c] sm:$0xf] %vm336_vm0, %v623_v17  ;;  %v632_v24 = vrot.slane %v628_v3, 4  ;;  %v639_v26 = vor.u32 %v637_v4, %v7416_v12  ;;  %v643_v27 = vshrl.u32 %v6384_v6, 16  ;;  %v7429_v31 = vld [vmem:[#allocation2 + $0x3c] sm:$0xf] }
  0x3e   : > { %v1583_v29 = vshrl.u32 %v7324_v10, 16  ;;  %v646_v32 = vshll.u32 %v6384_v6, 16  ;;  %v651_v33 = vshrl.u32 %v6385_v13, 16  ;;  %v892_v38 = vsel %vm7338_vm5, %v631_v21, %v891_v18  ;;  %v411_v47 = vld [vmem:[%s7315_s15 + $0x98] sm:$0xff]  ;;  %v905_v58 = vld [vmem:[#allocation2 + $0x6c] sm:$0xf] }
  0x3f   : > { %2552 = vrot.lane.b32.xlu0 %v6162_v16, %s7128_s16  ;;  %v640_v35 = vsel %vm7331_vm4, %v632_v24, %v639_v26  ;;  %v645_v39 = vrot.slane %v643_v27, 7  ;;  %v654_v9 = vshll.u32 %v6385_v13, 16  ;;  %893 = vst [vmem:[#allocation2 + $0x54] sm:$0xf] %v892_v38  ;;  %v6387_v44 = vpack.c.bf16 %v409_v28, %v409_v28  ;;  %v413_v11 = vld [vmem:[%s7315_s15 + $0xa8] sm:$0xff]  ;;  %v414_v38 = vld [vmem:[%s7315_s15 + $0xb0] sm:$0xff] }
  0x40   : > { %v1073_v41 = vld [vmem:[#allocation2 + $0x40] sm:$0xf]  ;;  %894 = vst.msk [vmem:[#allocation2 + $0x58] sm:$0xf] %vm336_vm0, %v640_v35  ;;  %v7437_v43 = vrot.slane %v651_v33, 7  ;;  %v660_v45 = vshrl.u32 %v6386_v19, 16  ;;  %v6388_v51 = vpack.c.bf16 %v410_v34, %v410_v34  ;;  %v6389_v61 = vpack.c.bf16 %v411_v47, %v411_v47 }
  0x41   : > { %v663_v46 = vshll.u32 %v6386_v19, 16  ;;  %v6163_v48 = vcombine.low %v7429_v31, %v1073_v41  ;;  %v648_v49 = vor.u32 %v646_v32, %v645_v39  ;;  %v649_v50 = vrot.slane %v645_v39, 4  ;;  %v912_v26 = vld [vmem:[#allocation2 + $0x78] sm:$0xf] }
  0x42   : > { %v656_v52 = vor.u32 %v654_v9, %v7437_v43  ;;  %v662_v53 = vrot.slane %v660_v45, 7  ;;  %v668_v54 = vshrl.u32 %v6387_v44, 16  ;;  %v671_v57 = vshll.u32 %v6387_v44, 16  ;;  %v415_v41 = vld [vmem:[%s7315_s15 + $0xb8] sm:$0xff] }
  0x43   : > { %2554 = vrot.lane.b32.xlu1 %v6163_v48, %s7128_s16  ;;  %v7443_v59 = vld [vmem:[#allocation2 + $0x48] sm:$0xf]  ;;  %v899_v60 = vsel %vm7338_vm5, %v648_v49, %v898_v40  ;;  %v677_v62 = vshrl.u32 %v6388_v51, 16  ;;  %v680_v63 = vshll.u32 %v6388_v51, 16  ;;  %v7448_v2 = vrot.slane %v1583_v29, 4  ;;  %v416_v48 = vld [vmem:[%s7315_s15 + $0xc0] sm:$0xff] }
  0x44   : > { %v1075_v4 = vld [vmem:[#allocation2 + $0x4c] sm:$0xf]  ;;  %v657_v6 = vsel %vm7331_vm4, %v649_v50, %v656_v52  ;;  %900 = vst [vmem:[#allocation2 + $0x60] sm:$0xf] %v899_v60  ;;  %v665_v8 = vor.u32 %v663_v46, %v662_v53  ;;  %v666_v16 = vrot.slane %v662_v53, 4  ;;  %v7456_v17 = vrot.slane %v668_v54, 7 }
  0x45   : > { %v6164_v13 = vcombine.low %v7443_v59, %v1075_v4  ;;  %901 = vst.msk [vmem:[#allocation2 + $0x64] sm:$0xf] %vm336_vm0, %v657_v6  ;;  %v679_v18 = vrot.slane %v677_v62, 7  ;;  %v685_v21 = vshrl.u32 %v6389_v61, 16  ;;  %v688_v24 = vshll.u32 %v6389_v61, 16  ;;  %v417_v49 = vld [vmem:[%s7315_s15 + $0xc8] sm:$0xff] }
  0x46   : > { %v906_v19 = vsel %vm7338_vm5, %v665_v8, %v905_v58  ;;  %v6390_v27 = vpack.c.bf16 %v412_v1, %v412_v1  ;;  %v7460_v28 = vrot.slane %v1576_v30, 4  ;;  %v7463_v29 = vld [vmem:[#allocation2 + $0x54] sm:$0xf]  ;;  %v673_v33 = vor.u32 %v671_v57, %v7456_v17  ;;  %v919_v4 = vld [vmem:[#allocation2 + $0x84] sm:$0xf] }
  0x47   : > { %2556 = vrot.lane.b32.xlu0 %v6164_v13, %s7128_s16  ;;  %v1077_v32 = vld [vmem:[#allocation2 + $0x58] sm:$0xf]  ;;  %907 = vst [vmem:[#allocation2 + $0x6c] sm:$0xf] %v906_v19  ;;  %v682_v34 = vor.u32 %v680_v63, %v679_v18  ;;  %v6391_v35 = vpack.c.bf16 %v413_v11, %v413_v11  ;;  %v1618_v39 = vshrl.u32 %v7371_v14, 16  ;;  %v683_v40 = vrot.slane %v679_v18, 4 }
  0x48   : > { %v6165_v9 = vcombine.low %v7463_v29, %v1077_v32  ;;  %v7469_v30 = vrot.slane %v685_v21, 7  ;;  %v674_v44 = vsel %vm7331_vm4, %v666_v16, %v673_v33  ;;  %v694_v46 = vshrl.u32 %v6390_v27, 16 }
  0x49   : > { %v913_v45 = vsel %vm7338_vm5, %v682_v34, %v912_v26  ;;  %v697_v47 = vshll.u32 %v6390_v27, 16  ;;  %908 = vst.msk [vmem:[#allocation2 + $0x70] sm:$0xf] %vm336_vm0, %v674_v44  ;;  %v702_v51 = vshrl.u32 %v6391_v35, 16  ;;  %v705_v52 = vshll.u32 %v6391_v35, 16  ;;  %v418_v26 = vld [vmem:[%s7315_s15 + $0xd0] sm:$0xff] }
  0x4a   : > { %2558 = vrot.lane.b32.xlu1 %v6165_v9, %s7128_s16  ;;  %v690_v50 = vor.u32 %v688_v24, %v7469_v30  ;;  %914 = vst [vmem:[#allocation2 + $0x78] sm:$0xf] %v913_v45  ;;  %v6392_v53 = vpack.c.bf16 %v414_v38, %v414_v38  ;;  %v1621_v54 = vshll.u32 %v7371_v14, 16  ;;  %v696_v60 = vrot.slane %v694_v46, 7 }
  0x4b   : > { %v7483_v58 = vld [vmem:[#allocation2 + $0x60] sm:$0xf]  ;;  %v6393_v61 = vpack.c.bf16 %v415_v41, %v415_v41  ;;  %v7487_v1 = vrot.slane %v702_v51, 7  ;;  %v6394_v6 = vpack.c.bf16 %v416_v48, %v416_v48  ;;  %v6395_v8 = vpack.c.bf16 %v417_v49, %v417_v49  ;;  %v419_v48 = vld [vmem:[%s7315_s15 + $0xd8] sm:$0xff] }
  0x4c   : > { %v1079_v62 = vld [vmem:[#allocation2 + $0x64] sm:$0xf]  ;;  %v691_v63 = vsel %vm7331_vm4, %v683_v40, %v690_v50  ;;  %v699_v14 = vor.u32 %v697_v47, %v696_v60  ;;  %v700_v13 = vrot.slane %v696_v60, 4  ;;  %v711_v16 = vshrl.u32 %v6392_v53, 16  ;;  %v926_v40 = vld [vmem:[#allocation2 + $0x90] sm:$0xf] }
  0x4d   : > { %10551 = vst [vmem:[#allocation9_spill] sm:$0xff] %v7487_v1  ;;  %v6166_v11 = vcombine.low %v7483_v58, %v1079_v62  ;;  %915 = vst.msk [vmem:[#allocation2 + $0x7c] sm:$0xf] %vm336_vm0, %v691_v63  ;;  %v707_v18 = vor.u32 %v705_v52, %v7487_v1  ;;  %v714_v19 = vshll.u32 %v6392_v53, 16  ;;  %v719_v21 = vshrl.u32 %v6393_v61, 16 }
  0x4e   : > { %v722_v24 = vshll.u32 %v6393_v61, 16  ;;  %v7493_v27 = vrot.slane %v1618_v39, 4  ;;  %v7497_v33 = vld [vmem:[#allocation2 + $0x6c] sm:$0xf]  ;;  %v920_v34 = vsel %vm7338_vm5, %v699_v14, %v919_v4  ;;  %v713_v35 = vrot.slane %v711_v16, 7 }
  0x4f   : > { %2560 = vrot.lane.b32.xlu0 %v6166_v11, %s7128_s16  ;;  %v708_v38 = vsel %vm7331_vm4, %v700_v13, %v707_v18  ;;  %921 = vst [vmem:[#allocation2 + $0x84] sm:$0xf] %v920_v34  ;;  %v7503_v9 = vrot.slane %v719_v21, 7  ;;  %v728_v39 = vshrl.u32 %v6394_v6, 16  ;;  %v731_v41 = vshll.u32 %v6394_v6, 16  ;;  %v422_v21 = vld [vmem:[%s7315_s15 + $0xf0] sm:$0xff] }
  0x50   : > { %v1081_v44 = vld [vmem:[#allocation2 + $0x70] sm:$0xf]  ;;  %922 = vst.msk [vmem:[#allocation2 + $0x88] sm:$0xf] %vm336_vm0, %v708_v38  ;;  %v716_v45 = vor.u32 %v714_v19, %v713_v35  ;;  %v717_v46 = vrot.slane %v713_v35, 4  ;;  %v736_v47 = vshrl.u32 %v6395_v8, 16  ;;  %v6396_v49 = vpack.c.bf16 %v418_v26, %v418_v26 }
  0x51   : > { %10552 = vst [vmem:[#allocation10_spill] sm:$0xff] %v7503_v9  ;;  %v7507_v50 = vrot.slane %v1621_v54, 5  ;;  %v6167_v52 = vcombine.low %v7497_v33, %v1081_v44  ;;  %v7511_v53 = vld [vmem:[#allocation2 + $0x78] sm:$0xf]  ;;  %v724_v60 = vor.u32 %v722_v24, %v7503_v9  ;;  %v730_v62 = vrot.slane %v728_v39, 7  ;;  %v420_v54 = vld [vmem:[%s7315_s15 + $0xe0] sm:$0xff] }
  0x52   : > { %v927_v61 = vsel %vm7338_vm5, %v716_v45, %v926_v40  ;;  %v7516_v63 = vrot.slane %v736_v47, 7  ;;  %v739_v4 = vshll.u32 %v6395_v8, 16  ;;  %v933_v6 = vld [vmem:[#allocation2 + $0x9c] sm:$0xf]  ;;  %v6397_v13 = vpack.c.bf16 %v419_v48, %v419_v48  ;;  %v421_v19 = vld [vmem:[%s7315_s15 + $0xe8] sm:$0xff] }
  0x53   : > { %2562 = vrot.lane.b32.xlu1 %v6167_v52, %s7128_s16  ;;  %v725_v14 = vsel %vm7331_vm4, %v717_v46, %v724_v60  ;;  %928 = vst [vmem:[#allocation2 + $0x90] sm:$0xf] %v927_v61  ;;  %v745_v16 = vshrl.u32 %v6396_v49, 16  ;;  %v748_v18 = vshll.u32 %v6396_v49, 16  ;;  %v733_v8 = vor.u32 %v731_v41, %v730_v62  ;;  %v940_v47 = vld [vmem:[#allocation2 + $0xa8] sm:$0xf] }
  0x54   : > { %10553 = vst [vmem:[#allocation11_spill] sm:$0xff] %v7516_v63  ;;  %v1083_v11 = vld [vmem:[#allocation2 + $0x7c] sm:$0xf]  ;;  %929 = vst.msk [vmem:[#allocation2 + $0x94] sm:$0xf] %vm336_vm0, %v725_v14  ;;  %v734_v26 = vrot.slane %v730_v62, 4  ;;  %v741_v34 = vor.u32 %v739_v4, %v7516_v63  ;;  %v6398_v39 = vpack.c.bf16 %v420_v54, %v420_v54  ;;  %v6399_v41 = vpack.c.bf16 %v421_v19, %v421_v19 }
  0x55   : > { %v6168_v24 = vcombine.low %v7511_v53, %v1083_v11  ;;  %v747_v35 = vrot.slane %v745_v16, 7  ;;  %v753_v38 = vshrl.u32 %v6397_v13, 16  ;;  %v756_v40 = vshll.u32 %v6397_v13, 16  ;;  %v423_v48 = vld [vmem:[%s7315_s15 + $0xf8] sm:$0xff] }
  0x56   : > { %v7529_v44 = vld [vmem:[#allocation2 + $0x84] sm:$0xf]  ;;  %v742_v45 = vsel %vm7331_vm4, %v734_v26, %v741_v34  ;;  %v934_v46 = vsel %vm7338_vm5, %v733_v8, %v933_v6  ;;  %v6400_v49 = vpack.c.bf16 %v422_v21, %v422_v21  ;;  %v762_v14 = vshrl.u32 %v6398_v39, 16  ;;  %v947_v21 = vld [vmem:[#allocation2 + $0xb4] sm:$0xf] }
  0x57   : > { %2564 = vrot.lane.b32.xlu0 %v6168_v24, %s7128_s16  ;;  %10554 = vst [vmem:[#allocation12_spill] sm:$0xff] %v7529_v44  ;;  %v1085_v61 = vld [vmem:[#allocation2 + $0x88] sm:$0xf]  ;;  %935 = vst [vmem:[#allocation2 + $0x9c] sm:$0xf] %v934_v46  ;;  %v750_v62 = vor.u32 %v748_v18, %v747_v35  ;;  %v751_v4 = vrot.slane %v747_v35, 4  ;;  %v6401_v24 = vpack.c.bf16 %v423_v48, %v423_v48 }
  0x58   : > { %936 = vst.msk [vmem:[#allocation2 + $0xa0] sm:$0xf] %vm336_vm0, %v742_v45  ;;  %v6169_v54 = vcombine.low %v7529_v44, %v1085_v61  ;;  %v7540_v11 = vrot.slane %v753_v38, 7  ;;  %v765_v6 = vshll.u32 %v6398_v39, 16  ;;  %v770_v16 = vshrl.u32 %v6399_v41, 16 }
  0x59   : > { %v941_v13 = vsel %vm7338_vm5, %v750_v62, %v940_v47  ;;  %v773_v19 = vshll.u32 %v6399_v41, 16  ;;  %v764_v34 = vrot.slane %v762_v14, 7  ;;  %v779_v35 = vshrl.u32 %v6400_v49, 16  ;;  %v1041_v44 = vld [vmem:[%s7547_s20 + $0x58] sm:$0xf] }
  0x5a   : > { %10555 = vst [vmem:[#allocation13_spill] sm:$0xff] %v7540_v11  ;;  %2566 = vrot.lane.b32.xlu1 %v6169_v54, %s7128_s16  ;;  %v7551_v8 = vld [vmem:[#allocation2 + $0x90] sm:$0xf]  ;;  %v758_v26 = vor.u32 %v756_v40, %v7540_v11  ;;  %942 = vst [vmem:[#allocation2 + $0xa8] sm:$0xf] %v941_v13  ;;  %v7555_v45 = vrot.slane %v770_v16, 7 }
  0x5b   : > { %v1087_v39 = vld [vmem:[#allocation2 + $0x94] sm:$0xf]  ;;  %v782_v46 = vshll.u32 %v6400_v49, 16  ;;  %v787_v47 = vshrl.u32 %v6401_v24, 16  ;;  %vm1116_vm6 = vsmask.f32 3328  ;;  %v767_v61 = vor.u32 %v765_v6, %v764_v34 }
  0x5c   : > { %10556 = vst [vmem:[#allocation14_spill] sm:$0xff] %v7555_v45  ;;  %vm1117_vm7 = vsmask.f32 7440  ;;  %v6170_v41 = vcombine.low %v7551_v8, %v1087_v39  ;;  %v759_v48 = vsel %vm7331_vm4, %v751_v4, %v758_v26  ;;  %v768_v40 = vrot.slane %v764_v34, 4  ;;  %v1026_v49 = vld [vmem:[%s7547_s20] sm:$0xf] }
  0x5d   : > { %943 = vst.msk [vmem:[#allocation2 + $0xac] sm:$0xf] %vm336_vm0, %v759_v48  ;;  %v775_v62 = vor.u32 %v773_v19, %v7555_v45  ;;  %v781_v54 = vrot.slane %v779_v35, 7  ;;  %v7562_v14 = vrot.slane %v787_v47, 7  ;;  %v790_v13 = vshll.u32 %v6401_v24, 16  ;;  %vm7609_vm8 = vmor %vm1116_vm6, %vm1117_vm7 }
  0x5e   : > { %2568 = vrot.lane.b32.xlu0 %v6170_v41, %s7128_s16  ;;  %v1088_v4 = vld [vmem:[#allocation2 + $0x9c] sm:$0xf]  ;;  %v948_v26 = vsel %vm7338_vm5, %v767_v61, %v947_v21  ;;  %v954_v39 = vld [vmem:[#allocation2 + $0xc0] sm:$0xf]  ;;  %v7575_v47 = vld [vmem:[%s7547_s20 + $0x4] sm:$0xf] }
  0x5f   : > { %10557 = vst [vmem:[#allocation15_spill] sm:$0xff] %v7562_v14  ;;  %v1089_v6 = vld [vmem:[#allocation2 + $0xa0] sm:$0xf]  ;;  %v776_v24 = vsel %vm7331_vm4, %v768_v40, %v775_v62  ;;  %949 = vst [vmem:[#allocation2 + $0xb4] sm:$0xf] %v948_v26  ;;  %v784_v48 = vor.u32 %v782_v46, %v781_v54  ;;  %v785_v38 = vrot.slane %v781_v54, 4  ;;  %v792_v21 = vor.u32 %v790_v13, %v7562_v14 }
  0x60   : > { %v6171_v35 = vcombine.low %v1088_v4, %v1089_v6  ;;  %950 = vst.msk [vmem:[#allocation2 + $0xb8] sm:$0xf] %vm336_vm0, %v776_v24  ;;  %v7581_v61 = vld [vmem:[%s7547_s20 + $0x8] sm:$0x1]  ;;  %v1028_v34 = vld [vmem:[%s7547_s20 + $0xc] sm:$0xf] }
  0x61   : > { %v1120_v62 = vshrl.u32 %v1026_v49, 16  ;;  %v1123_v6 = vshll.u32 %v1026_v49, 16  ;;  %v7588_v26 = vld [vmem:[%s7547_s20 + $0x10] sm:$0xf]  ;;  %v1090_v54 = vld [vmem:[#allocation2 + $0xa8] sm:$0xf]  ;;  %v793_v13 = vsel %vm7331_vm4, %v785_v38, %v792_v21  ;;  %v955_v24 = vsel %vm7338_vm5, %v784_v48, %v954_v39 }
  0x62   : > { %2570 = vrot.lane.b32.xlu1 %v6171_v35, %s7128_s16  ;;  %956 = vst [vmem:[#allocation2 + $0xc0] sm:$0xf] %v955_v24  ;;  %957 = vst.msk [vmem:[#allocation2 + $0xc4] sm:$0xf] %vm336_vm0, %v793_v13  ;;  %v1129_v40 = vshll.u32 %v7575_v47, 16  ;;  %v1133_v41 = vshrl.u32 %v7575_v47, 16 }
  0x63   : > { %v1122_v35 = vrot.slane %v1120_v62, 4  ;;  %v1125_v49 = vrot.slane %v1123_v6, 5  ;;  %v1139_v46 = vshll.u32 %v7581_v61, 16  ;;  %v1144_v19 = vshrl.u32 %v1028_v34, 16  ;;  %v1096_v39 = vld [vmem:[#allocation2 + $0xcc] sm:$0xf] }
  0x64   : > { %v1091_v4 = vld [vmem:[#allocation2 + $0xac] sm:$0xf]  ;;  %v1147_v16 = vshll.u32 %v1028_v34, 16  ;;  %v1153_v38 = vshll.u32 %v7588_v26, 16  ;;  %v1097_v48 = vld [vmem:[#allocation2 + $0xd0] sm:$0xf] }
  0x65   : > { %v6172_v21 = vcombine.low %v1090_v54, %v1091_v4  ;;  %v1126_v24 = vor.u32 %v1125_v49, %v1122_v35  ;;  %v1131_v13 = vrot.slane %v1129_v40, 5  ;;  %v1135_v18 = vrot.slane %v1133_v41, 4  ;;  %v7602_v62 = vld [vmem:[%s7547_s20 + $0x14] sm:$0x1]  ;;  %v1030_v6 = vld [vmem:[%s7547_s20 + $0x18] sm:$0xf] }
  0x66   : > { %v1092_v51 = vld [vmem:[#allocation2 + $0xb4] sm:$0xf]  ;;  %v1146_v4 = vrot.slane %v1144_v19, 4  ;;  %v1149_v54 = vrot.slane %v1147_v16, 5  ;;  %v1141_v49 = vrot.slane %v1139_v46, 5  ;;  %v1155_v3 = vrot.slane %v1153_v38, 5 }
  0x67   : > { %2572 = vrot.lane.b32.xlu0 %v6172_v21, %s7128_s16  ;;  %v1093_v41 = vld [vmem:[#allocation2 + $0xb8] sm:$0xf]  ;;  %v1127_v40 = vrot.slane %v1126_v24, 4  ;;  %v1136_v35 = vor.u32 %v1135_v18, %v1131_v13  ;;  %v1157_v52 = vshrl.u32 %v7588_v26, 16  ;;  %v1163_v57 = vshll.u32 %v7602_v62, 16 }
  0x68   : > { %v6173_v60 = vcombine.low %v1092_v51, %v1093_v41  ;;  %v1150_v32 = vor.u32 %v1149_v54, %v1146_v4  ;;  %v7619_v16 = vld [vmem:[%s7547_s20 + $0x1c] sm:$0xf]  ;;  %v1168_v21 = vshrl.u32 %v1030_v6, 16  ;;  %v1171_v0 = vshll.u32 %v1030_v6, 16  ;;  %v1032_v6 = vld [vmem:[%s7547_s20 + $0x24] sm:$0xf] }
  0x69   : > { %v1132_v15 = vsel %vm7609_vm8, %v1127_v40, %v1131_v13  ;;  %v1137_v19 = vrot.slane %v1136_v35, 4  ;;  %v1094_v18 = vld [vmem:[#allocation2 + $0xc0] sm:$0xf]  ;;  %v1095_v51 = vld [vmem:[#allocation2 + $0xc4] sm:$0xf]  ;;  %v6175_v46 = vcombine.low %v1096_v39, %v1097_v48  ;;  %v1159_v24 = vrot.slane %v1157_v52, 4 }
  0x6a   : > { %2574 = vrot.lane.b32.xlu1 %v6173_v60, %s7128_s16  ;;  %v1151_v38 = vrot.slane %v1150_v32, 4  ;;  %v6174_v41 = vcombine.low %v1094_v18, %v1095_v51  ;;  %v7627_v40 = vld [vmem:[%s7547_s20 + $0x20] sm:$0x1]  ;;  %v1165_v39 = vrot.slane %v1163_v57, 5  ;;  %v7633_v32 = vld [vmem:[%s7547_s20 + $0x28] sm:$0xf] }
  0x6b   : > { %v1142_v13 = vsel %vm7609_vm8, %v1137_v19, %v1141_v49  ;;  %v1160_v25 = vor.u32 %v1159_v24, %v1155_v3  ;;  %v1170_v52 = vrot.slane %v1168_v21, 4  ;;  %v1173_v48 = vrot.slane %v1171_v0, 5  ;;  %v7641_v51 = vld [vmem:[%s7547_s20 + $0x2c] sm:$0x1]  ;;  %v1034_v0 = vld [vmem:[%s7547_s20 + $0x30] sm:$0xf] }
  0x6c   : > { %v6176_v35 = vcombine.low %v1132_v15, %v1142_v13  ;;  %v1156_v60 = vsel %vm7609_vm8, %v1151_v38, %v1155_v3  ;;  %2576 = vrot.lane.b32.xlu0 %v6174_v41, %s7128_s16  ;;  %v1177_v18 = vshll.u32 %v7619_v16, 16  ;;  %v1181_v49 = vshrl.u32 %v7619_v16, 16  ;;  %v1102_v45 = vld [vmem:[%s7547_s20 + $0x38] sm:$0x1] }
  0x6d   : > { %v1161_v15 = vrot.slane %v1160_v25, 4  ;;  %v1187_v19 = vshll.u32 %v7627_v40, 16  ;;  %v1192_v3 = vshrl.u32 %v1032_v6, 16  ;;  %v1195_v57 = vshll.u32 %v1032_v6, 16  ;;  %v1035_v25 = vld [vmem:[%s7547_s20 + $0x34] sm:$0xf] }
  0x6e   : > { %2578 = vrot.lane.b32.xlu1 %v6175_v46, %s7128_s16  ;;  %v1174_v38 = vor.u32 %v1173_v48, %v1170_v52  ;;  %v1179_v24 = vrot.slane %v1177_v18, 5  ;;  %v1183_v13 = vrot.slane %v1181_v49, 4  ;;  %v1201_v21 = vshll.u32 %v7633_v32, 16 }
  0x6f   : > { %v1166_v41 = vsel %vm7609_vm8, %v1161_v15, %v1165_v39  ;;  %v1189_v54 = vrot.slane %v1187_v19, 5  ;;  %v1194_v4 = vrot.slane %v1192_v3, 4  ;;  %v1197_v46 = vrot.slane %v1195_v57, 5 }
  0x70   : > { %2634 = vrot.lane.b32.xlu0 %v6176_v35, %s7129_s27  ;;  %v6177_v20 = vcombine.low %v1156_v60, %v1166_v41  ;;  %v1175_v6 = vrot.slane %v1174_v38, 4  ;;  %v1184_v52 = vor.u32 %v1183_v13, %v1179_v24  ;;  %v1203_v48 = vrot.slane %v1201_v21, 5  ;;  %v1036_v60 = vld [vmem:[%s7547_s20 + $0x3c] sm:$0xf]  ;;  %v1037_v21 = vld [vmem:[%s7547_s20 + $0x40] sm:$0xf] }
  0x71   : > { %v1198_v18 = vor.u32 %v1197_v46, %v1194_v4  ;;  %v1205_v49 = vshrl.u32 %v7633_v32, 16  ;;  %v1211_v14 = vshll.u32 %v7641_v51, 16  ;;  %v1216_v39 = vshrl.u32 %v1034_v0, 16 }
  0x72   : > { %2636 = vrot.lane.b32.xlu1 %v6177_v20, %s7129_s27  ;;  %v1180_v15 = vsel %vm7609_vm8, %v1175_v6, %v1179_v24  ;;  %v1185_v19 = vrot.slane %v1184_v52, 4  ;;  %v1219_v3 = vshll.u32 %v1034_v0, 16  ;;  %v1225_v35 = vshll.u32 %v1035_v25, 16  ;;  %v1103_v52 = vld [vmem:[%s7547_s20 + $0x44] sm:$0x1] }
  0x73   : > { %v1199_v57 = vrot.slane %v1198_v18, 4  ;;  %v1207_v38 = vrot.slane %v1205_v49, 4  ;;  %v1213_v13 = vrot.slane %v1211_v14, 5  ;;  %v1218_v4 = vrot.slane %v1216_v39, 4  ;;  %v1038_v39 = vld [vmem:[%s7547_s20 + $0x48] sm:$0xf] }
  0x74   : > { %v1190_v41 = vsel %vm7609_vm8, %v1185_v19, %v1189_v54  ;;  %v1221_v46 = vrot.slane %v1219_v3, 5  ;;  %v1227_v11 = vrot.slane %v1225_v35, 5  ;;  %v1229_v20 = vshrl.u32 %v1035_v25, 16 }
  0x75   : > { %v6178_v63 = vcombine.low %v1180_v15, %v1190_v41  ;;  %v1204_v24 = vsel %vm7609_vm8, %v1199_v57, %v1203_v48  ;;  %v1208_v0 = vor.u32 %v1207_v38, %v1203_v48  ;;  %v1235_v6 = vshll.u32 %v1102_v45, 16  ;;  %v1039_v15 = vld [vmem:[%s7547_s20 + $0x4c] sm:$0xf] }
  0x76   : > { %v1222_v18 = vor.u32 %v1221_v46, %v1218_v4  ;;  %v1231_v49 = vrot.slane %v1229_v20, 4  ;;  %v1240_v14 = vshrl.u32 %v1036_v60, 16  ;;  %v1243_v9 = vshll.u32 %v1036_v60, 16  ;;  %v1104_v46 = vld [vmem:[%s7547_s20 + $0x50] sm:$0x1] }
  0x77   : > { %2638 = vrot.lane.b32.xlu0 %v6178_v63, %s7129_s27  ;;  %v1209_v54 = vrot.slane %v1208_v0, 4  ;;  %v1237_v19 = vrot.slane %v1235_v6, 5  ;;  %v1249_v3 = vshll.u32 %v1037_v21, 16  ;;  %v1253_v25 = vshrl.u32 %v1037_v21, 16  ;;  %v1040_v21 = vld [vmem:[%s7547_s20 + $0x54] sm:$0xf] }
  0x78   : > { %v1223_v35 = vrot.slane %v1222_v18, 4  ;;  %v1232_v41 = vor.u32 %v1231_v49, %v1227_v11  ;;  %v1242_v57 = vrot.slane %v1240_v14, 4  ;;  %v1245_v45 = vrot.slane %v1243_v9, 5 }
  0x79   : > { %v1214_v48 = vsel %vm7609_vm8, %v1209_v54, %v1213_v13  ;;  %v1251_v38 = vrot.slane %v1249_v3, 5  ;;  %v1255_v60 = vrot.slane %v1253_v25, 4  ;;  %v1259_v4 = vshll.u32 %v1103_v52, 16 }
  0x7a   : > { %v6179_v20 = vcombine.low %v1204_v24, %v1214_v48  ;;  %v1228_v63 = vsel %vm7609_vm8, %v1223_v35, %v1227_v11  ;;  %v1233_v0 = vrot.slane %v1232_v41, 4  ;;  %v1246_v6 = vor.u32 %v1245_v45, %v1242_v57  ;;  %v1105_v41 = vld [vmem:[%s7547_s20 + $0x5c] sm:$0x1]  ;;  %v1042_v57 = vld [vmem:[%s7547_s20 + $0x60] sm:$0xf] }
  0x7b   : > { %v1256_v18 = vor.u32 %v1255_v60, %v1251_v38  ;;  %v1261_v49 = vrot.slane %v1259_v4, 5  ;;  %v1264_v14 = vshrl.u32 %v1038_v39, 16  ;;  %v1267_v9 = vshll.u32 %v1038_v39, 16 }
  0x7c   : > { %2640 = vrot.lane.b32.xlu1 %v6179_v20, %s7129_s27  ;;  %v1238_v13 = vsel %vm7609_vm8, %v1233_v0, %v1237_v19  ;;  %v1247_v52 = vrot.slane %v1246_v6, 4  ;;  %v1273_v24 = vshll.u32 %v1039_v15, 16  ;;  %v1277_v54 = vshrl.u32 %v1039_v15, 16 }
  0x7d   : > { %v6180_v11 = vcombine.low %v1228_v63, %v1238_v13  ;;  %v1257_v3 = vrot.slane %v1256_v18, 4  ;;  %v1266_v25 = vrot.slane %v1264_v14, 4  ;;  %v1269_v35 = vrot.slane %v1267_v9, 5  ;;  %v1043_v63 = vld [vmem:[%s7547_s20 + $0x64] sm:$0xf] }
  0x7e   : > { %v1252_v45 = vsel %vm7609_vm8, %v1247_v52, %v1251_v38  ;;  %v1275_v39 = vrot.slane %v1273_v24, 5  ;;  %v1279_v48 = vrot.slane %v1277_v54, 4  ;;  %v1283_v60 = vshll.u32 %v1104_v46, 16  ;;  %v1106_v24 = vld [vmem:[%s7547_s20 + $0x68] sm:$0x1] }
  0x7f   : > { %2642 = vrot.lane.b32.xlu0 %v6180_v11, %s7129_s27  ;;  %v1262_v19 = vsel %vm7609_vm8, %v1257_v3, %v1261_v49  ;;  %v1270_v15 = vor.u32 %v1269_v35, %v1266_v25  ;;  %v1288_v4 = vshrl.u32 %v1040_v21, 16  ;;  %v1291_v20 = vshll.u32 %v1040_v21, 16  ;;  %v1044_v3 = vld [vmem:[%s7547_s20 + $0x6c] sm:$0xf] }
  0x80   : > { %v6181_v0 = vcombine.low %v1252_v45, %v1262_v19  ;;  %v1280_v6 = vor.u32 %v1279_v48, %v1275_v39  ;;  %v1285_v18 = vrot.slane %v1283_v60, 5  ;;  %v1297_v14 = vshll.u32 %v1041_v44, 16 }
  0x81   : > { %v1271_v9 = vrot.slane %v1270_v15, 4  ;;  %v1290_v38 = vrot.slane %v1288_v4, 4  ;;  %v1293_v13 = vrot.slane %v1291_v20, 5  ;;  %v1301_v52 = vshrl.u32 %v1041_v44, 16 }
  0x82   : > { %2644 = vrot.lane.b32.xlu1 %v6181_v0, %s7129_s27  ;;  %v1281_v46 = vrot.slane %v1280_v6, 4  ;;  %v1299_v54 = vrot.slane %v1297_v14, 5  ;;  %v1307_v49 = vshll.u32 %v1105_v41, 16  ;;  %v1312_v11 = vshrl.u32 %v1042_v57, 16  ;;  %v1045_v41 = vld [vmem:[%s7547_s20 + $0x70] sm:$0xf] }
  0x83   : > { %v1276_v21 = vsel %vm7609_vm8, %v1271_v9, %v1275_v39  ;;  %v1294_v25 = vor.u32 %v1293_v13, %v1290_v38  ;;  %v1303_v35 = vrot.slane %v1301_v52, 4  ;;  %v1315_v45 = vshll.u32 %v1042_v57, 16  ;;  %v1107_v38 = vld [vmem:[%s7547_s20 + $0x74] sm:$0x1] }
  0x84   : > { %v1286_v48 = vsel %vm7609_vm8, %v1281_v46, %v1285_v18  ;;  %v1309_v60 = vrot.slane %v1307_v49, 5  ;;  %v1314_v44 = vrot.slane %v1312_v11, 4  ;;  %v1321_v19 = vshll.u32 %v1043_v63, 16 }
  0x85   : > { %v6182_v15 = vcombine.low %v1276_v21, %v1286_v48  ;;  %v1295_v4 = vrot.slane %v1294_v25, 4  ;;  %v1304_v20 = vor.u32 %v1303_v35, %v1299_v54  ;;  %v1317_v0 = vrot.slane %v1315_v45, 5  ;;  %v1046_v21 = vld [vmem:[%s7547_s20 + $0x78] sm:$0xf]  ;;  %v1047_v45 = vld [vmem:[%s7547_s20 + $0x7c] sm:$0xf] }
  0x86   : > { %v1323_v6 = vrot.slane %v1321_v19, 5  ;;  %v1325_v14 = vshrl.u32 %v1043_v63, 16  ;;  %v1331_v1 = vshll.u32 %v1106_v24, 16  ;;  %v1336_v39 = vshrl.u32 %v1044_v3, 16 }
  0x87   : > { %2646 = vrot.lane.b32.xlu0 %v6182_v15, %s7129_s27  ;;  %v1300_v57 = vsel %vm7609_vm8, %v1295_v4, %v1299_v54  ;;  %v1305_v18 = vrot.slane %v1304_v20, 4  ;;  %v1318_v9 = vor.u32 %v1317_v0, %v1314_v44  ;;  %v1339_v13 = vshll.u32 %v1044_v3, 16  ;;  %v1108_v4 = vld [vmem:[%s7547_s20 + $0x80] sm:$0x1] }
  0x88   : > { %v1327_v52 = vrot.slane %v1325_v14, 4  ;;  %v1333_v46 = vrot.slane %v1331_v1, 5  ;;  %v1338_v49 = vrot.slane %v1336_v39, 4  ;;  %v1345_v11 = vshll.u32 %v1045_v41, 16 }
  0x89   : > { %v1310_v63 = vsel %vm7609_vm8, %v1305_v18, %v1309_v60  ;;  %v1319_v24 = vrot.slane %v1318_v9, 4  ;;  %v1341_v25 = vrot.slane %v1339_v13, 5  ;;  %v1349_v35 = vshrl.u32 %v1045_v41, 16 }
  0x8a   : > { %v6183_v48 = vcombine.low %v1300_v57, %v1310_v63  ;;  %v1328_v19 = vor.u32 %v1327_v52, %v1323_v6  ;;  %v1347_v54 = vrot.slane %v1345_v11, 5  ;;  %v1355_v44 = vshll.u32 %v1107_v38, 16  ;;  %v1048_v38 = vld [vmem:[%s7547_s20 + $0x84] sm:$0xf]  ;;  %v1049_v11 = vld [vmem:[%s7547_s20 + $0x88] sm:$0xf] }
  0x8b   : > { %v1324_v3 = vsel %vm7609_vm8, %v1319_v24, %v1323_v6  ;;  %v1342_v1 = vor.u32 %v1341_v25, %v1338_v49  ;;  %v1351_v15 = vrot.slane %v1349_v35, 4  ;;  %v1360_v20 = vshrl.u32 %v1046_v21, 16 }
  0x8c   : > { %2648 = vrot.lane.b32.xlu1 %v6183_v48, %s7129_s27  ;;  %v1329_v60 = vrot.slane %v1328_v19, 4  ;;  %v1357_v0 = vrot.slane %v1355_v44, 5  ;;  %v1363_v14 = vshll.u32 %v1046_v21, 16  ;;  %v1369_v41 = vshll.u32 %v1047_v45, 16  ;;  %v1109_v19 = vld [vmem:[%s7547_s20 + $0x8c] sm:$0x1] }
  0x8d   : > { %v1343_v39 = vrot.slane %v1342_v1, 4  ;;  %v1352_v57 = vor.u32 %v1351_v15, %v1347_v54  ;;  %v1362_v18 = vrot.slane %v1360_v20, 4  ;;  %v1373_v9 = vshrl.u32 %v1047_v45, 16 }
  0x8e   : > { %v1334_v6 = vsel %vm7609_vm8, %v1329_v60, %v1333_v46  ;;  %v1365_v13 = vrot.slane %v1363_v14, 5  ;;  %v1371_v52 = vrot.slane %v1369_v41, 5  ;;  %v1379_v49 = vshll.u32 %v1108_v4, 16  ;;  %v1050_v4 = vld [vmem:[%s7547_s20 + $0x90] sm:$0xf] }
  0x8f   : > { %v6184_v63 = vcombine.low %v1324_v3, %v1334_v6  ;;  %v1348_v24 = vsel %vm7609_vm8, %v1343_v39, %v1347_v54  ;;  %v1353_v21 = vrot.slane %v1352_v57, 4  ;;  %v1375_v25 = vrot.slane %v1373_v9, 4  ;;  %v1051_v41 = vld [vmem:[%s7547_s20 + $0x94] sm:$0xf]  ;;  %v1110_v6 = vld [vmem:[%s7547_s20 + $0x98] sm:$0x1] }
  0x90   : > { %v1366_v35 = vor.u32 %v1365_v13, %v1362_v18  ;;  %v1381_v48 = vrot.slane %v1379_v49, 5  ;;  %v1384_v45 = vshrl.u32 %v1048_v38, 16  ;;  %v1387_v44 = vshll.u32 %v1048_v38, 16 }
  0x91   : > { %2650 = vrot.lane.b32.xlu0 %v6184_v63, %s7129_s27  ;;  %v1358_v46 = vsel %vm7609_vm8, %v1353_v21, %v1357_v0  ;;  %v1376_v1 = vor.u32 %v1375_v25, %v1371_v52  ;;  %v1393_v15 = vshll.u32 %v1049_v11, 16  ;;  %v1397_v3 = vshrl.u32 %v1049_v11, 16  ;;  %v1052_v25 = vld [vmem:[%s7547_s20 + $0x9c] sm:$0xf] }
  0x92   : > { %v6185_v20 = vcombine.low %v1348_v24, %v1358_v46  ;;  %v1367_v54 = vrot.slane %v1366_v35, 4  ;;  %v1386_v60 = vrot.slane %v1384_v45, 4  ;;  %v1389_v14 = vrot.slane %v1387_v44, 5  ;;  %v1053_v46 = vld [vmem:[%s7547_s20 + $0xa0] sm:$0xf] }
  0x93   : > { %v1377_v39 = vrot.slane %v1376_v1, 4  ;;  %v1395_v57 = vrot.slane %v1393_v15, 5  ;;  %v1399_v18 = vrot.slane %v1397_v3, 4  ;;  %v1403_v9 = vshll.u32 %v1109_v19, 16 }
  0x94   : > { %2652 = vrot.lane.b32.xlu1 %v6185_v20, %s7129_s27  ;;  %v1372_v0 = vsel %vm7609_vm8, %v1367_v54, %v1371_v52  ;;  %v1390_v38 = vor.u32 %v1389_v14, %v1386_v60  ;;  %v1408_v13 = vshrl.u32 %v1050_v4, 16  ;;  %v1411_v49 = vshll.u32 %v1050_v4, 16  ;;  %v1111_v20 = vld [vmem:[%s7547_s20 + $0xa4] sm:$0x1] }
  0x95   : > { %v1382_v11 = vsel %vm7609_vm8, %v1377_v39, %v1381_v48  ;;  %v1400_v63 = vor.u32 %v1399_v18, %v1395_v57  ;;  %v1405_v24 = vrot.slane %v1403_v9, 5  ;;  %v1417_v21 = vshll.u32 %v1051_v41, 16 }
  0x96   : > { %v6186_v35 = vcombine.low %v1372_v0, %v1382_v11  ;;  %v1391_v19 = vrot.slane %v1390_v38, 4  ;;  %v1410_v45 = vrot.slane %v1408_v13, 4  ;;  %v1413_v44 = vrot.slane %v1411_v49, 5  ;;  %v1054_v0 = vld [vmem:[%s7547_s20 + $0xa8] sm:$0xf] }
  0x97   : > { %v1401_v1 = vrot.slane %v1400_v63, 4  ;;  %v1419_v52 = vrot.slane %v1417_v21, 5  ;;  %v1421_v15 = vshrl.u32 %v1051_v41, 16  ;;  %v1427_v3 = vshll.u32 %v1110_v6, 16  ;;  %v1055_v49 = vld [vmem:[%s7547_s20 + $0xac] sm:$0xf] }
  0x98   : > { %2654 = vrot.lane.b32.xlu0 %v6186_v35, %s7129_s27  ;;  %v1396_v48 = vsel %vm7609_vm8, %v1391_v19, %v1395_v57  ;;  %v1414_v4 = vor.u32 %v1413_v44, %v1410_v45  ;;  %v1432_v54 = vshrl.u32 %v1052_v25, 16  ;;  %v1435_v60 = vshll.u32 %v1052_v25, 16  ;;  %v1112_v35 = vld [vmem:[%s7547_s20 + $0xb0] sm:$0x1] }
  0x99   : > { %v1406_v14 = vsel %vm7609_vm8, %v1401_v1, %v1405_v24  ;;  %v1423_v39 = vrot.slane %v1421_v15, 4  ;;  %v1429_v18 = vrot.slane %v1427_v3, 5  ;;  %v1441_v9 = vshll.u32 %v1053_v46, 16 }
  0x9a   : > { %v6187_v41 = vcombine.low %v1396_v48, %v1406_v14  ;;  %v1415_v38 = vrot.slane %v1414_v4, 4  ;;  %v1434_v6 = vrot.slane %v1432_v54, 4  ;;  %v1437_v13 = vrot.slane %v1435_v60, 5 }
  0x9b   : > { %v1424_v11 = vor.u32 %v1423_v39, %v1419_v52  ;;  %v1443_v63 = vrot.slane %v1441_v9, 5  ;;  %v1445_v57 = vshrl.u32 %v1053_v46, 16  ;;  %v1451_v21 = vshll.u32 %v1111_v20, 16  ;;  %v1056_v20 = vld [vmem:[%s7547_s20 + $0xb4] sm:$0xf] }
  0x9c   : > { %2656 = vrot.lane.b32.xlu1 %v6187_v41, %s7129_s27  ;;  %v1420_v24 = vsel %vm7609_vm8, %v1415_v38, %v1419_v52  ;;  %v1438_v25 = vor.u32 %v1437_v13, %v1434_v6  ;;  %v1456_v19 = vshrl.u32 %v1054_v0, 16  ;;  %v1459_v45 = vshll.u32 %v1054_v0, 16  ;;  %v1057_v9 = vld [vmem:[%s7547_s20 + $0xb8] sm:$0xf]  ;;  %v1113_v13 = vld [vmem:[%s7547_s20 + $0xbc] sm:$0x1] }
  0x9d   : > { %v1425_v44 = vrot.slane %v1424_v11, 4  ;;  %v1447_v1 = vrot.slane %v1445_v57, 4  ;;  %v1453_v15 = vrot.slane %v1451_v21, 5  ;;  %v1465_v3 = vshll.u32 %v1055_v49, 16 }
  0x9e   : > { %v1439_v48 = vrot.slane %v1438_v25, 4  ;;  %v1458_v4 = vrot.slane %v1456_v19, 4  ;;  %v1461_v46 = vrot.slane %v1459_v45, 5  ;;  %v1469_v54 = vshrl.u32 %v1055_v49, 16  ;;  %v1058_v45 = vld [vmem:[%s7547_s20 + $0xc0] sm:$0xf] }
  0x9f   : > { %v1430_v60 = vsel %vm7609_vm8, %v1425_v44, %v1429_v18  ;;  %v1448_v14 = vor.u32 %v1447_v1, %v1443_v63  ;;  %v1467_v52 = vrot.slane %v1465_v3, 5  ;;  %v1475_v39 = vshll.u32 %v1112_v35, 16  ;;  %v1059_v3 = vld [vmem:[%s7547_s20 + $0xc4] sm:$0xf] }
  0xa0   : > { %v6188_v41 = vcombine.low %v1420_v24, %v1430_v60  ;;  %v1444_v0 = vsel %vm7609_vm8, %v1439_v48, %v1443_v63  ;;  %v1462_v38 = vor.u32 %v1461_v46, %v1458_v4  ;;  %v1471_v6 = vrot.slane %v1469_v54, 4 }
  0xa1   : > { %v1449_v11 = vrot.slane %v1448_v14, 4  ;;  %v1477_v57 = vrot.slane %v1475_v39, 5  ;;  %v1480_v49 = vshrl.u32 %v1056_v20, 16  ;;  %v1483_v21 = vshll.u32 %v1056_v20, 16  ;;  %v1114_v39 = vld [vmem:[%s7547_s20 + $0xc8] sm:$0x1] }
  0xa2   : > { %2658 = vrot.lane.b32.xlu0 %v6188_v41, %s7129_s27  ;;  %v1463_v18 = vrot.slane %v1462_v38, 4  ;;  %v1472_v25 = vor.u32 %v1471_v6, %v1467_v52  ;;  %v1489_v35 = vshll.u32 %v1057_v9, 16  ;;  %v1493_v19 = vshrl.u32 %v1057_v9, 16 }
  0xa3   : > { %v1454_v24 = vsel %vm7609_vm8, %v1449_v11, %v1453_v15  ;;  %v1482_v63 = vrot.slane %v1480_v49, 4  ;;  %v1485_v44 = vrot.slane %v1483_v21, 5  ;;  %v1499_v1 = vshll.u32 %v1113_v13, 16  ;;  %v1061_v21 = vld [vmem:[%s7547_s20 + $0xd0] sm:$0xf] }
  0xa4   : > { %v6189_v48 = vcombine.low %v1444_v0, %v1454_v24  ;;  %v1468_v4 = vsel %vm7609_vm8, %v1463_v18, %v1467_v52  ;;  %v1473_v46 = vrot.slane %v1472_v25, 4  ;;  %v1491_v54 = vrot.slane %v1489_v35, 5  ;;  %v1060_v0 = vld [vmem:[%s7547_s20 + $0xcc] sm:$0xf] }
  0xa5   : > { %v1486_v20 = vor.u32 %v1485_v44, %v1482_v63  ;;  %v1495_v60 = vrot.slane %v1493_v19, 4  ;;  %v1501_v14 = vrot.slane %v1499_v1, 5  ;;  %v1504_v9 = vshrl.u32 %v1058_v45, 16 }
  0xa6   : > { %2660 = vrot.lane.b32.xlu1 %v6189_v48, %s7129_s27  ;;  %v1478_v15 = vsel %vm7609_vm8, %v1473_v46, %v1477_v57  ;;  %v1507_v41 = vshll.u32 %v1058_v45, 16  ;;  %v1513_v38 = vshll.u32 %v1059_v3, 16  ;;  %v1517_v6 = vshrl.u32 %v1059_v3, 16  ;;  %v1115_v48 = vld [vmem:[%s7547_s20 + $0xd4] sm:$0x1] }
  0xa7   : > { %v6190_v13 = vcombine.low %v1468_v4, %v1478_v15  ;;  %v1487_v11 = vrot.slane %v1486_v20, 4  ;;  %v1496_v52 = vor.u32 %v1495_v60, %v1491_v54  ;;  %v1506_v49 = vrot.slane %v1504_v9, 4 }
  0xa8   : > { %v1509_v18 = vrot.slane %v1507_v41, 5  ;;  %v1515_v25 = vrot.slane %v1513_v38, 5  ;;  %v1519_v35 = vrot.slane %v1517_v6, 4  ;;  %v1523_v19 = vshll.u32 %v1114_v39, 16 }
  0xa9   : > { %2662 = vrot.lane.b32.xlu0 %v6190_v13, %s7129_s27  ;;  %v1492_v24 = vsel %vm7609_vm8, %v1487_v11, %v1491_v54  ;;  %v1497_v57 = vrot.slane %v1496_v52, 4  ;;  %v1528_v45 = vshrl.u32 %v1060_v0, 16  ;;  %v1531_v63 = vshll.u32 %v1060_v0, 16 }
  0xaa   : > { %v1510_v44 = vor.u32 %v1509_v18, %v1506_v49  ;;  %v1520_v1 = vor.u32 %v1519_v35, %v1515_v25  ;;  %v1525_v3 = vrot.slane %v1523_v19, 5  ;;  %v1537_v4 = vshll.u32 %v1061_v21, 16 }
  0xab   : > { %v1502_v46 = vsel %vm7609_vm8, %v1497_v57, %v1501_v14  ;;  %v1530_v20 = vrot.slane %v1528_v45, 4  ;;  %v1533_v60 = vrot.slane %v1531_v63, 5  ;;  %v1541_v9 = vshrl.u32 %v1061_v21, 16 }
  0xac   : > { %v6191_v39 = vcombine.low %v1492_v24, %v1502_v46  ;;  %v1511_v15 = vrot.slane %v1510_v44, 4  ;;  %v1521_v41 = vrot.slane %v1520_v1, 4  ;;  %v1539_v38 = vrot.slane %v1537_v4, 5 }
  0xad   : > { %v1534_v6 = vor.u32 %v1533_v60, %v1530_v20  ;;  %v1543_v54 = vrot.slane %v1541_v9, 4  ;;  %v1547_v13 = vshll.u32 %v1115_v48, 16  ;;  %v10560_v52 = vmov 0   ;;  %v7818_v48 = vld [vmem:[#allocation2 + $0x10] sm:$0xf] }
  0xae   : > { %2664 = vrot.lane.b32.xlu1 %v6191_v39, %s7129_s27  ;;  %v1516_v11 = vsel %vm7609_vm8, %v1511_v15, %v1515_v25  ;;  %v1526_v14 = vsel %vm7609_vm8, %v1521_v41, %v1525_v3  ;;  %340 = vst.msk [vmem:[#allocation2 + $0x8] sm:$0x1] %vm339_vm9, %v10560_v52  ;;  %v10561_v49 = vshll.u32 %v7324_v10, 16  ;;  %343 = vst.msk [vmem:[#allocation2 + $0x14] sm:$0x1] %vm339_vm9, %v10560_v52  ;;  %v10562_v24 = vshrl.u32 %v7376_v23, 16 }
  0xaf   : > { %346 = vst.msk [vmem:[#allocation2 + $0x20] sm:$0x1] %vm339_vm9, %v10560_v52  ;;  %349 = vst.msk [vmem:[#allocation2 + $0x2c] sm:$0x1] %vm339_vm9, %v10560_v52  ;;  %v6192_v10 = vcombine.low %v1516_v11, %v1526_v14  ;;  %v1535_v18 = vrot.slane %v1534_v6, 4  ;;  %v1544_v25 = vor.u32 %v1543_v54, %v1539_v38  ;;  %v1549_v35 = vrot.slane %v1547_v13, 5 }
  0xb0   : > { %v7771_v21 = vrot.slane %v10561_v49, 5  ;;  %352 = vst.msk [vmem:[#allocation2 + $0x38] sm:$0x1] %vm339_vm9, %v10560_v52  ;;  %355 = vst.msk [vmem:[#allocation2 + $0x44] sm:$0x1] %vm339_vm9, %v10560_v52  ;;  %v1596_v57 = vrot.slane %v10562_v24, 4  ;;  %v1624_v44 = vor.u32 %v7507_v50, %v7493_v27 }
  0xb1   : > { %358 = vst.msk [vmem:[#allocation2 + $0x50] sm:$0x1] %vm339_vm9, %v10560_v52  ;;  %361 = vst.msk [vmem:[#allocation2 + $0x5c] sm:$0x1] %vm339_vm9, %v10560_v52  ;;  %v10563_v45 = vshll.u32 %v7376_v23, 16  ;;  %2666 = vrot.lane.b32.xlu0 %v6192_v10, %s7129_s27  ;;  %v1540_v1 = vsel %vm7609_vm8, %v1535_v18, %v1539_v38  ;;  %v1545_v3 = vrot.slane %v1544_v25, 4 }
  0xb2   : > { %364 = vst.msk [vmem:[#allocation2 + $0x68] sm:$0x1] %vm339_vm9, %v10560_v52  ;;  %367 = vst.msk [vmem:[#allocation2 + $0x74] sm:$0x1] %vm339_vm9, %v10560_v52  ;;  %v1586_v19 = vor.u32 %v7448_v2, %v7771_v21  ;;  %v1603_v4 = vshll.u32 %v7818_v48, 16  ;;  %v1607_v2 = vshrl.u32 %v7818_v48, 16  ;;  %v1582_v11 = vsel %vm7609_vm8, %v7460_v28, %v7771_v21 }
  0xb3   : > { %370 = vst.msk [vmem:[#allocation2 + $0x80] sm:$0x1] %vm339_vm9, %v10560_v52  ;;  %373 = vst.msk [vmem:[#allocation2 + $0x8c] sm:$0x1] %vm339_vm9, %v10560_v52  ;;  %v1599_v63 = vrot.slane %v10563_v45, 5  ;;  %v539_v20 = vrot.slane %v7343_v37, 4  ;;  %v1550_v50 = vsel %vm7609_vm8, %v1545_v3, %v1549_v35 }
  0xb4   : > { %376 = vst.msk [vmem:[#allocation2 + $0x98] sm:$0x1] %vm339_vm9, %v10560_v52  ;;  %379 = vst.msk [vmem:[#allocation2 + $0xa4] sm:$0x1] %vm339_vm9, %v10560_v52  ;;  %v1587_v46 = vrot.slane %v1586_v19, 4  ;;  %v10564_v9 = vmov 0  ;;  %v6193_v37 = vcombine.low %v1540_v1, %v1550_v50 }
  0xb5   : > { %382 = vst.msk [vmem:[#allocation2 + $0xb0] sm:$0x1] %vm339_vm9, %v10560_v52  ;;  %385 = vst.msk [vmem:[#allocation2 + $0xbc] sm:$0x1] %vm339_vm9, %v10560_v52  ;;  %v1600_v23 = vor.u32 %v1599_v63, %v1596_v57  ;;  %v7823_v60 = vld [vmem:[#allocation2 + $0x1c] sm:$0xf] }
  0xb6   : > { %388 = vst.msk [vmem:[#allocation2 + $0xc8] sm:$0x1] %vm339_vm9, %v10560_v52  ;;  %391 = vst.msk [vmem:[#allocation2 + $0xd4] sm:$0x1] %vm339_vm9, %v10560_v52  ;;  %v1627_v27 = vshll.u32 %v7823_v60, 16  ;;  %v10565_v9 = vsel %vm7830_vm10, 4294967295, %v10564_v9  ;;  %2668 = vrot.lane.b32.xlu1 %v6193_v37, %s7129_s27 }
  0xb7   : > { %10566 = vst [vmem:[#allocation16_spill] sm:$0xff] %v10565_v9  ;;  %v7834_v39 = vrot.slane %v1603_v4, 5  ;;  %v1609_v15 = vrot.slane %v1607_v2, 4  ;;  %v1631_v41 = vshrl.u32 %v7823_v60, 16  ;;  %v7837_v38 = vrot.slane %v1600_v23, 4  ;;  %s7133_s27 = smov 16  }
  0xb8   : > { %v7839_v6 = vrot.slane %v1627_v27, 5  ;;  %v573_v54 = vrot.slane %v7359_v56, 4  ;;  %v7842_v13 = vld [vmem:[#allocation2 + $0x8] sm:$0x1]  ;;  %v853_v14 = vld [vmem:[#allocation2 + $0x14] sm:$0x1] }
  0xb9   : > { %v860_v52 = vld [vmem:[#allocation2 + $0x20] sm:$0x1]  ;;  %v1589_v49 = vshll.u32 %v7842_v13, 16  ;;  %v854_v10 = vsel %vm7830_vm10, %v539_v20, %v853_v14  ;;  %v10567_v18 = vrot.slane %v7335_v22, 4  ;;  %v7856_v25 = vrot.slane %v1624_v44, 4 }
  0xba   : > { %v867_v35 = vld [vmem:[#allocation2 + $0x2c] sm:$0x1]  ;;  %855 = vst [vmem:[#allocation2 + $0x14] sm:$0x1] %v854_v10  ;;  %v1606_v28 = vsel %vm7609_vm8, %v7837_v38, %v7834_v39  ;;  %v1610_v21 = vor.u32 %v1609_v15, %v7834_v39  ;;  %v1633_v19 = vrot.slane %v1631_v41, 4  ;;  %v10568_v45 = vshrl.u32 %v7393_v42, 16 }
  0xbb   : > { %v861_v56 = vsel %vm7830_vm10, %v10567_v18, %v860_v52  ;;  %v868_v22 = vsel %vm7830_vm10, %v573_v54, %v867_v35  ;;  %v2001_v24 = vld [vmem:[%s7547_s20] sm:$0xe]  ;;  %v1591_v57 = vrot.slane %v1589_v49, 5  ;;  %v10569_v44 = vshll.u32 %v7393_v42, 16  ;;  %v7870_v3 = vld [vmem:[#allocation2 + $0x28] sm:$0xf] }
  0xbc   : > { %862 = vst [vmem:[#allocation2 + $0x20] sm:$0x1] %v861_v56  ;;  %869 = vst [vmem:[#allocation2 + $0x2c] sm:$0x1] %v868_v22  ;;  %v1644_v63 = vrot.slane %v10568_v45, 4  ;;  %v1651_v4 = vshll.u32 %v7870_v3, 16  ;;  %v1634_v2 = vor.u32 %v1633_v19, %v7839_v6 }
  0xbd   : > { %v1647_v1 = vrot.slane %v10569_v44, 5  ;;  %v1655_v20 = vshrl.u32 %v7870_v3, 16  ;;  %vm2073_vm11 = vcmask 1042432   ;;  %vm2074_vm12 = vcmask 1046532   ;;  %v2002_v23 = vld [vmem:[%s7547_s20 + $0xc] sm:$0xe] }
  0xbe   : > { %v1592_v27 = vsel %vm7609_vm8, %v1587_v46, %v1591_v57  ;;  %v1653_v15 = vrot.slane %v1651_v4, 5  ;;  %v6104_v41 = vrot.slane %v2001_v24, 9  ;;  %v1611_v42 = vrot.slane %v1610_v21, 4  ;;  %vm7878_vm13 = vmor %vm2073_vm11, %vm2074_vm12  ;;  %v2202_v19 = vld [vmem:[#allocation2] sm:$0xe] }
  0xbf   : > { %v1648_v50 = vor.u32 %v1647_v1, %v1644_v63  ;;  %v6194_v37 = vcombine.low %v1582_v11, %v1592_v27  ;;  %v1657_v54 = vrot.slane %v1655_v20, 4  ;;  %v2078_v52 = vrot.slane %v7575_v47, 5  ;;  %v2203_v44 = vld [vmem:[#allocation2 + $0xc] sm:$0xe]  ;;  %v6966_v20 = vld [vmem:[#allocation2 + $0x4] sm:$0xf] }
  0xc0   : > { %v2081_v10 = vrot.slane %v7581_v61, 5  ;;  %v6105_v18 = vrot.slane %v2002_v23, 9  ;;  %v2085_v56 = vrot.slane %v7588_v26, 5  ;;  %v1630_v46 = vsel %vm7609_vm8, %v7856_v25, %v7839_v6 }
  0xc1   : > { %v1649_v49 = vrot.slane %v1648_v50, 4  ;;  %2724 = vrot.lane.b32.xlu0 %v6194_v37, %s7130_s28  ;;  %v1658_v11 = vor.u32 %v1657_v54, %v1653_v15  ;;  %v2080_v35 = vrot.slane %v2078_v52, 4  ;;  %v2088_v21 = vrot.slane %v7602_v62, 5  ;;  %v1552_v47 = vld [vmem:[#allocation2 + $0x14] sm:$0x1] }
  0xc2   : > { %v1635_v61 = vrot.slane %v1634_v2, 4  ;;  %v2079_v24 = vsel %vm7878_vm13, %v6104_v41, %v2078_v52  ;;  %v2087_v57 = vrot.slane %v2085_v56, 4  ;;  %v1613_v45 = vshll.u32 %v1552_v47, 16 }
  0xc3   : > { %v7891_v22 = vld [vmem:[#allocation2 + $0x20] sm:$0x1]  ;;  %v1654_v26 = vsel %vm7609_vm8, %v1649_v49, %v1653_v15  ;;  %v7898_v6 = vld [vmem:[#allocation2 + $0x2c] sm:$0x1]  ;;  %v2082_v62 = vsel %vm7878_vm13, %v2080_v35, %v2081_v10  ;;  %v7904_v25 = vsel %vm7878_vm13, %v6105_v18, %v2085_v56  ;;  %v1659_v1 = vrot.slane %v1658_v11, 4 }
  0xc4   : > { %v1637_v63 = vshll.u32 %v7891_v22, 16  ;;  %v1661_v4 = vshll.u32 %v7898_v6, 16  ;;  %v6122_v2 = vrot.slane %v2202_v19, 9  ;;  %v2276_v23 = vrot.slane %v6966_v20, 5  ;;  %v2003_v35 = vld [vmem:[%s7547_s20 + $0x18] sm:$0xe] }
  0xc5   : > { %v1615_v27 = vrot.slane %v1613_v45, 5  ;;  %v7909_v15 = vsel %vm7878_vm13, %v2087_v57, %v2088_v21  ;;  %v2279_v41 = vrot.slane %v7842_v13, 5  ;;  %v6212_v54 = vcombine.low %v2079_v24, %v2082_v62  ;;  %v2204_v24 = vld [vmem:[#allocation2 + $0x18] sm:$0xe]  ;;  %v2004_v57 = vld [vmem:[%s7547_s20 + $0x24] sm:$0xe] }
  0xc6   : > { %v1639_v50 = vrot.slane %v1637_v63, 5  ;;  %v1663_v37 = vrot.slane %v1661_v4, 5  ;;  %v2278_v52 = vrot.slane %v2276_v23, 4  ;;  %v6123_v49 = vrot.slane %v2203_v44, 9 }
  0xc7   : > { %v1616_v10 = vsel %vm7609_vm8, %v1611_v42, %v1615_v27  ;;  %v2283_v56 = vrot.slane %v7818_v48, 5  ;;  %v2286_v11 = vrot.slane %v1552_v47, 5  ;;  %v6213_v42 = vcombine.low %v7904_v25, %v7909_v15 }
  0xc8   : > { %v1640_v18 = vsel %vm7609_vm8, %v1635_v61, %v1639_v50  ;;  %v6195_v13 = vcombine.low %v1606_v28, %v1616_v10  ;;  %v1664_v19 = vsel %vm7609_vm8, %v1659_v1, %v1663_v37  ;;  %v2277_v48 = vsel %vm7878_vm13, %v6122_v2, %v2276_v23  ;;  %v874_v23 = vld [vmem:[#allocation2 + $0x38] sm:$0x1]  ;;  %v2205_v37 = vld [vmem:[#allocation2 + $0x24] sm:$0xe]  ;;  %v2005_v10 = vld [vmem:[%s7547_s20 + $0x30] sm:$0xe] }
  0xc9   : > { %v6196_v21 = vcombine.low %v1630_v46, %v1640_v18  ;;  %v6197_v61 = vcombine.low %v1654_v26, %v1664_v19  ;;  %v2280_v47 = vsel %vm7878_vm13, %v2278_v52, %v2279_v41  ;;  %v2285_v45 = vrot.slane %v2283_v56, 4  ;;  %v7940_v26 = vpop.permute.xlu0 %2544  ;;  %v7987_v19 = vpop.permute.xlu1 %2548 }
  0xca   : > { %2726 = vrot.lane.b32.xlu1 %v6195_v13, %s7130_s28  ;;  %v7936_v39 = vsel %vm7878_vm13, %v6123_v49, %v2283_v56  ;;  %v6106_v38 = vrot.slane %v2003_v35, 9  ;;  %v2092_v28 = vrot.slane %v7619_v16, 5  ;;  %v2095_v46 = vrot.slane %v7627_v40, 5 }
  0xcb   : > { %2728 = vrot.lane.b32.xlu0 %v6196_v21, %s7130_s28  ;;  %v7944_v63 = vsel %vm7878_vm13, %v2285_v45, %v2286_v11  ;;  %v6124_v62 = vrot.slane %v2204_v24, 9  ;;  %v2290_v25 = vrot.slane %v7823_v60, 5  ;;  %v6107_v44 = vrot.slane %v2004_v57, 9  ;;  %v7981_v11 = vld [vmem:[#allocation2 + $0x34] sm:$0xf]  ;;  %v6821_v45 = vld [vmem:[%s10506_s3 + $0x8] sm:$0xff]  }
  0xcc   : > { %v6230_v1 = vcombine.low %v2277_v48, %v2280_v47  ;;  %v2094_v4 = vrot.slane %v2092_v28, 4  ;;  %v2293_v2 = vrot.slane %v7891_v22, 5  ;;  %v2099_v20 = vrot.slane %v7633_v32, 5  ;;  %v7985_v21 = vld [vmem:[#allocation2 + $0x30] sm:$0xe]  ;;  %v6820_v47 = vld [vmem:[%s10506_s3] sm:$0xff]  }
  0xcd   : > { %v7951_v16 = vsel %vm7878_vm13, %v6106_v38, %v2092_v28  ;;  %v2292_v40 = vrot.slane %v2290_v25, 4  ;;  %v2102_v27 = vrot.slane %v7641_v51, 5  ;;  %v590_v50 = vrot.slane %v7366_v5, 4  ;;  %6498 = vmatprep.subr.bf16.mxu1 %v6820_v47 }
  0xce   : > { %2730 = vrot.lane.b32.xlu1 %v6197_v61, %s7130_s28  ;;  %v6231_v60 = vcombine.low %v7936_v39, %v7944_v63  ;;  %v2096_v32 = vsel %vm7878_vm13, %v2094_v4, %v2095_v46  ;;  %v2101_v22 = vrot.slane %v2099_v20, 4  ;;  %v10572_v15 = vshrl.u32 %v7412_v7, 16  ;;  %v6822_v39 = vld [vmem:[%s10506_s3 + $0x24] sm:$0xff]   ;;  %v6824_v63 = vld [vmem:[%s10506_s3 + $0x2c] sm:$0xff]   ;;  %v6969_v4 = vld [vmem:[%s7547_s20 + $0x34] sm:$0xf]  ;;  %6499 = vmatpush3.bf16.msra.mxu1 %v6820_v47 }
  0xcf   : > { %2814 = vrot.lane.b32.xlu0 %v6212_v54, %s7131_s30  ;;  %v7965_v51 = vsel %vm7878_vm13, %v6124_v62, %v2290_v25  ;;  %v7969_v5 = vsel %vm7878_vm13, %v6107_v44, %v2099_v20  ;;  %v875_v54 = vsel %vm7830_vm10, %v590_v50, %v874_v23  ;;  %v10573_v52 = vshll.u32 %v7412_v7, 16  ;;  %v7989_v7 = vpop.permute.xlu0 %2546  ;;  %v8013_v62 = vld [vmem:[#allocation2 + $0x90] sm:$0xf]  ;;  %6540 = vmatprep.subr.bf16.mxu0 %v6822_v39 }
  0xd0   : > { %v1668_v41 = vrot.slane %v10572_v15, 4  ;;  %v6214_v18 = vcombine.low %v7951_v16, %v2096_v32  ;;  %v7979_v56 = vsel %vm7878_vm13, %v2292_v40, %v2293_v2  ;;  %876 = vst [vmem:[#allocation2 + $0x38] sm:$0x1] %v875_v54  ;;  %v1675_v35 = vshll.u32 %v7981_v11, 16  ;;  %6541 = vmatpush3.bf16.msra.mxu0 %v6822_v39  ;;  %6500 = vmatprep.subr.bf16.mxu1 %v6821_v45  ;;  %v6826_v15 = vld [vmem:[%s10506_s3 + $0x34] sm:$0xff]  }
  0xd1   : > { %v1671_v49 = vrot.slane %v10573_v52, 5  ;;  %v1679_v13 = vshrl.u32 %v7981_v11, 16  ;;  %v7993_v24 = vsel %vm7878_vm13, %v2101_v22, %v2102_v27  ;;  %v6125_v61 = vrot.slane %v2205_v37, 9  ;;  %v6970_v27 = vld [vmem:[%s7547_s20 + $0x38] sm:$0x1]  ;;  %v6823_v22 = vld [vmem:[%s10506_s3 + $0x10] sm:$0xff]   ;;  %6542 = vmatprep.subr.bf16.mxu0 %v6824_v63 }
  0xd2   : > { %v2297_v48 = vrot.slane %v7870_v3, 5  ;;  %2816 = vrot.lane.b32.xlu1 %v6213_v42, %s7131_s30  ;;  %v8007_v38 = vrot.slane %v1675_v35, 5  ;;  %v2300_v28 = vrot.slane %v7898_v6, 5  ;;  %v6108_v46 = vrot.slane %v2005_v10, 9  ;;  %v881_v54 = vld [vmem:[#allocation2 + $0x44] sm:$0x1]  ;;  %6501 = vmatpush3.bf16.msra.mxu1 %v6821_v45 }
  0xd3   : > { %v1672_v57 = vor.u32 %v1671_v49, %v1668_v41  ;;  %2904 = vrot.lane.b32.xlu0 %v6230_v1, %s7132_s17  ;;  %v1681_v3 = vrot.slane %v1679_v13, 4  ;;  %v2106_v1 = vrot.slane %v6969_v4, 5  ;;  %v6232_v6 = vcombine.low %v7965_v51, %v7979_v56  ;;  %v2006_v52 = vld [vmem:[%s7547_s20 + $0x3c] sm:$0xe]  ;;  %v8052_v49 = vpop.permute.xlu1 %2550  ;;  %v8054_v10 = vpop.permute.xlu0 %2552  ;;  %6502 = vmatprep.subr.bf16.mxu1 %v6823_v22 }
  0xd4   : > { %v2299_v42 = vrot.slane %v2297_v48, 4  ;;  %v6215_v2 = vcombine.low %v7969_v5, %v7993_v24  ;;  %v2304_v23 = vrot.slane %v7981_v11, 5  ;;  %v8027_v16 = vsel %vm7878_vm13, %v6125_v61, %v2297_v48  ;;  %v8063_v48 = vld [vmem:[#allocation2 + $0x40] sm:$0xf]  ;;  %6543 = vmatpush3.bf16.msra.mxu0 %v6824_v63 }
  0xd5   : > { %v8016_v44 = vrot.slane %v1672_v57, 4  ;;  %v1682_v20 = vor.u32 %v1681_v3, %v8007_v38  ;;  %v2109_v50 = vrot.slane %v6970_v27, 5  ;;  %v6126_v32 = vrot.slane %v7985_v21, 9  ;;  %v6825_v3 = vld [vmem:[%s10506_s3 + $0x18] sm:$0xff]   ;;  %6544 = vmatprep.subr.bf16.mxu0 %v6826_v15 }
  0xd6   : > { %v8031_v40 = vsel %vm7878_vm13, %v2299_v42, %v2300_v28  ;;  %2906 = vrot.lane.b32.xlu1 %v6231_v60, %s7132_s17  ;;  %v8049_v37 = vsel %vm7878_vm13, %v6108_v46, %v2106_v1  ;;  %v2108_v51 = vrot.slane %v2106_v1, 4  ;;  %v2306_v5 = vrot.slane %v2304_v23, 4  ;;  %v6828_v45 = vld [vmem:[%s10506_s3 + $0x3c] sm:$0xff]   ;;  %6503 = vmatpush3.bf16.msra.mxu1 %v6823_v22 }
  0xd7   : > { %2818 = vrot.lane.b32.xlu0 %v6214_v18, %s7131_s30  ;;  %v1678_v41 = vsel %vm7609_vm8, %v8016_v44, %v8007_v38  ;;  %v1555_v60 = vld [vmem:[#allocation2 + $0x38] sm:$0x1]  ;;  %v1683_v56 = vrot.slane %v1682_v20, 4  ;;  %v607_v18 = vrot.slane %v7387_v36, 4  ;;  %v10574_v11 = vshrl.u32 %v7429_v31, 16  ;;  %6504 = vmatprep.subr.bf16.mxu1 %v6825_v3 }
  0xd8   : > { %v10575_v13 = vshll.u32 %v7429_v31, 16  ;;  %v1685_v24 = vshll.u32 %v1555_v60, 16  ;;  %v6233_v57 = vcombine.low %v8027_v16, %v8031_v40  ;;  %v2307_v61 = vrot.slane %v1555_v60, 5  ;;  %v6972_v44 = vld [vmem:[%s7547_s20 + $0x40] sm:$0xf]  ;;  %6545 = vmatpush3.bf16.msra.mxu0 %v6826_v15 }
  0xd9   : > { %v1692_v35 = vrot.slane %v10574_v11, 4  ;;  %v1699_v47 = vshll.u32 %v8063_v48, 16  ;;  %v8068_v36 = vsel %vm7878_vm13, %v6126_v32, %v2304_v23  ;;  %v882_v31 = vsel %vm7830_vm10, %v607_v18, %v881_v54  ;;  %v6973_v23 = vld [vmem:[%s7547_s20 + $0x44] sm:$0x1]  ;;  %v888_v40 = vld [vmem:[#allocation2 + $0x50] sm:$0x1]  ;;  %v8093_v54 = vpop.permute.xlu1 %2554  ;;  %6546 = vmatprep.subr.bf16.mxu0 %v6828_v45 }
  0xda   : > { %v1695_v21 = vrot.slane %v10575_v13, 5  ;;  %v1703_v39 = vshrl.u32 %v8063_v48, 16  ;;  %v6109_v38 = vrot.slane %v2006_v52, 9  ;;  %2908 = vrot.lane.b32.xlu1 %v6232_v6, %s7132_s17  ;;  %v1687_v28 = vrot.slane %v1685_v24, 5  ;;  %883 = vst [vmem:[#allocation2 + $0x44] sm:$0x1] %v882_v31  ;;  %v8095_v52 = vpop.permute.xlu0 %2556  ;;  %6505 = vmatpush3.bf16.msra.mxu1 %v6825_v3 }
  0xdb   : > { %2820 = vrot.lane.b32.xlu0 %v6215_v2, %s7131_s30  ;;  %v2308_v46 = vsel %vm7878_vm13, %v2306_v5, %v2307_v61  ;;  %v8083_v63 = vrot.slane %v1699_v47, 5  ;;  %v2113_v42 = vrot.slane %v6972_v44, 5  ;;  %v2110_v4 = vsel %vm7878_vm13, %v2108_v51, %v2109_v50  ;;  %v2207_v5 = vld [vmem:[#allocation2 + $0x3c] sm:$0xe]  ;;  %10576 = vst [vmem:[#allocation17_spill] sm:$0xff] %v8095_v52 }
  0xdc   : > { %v1696_v1 = vor.u32 %v1695_v21, %v1692_v35  ;;  %v1705_v20 = vrot.slane %v1703_v39, 4  ;;  %v2116_v16 = vrot.slane %v6973_v23, 5  ;;  %v1688_v6 = vsel %vm7609_vm8, %v1683_v56, %v1687_v28  ;;  %v6974_v11 = vld [vmem:[#allocation2 + $0x4c] sm:$0xf]  ;;  %v2007_v13 = vld [vmem:[%s7547_s20 + $0x48] sm:$0xe]  ;;  %6547 = vmatpush3.bf16.msra.mxu0 %v6828_v45 }
  0xdd   : > { %v6234_v2 = vcombine.low %v8068_v36, %v2308_v46  ;;  %v2115_v27 = vrot.slane %v2113_v42, 4  ;;  %v624_v32 = vrot.slane %v7404_v55, 4  ;;  %v6198_v50 = vcombine.low %v1678_v41, %v1688_v6  ;;  %v2208_v47 = vld [vmem:[#allocation2 + $0x48] sm:$0xe] }
  0xde   : > { %v1706_v51 = vor.u32 %v1705_v20, %v8083_v63  ;;  %v2114_v60 = vsel %vm7878_vm13, %v6109_v38, %v2113_v42  ;;  %v10577_v56 = vshrl.u32 %v7443_v59, 16  ;;  %v10578_v15 = vshll.u32 %v7443_v59, 16  ;;  %v6975_v42 = vld [vmem:[%s7547_s20 + $0x4c] sm:$0xf] }
  0xdf   : > { %2910 = vrot.lane.b32.xlu0 %v6233_v57, %s7132_s17  ;;  %v2117_v55 = vsel %vm7878_vm13, %v2115_v27, %v2116_v16  ;;  %v889_v22 = vsel %vm7830_vm10, %v624_v32, %v888_v40  ;;  %v1723_v35 = vshll.u32 %v6974_v11, 16  ;;  %2732 = vrot.lane.b32.xlu1 %v6198_v50, %s7130_s28  ;;  %v6216_v21 = vcombine.low %v8049_v37, %v2110_v4  ;;  %v8117_v16 = vpop.permute.xlu1 %2558  ;;  %v8119_v40 = vpop.permute.xlu0 %2560 }
  0xe0   : > { %v1716_v18 = vrot.slane %v10577_v56, 4  ;;  %v1719_v41 = vrot.slane %v10578_v15, 5  ;;  %v1697_v24 = vrot.slane %v1696_v1, 4  ;;  %890 = vst [vmem:[#allocation2 + $0x50] sm:$0x1] %v889_v22  ;;  %v1727_v57 = vshrl.u32 %v6974_v11, 16 }
  0xe1   : > { %v6127_v61 = vrot.slane %v2207_v5, 9  ;;  %v1707_v36 = vrot.slane %v1706_v51, 4  ;;  %v8112_v39 = vrot.slane %v1723_v35, 5  ;;  %v2311_v59 = vrot.slane %v8063_v48, 5  ;;  %v1556_v38 = vld [vmem:[#allocation2 + $0x44] sm:$0x1] }
  0xe2   : > { %v1720_v31 = vor.u32 %v1719_v41, %v1716_v18  ;;  %v6217_v28 = vcombine.low %v2114_v60, %v2117_v55  ;;  %v1729_v46 = vrot.slane %v1727_v57, 4  ;;  %v6110_v44 = vrot.slane %v2007_v13, 9  ;;  %10579 = vst [vmem:[#allocation18_spill] sm:$0xff] %v8117_v16  ;;  %10580 = vst [vmem:[#allocation19_spill] sm:$0xff] %v8119_v40  ;;  %v8121_v48 = vld [vmem:[#allocation2 + $0xcc] sm:$0xf] }
  0xe3   : > { %v2120_v37 = vrot.slane %v6975_v42, 5  ;;  %2912 = vrot.lane.b32.xlu0 %v6234_v2, %s7132_s17  ;;  %v1709_v4 = vshll.u32 %v1556_v38, 16  ;;  %v2313_v20 = vrot.slane %v2311_v59, 4  ;;  %v6128_v23 = vrot.slane %v2208_v47, 9  ;;  %2822 = vrot.lane.b32.xlu1 %v6216_v21, %s7131_s30  ;;  %v6977_v5 = vld [vmem:[%s7547_s20 + $0x50] sm:$0x1] }
  0xe4   : > { %v1721_v1 = vrot.slane %v1720_v31, 4  ;;  %v1978_v3 = vshrl.u32 %v8121_v48, 16  ;;  %v1730_v45 = vor.u32 %v1729_v46, %v8112_v39  ;;  %v2312_v6 = vsel %vm7878_vm13, %v6127_v61, %v2311_v59  ;;  %v2008_v35 = vld [vmem:[%s7547_s20 + $0x54] sm:$0xe]  ;;  %v895_v61 = vld [vmem:[#allocation2 + $0x5c] sm:$0x1]  ;;  %v8155_v46 = vpop.permute.xlu1 %2562 }
  0xe5   : > { %v2314_v2 = vrot.slane %v1556_v38, 5  ;;  %v1702_v27 = vsel %vm7609_vm8, %v1697_v24, %v8083_v63  ;;  %v1711_v32 = vrot.slane %v1709_v4, 5  ;;  %v2123_v50 = vrot.slane %v6977_v5, 5  ;;  %v8152_v38 = vld [vmem:[#allocation2 + $0x58] sm:$0xf]  ;;  %10583 = vst [vmem:[#allocation20_spill] sm:$0xff] %v8155_v46 }
  0xe6   : > { %v2318_v51 = vrot.slane %v6974_v11, 5  ;;  %v1726_v60 = vsel %vm7609_vm8, %v1721_v1, %v8112_v39  ;;  %v8139_v18 = vsel %vm7878_vm13, %v6110_v44, %v2120_v37  ;;  %v2122_v55 = vrot.slane %v2120_v37, 4  ;;  %v8157_v44 = vpop.permute.xlu0 %2564  ;;  %v8364_v46 = vld [vmem:[%s7547_s20 + $0x88] sm:$0xf] }
  0xe7   : > { %v2315_v56 = vsel %vm7878_vm13, %v2313_v20, %v2314_v2  ;;  %v1712_v22 = vsel %vm7609_vm8, %v1707_v36, %v1711_v32  ;;  %2824 = vrot.lane.b32.xlu0 %v6217_v28, %s7131_s30  ;;  %v1557_v63 = vld [vmem:[#allocation2 + $0x50] sm:$0x1]  ;;  %v1731_v15 = vrot.slane %v1730_v45, 4  ;;  %v641_v47 = vrot.slane %v7416_v12, 4  ;;  %v6979_v2 = vld [vmem:[%s7547_s20 + $0x58] sm:$0xf] }
  0xe8   : > { %v6235_v41 = vcombine.low %v2312_v6, %v2315_v56  ;;  %v2319_v11 = vsel %vm7878_vm13, %v6128_v23, %v2318_v51  ;;  %v6199_v13 = vcombine.low %v1702_v27, %v1712_v22  ;;  %v1733_v21 = vshll.u32 %v1557_v63, 16  ;;  %v6980_v32 = vld [vmem:[%s7547_s20 + $0x5c] sm:$0x1] }
  0xe9   : > { %v2320_v24 = vrot.slane %v2318_v51, 4  ;;  %v2321_v57 = vrot.slane %v1557_v63, 5  ;;  %v10581_v31 = vshrl.u32 %v7463_v29, 16  ;;  %v10582_v36 = vshll.u32 %v7463_v29, 16  ;;  %v8174_v51 = vld [vmem:[#allocation2 + $0x9c] sm:$0xf] }
  0xea   : > { %v1747_v28 = vshll.u32 %v8152_v38, 16  ;;  %2734 = vrot.lane.b32.xlu1 %v6199_v13, %s7130_s28  ;;  %v1735_v42 = vrot.slane %v1733_v21, 5  ;;  %v1751_v37 = vshrl.u32 %v8152_v38, 16  ;;  %v6111_v29 = vrot.slane %v2008_v35, 9  ;;  %v902_v63 = vld [vmem:[#allocation2 + $0x68] sm:$0x1] }
  0xeb   : > { %v1740_v39 = vrot.slane %v10581_v31, 4  ;;  %v1743_v59 = vrot.slane %v10582_v36, 5  ;;  %v2322_v12 = vsel %vm7878_vm13, %v2320_v24, %v2321_v57  ;;  %2914 = vrot.lane.b32.xlu0 %v6235_v41, %s7132_s17  ;;  %v2124_v4 = vsel %vm7878_vm13, %v2122_v55, %v2123_v50  ;;  %v2209_v13 = vld [vmem:[#allocation2 + $0x54] sm:$0xe]  ;;  %v8191_v36 = vpop.permute.xlu0 %2568  ;;  %v6998_v50 = vld [vmem:[%s7547_s20 + $0x10] sm:$0xf] }
  0xec   : > { %v6236_v1 = vcombine.low %v2319_v11, %v2322_v12  ;;  %v896_v20 = vsel %vm7830_vm10, %v641_v47, %v895_v61  ;;  %v8168_v23 = vrot.slane %v1747_v28, 5  ;;  %v1736_v45 = vsel %vm7609_vm8, %v1731_v15, %v1735_v42  ;;  %v6982_v47 = vld [vmem:[#allocation2 + $0x64] sm:$0xf] }
  0xed   : > { %897 = vst [vmem:[#allocation2 + $0x5c] sm:$0x1] %v896_v20  ;;  %v1753_v6 = vrot.slane %v1751_v37, 4  ;;  %v2127_v27 = vrot.slane %v6979_v2, 5  ;;  %v2130_v5 = vrot.slane %v6980_v32, 5  ;;  %v1981_v55 = vshll.u32 %v8121_v48, 16 }
  0xee   : > { %v6200_v22 = vcombine.low %v1726_v60, %v1736_v45  ;;  %v1744_v41 = vor.u32 %v1743_v59, %v1740_v39  ;;  %v658_v35 = vrot.slane %v7437_v43, 4  ;;  %v6218_v21 = vcombine.low %v8139_v18, %v2124_v4  ;;  %v8189_v39 = vpop.permute.xlu1 %2566  ;;  %v2009_v32 = vld [vmem:[%s7547_s20 + $0x60] sm:$0xe] }
  0xef   : > { %v2128_v15 = vsel %vm7878_vm13, %v6111_v29, %v2127_v27  ;;  %v2129_v11 = vrot.slane %v2127_v27, 4  ;;  %2916 = vrot.lane.b32.xlu0 %v6236_v1, %s7132_s17  ;;  %v10584_v24 = vshrl.u32 %v7483_v58, 16  ;;  %v10585_v60 = vshll.u32 %v7483_v58, 16 }
  0xf0   : > { %2736 = vrot.lane.b32.xlu1 %v6200_v22, %s7130_s28  ;;  %v1771_v31 = vshll.u32 %v6982_v47, 16  ;;  %v1754_v43 = vor.u32 %v1753_v6, %v8168_v23  ;;  %v903_v18 = vsel %vm7830_vm10, %v658_v35, %v902_v63  ;;  %v1775_v28 = vshrl.u32 %v6982_v47, 16  ;;  %v8207_v6 = vld [vmem:[#allocation2 + $0xd0] sm:$0xf]  ;;  %v2210_v63 = vld [vmem:[#allocation2 + $0x60] sm:$0xe] }
  0xf1   : > { %v1764_v57 = vrot.slane %v10584_v24, 4  ;;  %v1767_v61 = vrot.slane %v10585_v60, 5  ;;  %v2131_v59 = vsel %vm7878_vm13, %v2129_v11, %v2130_v5  ;;  %904 = vst [vmem:[#allocation2 + $0x68] sm:$0x1] %v903_v18  ;;  %v6129_v37 = vrot.slane %v2209_v13, 9  ;;  %v8219_v13 = vpop.permute.xlu0 %2572 }
  0xf2   : > { %v6219_v42 = vcombine.low %v2128_v15, %v2131_v59  ;;  %v8198_v12 = vrot.slane %v1771_v31, 5  ;;  %v8202_v29 = vrot.slane %v1978_v3, 4  ;;  %v1745_v4 = vrot.slane %v1744_v41, 4  ;;  %v6984_v15 = vld [vmem:[%s7547_s20 + $0x64] sm:$0xf]  ;;  %v8217_v35 = vpop.permute.xlu1 %2570 }
  0xf3   : > { %v1768_v58 = vor.u32 %v1767_v61, %v1764_v57  ;;  %v1777_v1 = vrot.slane %v1775_v28, 4  ;;  %v2325_v20 = vrot.slane %v8152_v38, 5  ;;  %v8205_v45 = vrot.slane %v1981_v55, 5  ;;  %v6995_v31 = vld [vmem:[%s7547_s20 + $0x18] sm:$0xf] }
  0xf4   : > { %2826 = vrot.lane.b32.xlu1 %v6218_v21, %s7131_s30  ;;  %v1558_v27 = vld [vmem:[#allocation2 + $0x5c] sm:$0x1]  ;;  %2828 = vrot.lane.b32.xlu0 %v6219_v42, %s7131_s30  ;;  %v1755_v48 = vrot.slane %v1754_v43, 4  ;;  %v2134_v11 = vrot.slane %v6984_v15, 5  ;;  %v8221_v21 = vld [vmem:[#allocation2 + $0xa8] sm:$0xf]  ;;  %v1750_v57 = vsel %vm7609_vm8, %v1745_v4, %v8168_v23 }
  0xf5   : > { %v1757_v3 = vshll.u32 %v1558_v27, 16  ;;  %v1769_v5 = vrot.slane %v1768_v58, 4  ;;  %v2327_v22 = vrot.slane %v2325_v20, 4  ;;  %v1778_v38 = vor.u32 %v1777_v1, %v8198_v12  ;;  %v6986_v23 = vld [vmem:[%s7547_s20 + $0x68] sm:$0x1] }
  0xf6   : > { %v2326_v55 = vsel %vm7878_vm13, %v6129_v37, %v2325_v20  ;;  %v2328_v41 = vrot.slane %v1558_v27, 5  ;;  %v6112_v61 = vrot.slane %v2009_v32, 9  ;;  %v6130_v59 = vrot.slane %v2210_v63, 9 }
  0xf7   : > { %v1759_v60 = vrot.slane %v1757_v3, 5  ;;  %v2332_v18 = vrot.slane %v6982_v47, 5  ;;  %v1774_v58 = vsel %vm7609_vm8, %v1769_v5, %v8198_v12  ;;  %v2137_v4 = vrot.slane %v6986_v23, 5  ;;  %v2010_v3 = vld [vmem:[%s7547_s20 + $0x6c] sm:$0xe] }
  0xf8   : > { %v2329_v43 = vsel %vm7878_vm13, %v2327_v22, %v2328_v41  ;;  %v1559_v42 = vld [vmem:[#allocation2 + $0x68] sm:$0x1]  ;;  %v1779_v20 = vrot.slane %v1778_v38, 4  ;;  %v2136_v32 = vrot.slane %v2134_v11, 4  ;;  %v2135_v47 = vsel %vm7878_vm13, %v6112_v61, %v2134_v11  ;;  %v909_v41 = vld [vmem:[#allocation2 + $0x74] sm:$0x1]  ;;  %v8250_v11 = vpop.permute.xlu0 %2576 }
  0xf9   : > { %v1760_v28 = vsel %vm7609_vm8, %v1755_v48, %v1759_v60  ;;  %v6237_v37 = vcombine.low %v2326_v55, %v2329_v43  ;;  %v1781_v27 = vshll.u32 %v1559_v42, 16  ;;  %v2333_v48 = vsel %vm7878_vm13, %v6130_v59, %v2332_v18  ;;  %v8248_v60 = vpop.permute.xlu1 %2574  ;;  %v8254_v43 = vld [vmem:[#allocation2 + $0x70] sm:$0xf] }
  0xfa   : > { %v6201_v1 = vcombine.low %v1750_v57, %v1760_v28  ;;  %v2334_v22 = vrot.slane %v2332_v18, 4  ;;  %v2335_v63 = vrot.slane %v1559_v42, 5  ;;  %v675_v5 = vrot.slane %v7456_v17, 4 }
  0xfb   : > { %2918 = vrot.lane.b32.xlu0 %v6237_v37, %s7132_s17  ;;  %v1783_v12 = vrot.slane %v1781_v27, 5  ;;  %v10586_v38 = vshrl.u32 %v7497_v33, 16  ;;  %v10587_v15 = vshll.u32 %v7497_v33, 16  ;;  %v1795_v59 = vshll.u32 %v8254_v43, 16 }
  0xfc   : > { %2738 = vrot.lane.b32.xlu1 %v6201_v1, %s7130_s28  ;;  %v2336_v61 = vsel %vm7878_vm13, %v2334_v22, %v2335_v63  ;;  %v1799_v17 = vshrl.u32 %v8254_v43, 16  ;;  %v6113_v18 = vrot.slane %v2010_v3, 9  ;;  %v2138_v28 = vsel %vm7878_vm13, %v2136_v32, %v2137_v4  ;;  %v6988_v22 = vld [vmem:[%s7547_s20 + $0x70] sm:$0xf]  ;;  %v6990_v32 = vld [vmem:[%s7547_s20 + $0x74] sm:$0x1] }
  0xfd   : > { %v1788_v55 = vrot.slane %v10586_v38, 4  ;;  %v1791_v57 = vrot.slane %v10587_v15, 5  ;;  %v1784_v33 = vsel %vm7609_vm8, %v1779_v20, %v1783_v12  ;;  %v6238_v42 = vcombine.low %v2333_v48, %v2336_v61  ;;  %v8267_v38 = vld [vmem:[#allocation2 + $0xb4] sm:$0xf]  ;;  %v2211_v15 = vld [vmem:[#allocation2 + $0x6c] sm:$0xe] }
  0xfe   : > { %v910_v37 = vsel %vm7830_vm10, %v675_v5, %v909_v41  ;;  %v6202_v23 = vcombine.low %v1774_v58, %v1784_v33  ;;  %v8264_v1 = vrot.slane %v1795_v59, 5  ;;  %v1801_v27 = vrot.slane %v1799_v17, 4  ;;  %v8277_v61 = vld [vmem:[#allocation2 + $0xc0] sm:$0xf]  ;;  %v8298_v59 = vld [vmem:[#allocation2 + $0x7c] sm:$0xf] }
  0xff   : > { %911 = vst [vmem:[#allocation2 + $0x74] sm:$0x1] %v910_v37  ;;  %v2141_v63 = vrot.slane %v6988_v22, 5  ;;  %2920 = vrot.lane.b32.xlu0 %v6238_v42, %s7132_s17  ;;  %v1792_v4 = vor.u32 %v1791_v57, %v1788_v55  ;;  %v2144_v48 = vrot.slane %v6990_v32, 5  ;;  %v6220_v58 = vcombine.low %v2135_v47, %v2138_v28  ;;  %v6992_v33 = vld [vmem:[%s7547_s20] sm:$0xf]  ;;  %v8284_v47 = vpop.permute.xlu1 %2578  ;;  %v8286_v28 = vpop.permute.xlu0 %2634 }
 0x100   : > { %2740 = vrot.lane.b32.xlu1 %v6202_v23, %s7130_s28  ;;  %v1802_v41 = vor.u32 %v1801_v27, %v8264_v1  ;;  %v6993_v55 = vld [vmem:[%s7547_s20 + $0x4] sm:$0xf]  ;;  %v2339_v42 = vrot.slane %v8254_v43, 5  ;;  %v916_v37 = vld [vmem:[#allocation2 + $0x80] sm:$0x1]  ;;  %vm2940_vm14 = vcmask 48128  }
 0x101   : > { %v2142_v12 = vsel %vm7878_vm13, %v6113_v18, %v2141_v63  ;;  %v2143_v5 = vrot.slane %v2141_v63, 4  ;;  %v6140_v57 = vcombine.low %v6992_v33, %v6993_v55  ;;  %v692_v23 = vrot.slane %v7469_v30, 4 }
 0x102   : > { %v10588_v27 = vshrl.u32 %v7511_v53, 16  ;;  %v1793_v63 = vrot.slane %v1792_v4, 4  ;;  %v6131_v2 = vrot.slane %v2211_v15, 9  ;;  %v10589_v33 = vshll.u32 %v7511_v53, 16  ;;  %v923_v4 = vld [vmem:[#allocation2 + $0x8c] sm:$0x1] }
 0x103   : > { %v2145_v18 = vsel %vm7878_vm13, %v2143_v5, %v2144_v48  ;;  %v1803_v55 = vrot.slane %v1802_v41, 4  ;;  %v917_v17 = vsel %vm7830_vm10, %v692_v23, %v916_v37  ;;  %v1819_v30 = vshll.u32 %v8298_v59, 16  ;;  %v10590_v41 = vld [vmem:[#allocation9_spill] sm:$0xff]  ;;  %v10591_v15 = vld [vmem:[#allocation12_spill] sm:$0xff] }
 0x104   : > { %v1812_v22 = vrot.slane %v10588_v27, 4  ;;  %v6221_v32 = vcombine.low %v2142_v12, %v2145_v18  ;;  %v1815_v43 = vrot.slane %v10589_v33, 5  ;;  %2830 = vrot.lane.b32.xlu1 %v6220_v58, %s7131_s30  ;;  %v1823_v48 = vshrl.u32 %v8298_v59, 16  ;;  %918 = vst [vmem:[#allocation2 + $0x80] sm:$0x1] %v917_v17 }
 0x105   : > { %v2341_v53 = vrot.slane %v2339_v42, 4  ;;  %v709_v5 = vrot.slane %v10590_v41, 4  ;;  %v10592_v37 = vshrl.u32 %v10591_v15, 16  ;;  %v8306_v33 = vrot.slane %v1819_v30, 5  ;;  %v6997_v17 = vld [vmem:[%s7547_s20 + $0xc] sm:$0xf] }
 0x106   : > { %v1560_v12 = vld [vmem:[#allocation2 + $0x74] sm:$0x1]  ;;  %2832 = vrot.lane.b32.xlu0 %v6221_v32, %s7131_s30  ;;  %v1816_v58 = vor.u32 %v1815_v43, %v1812_v22  ;;  %v1825_v20 = vrot.slane %v1823_v48, 4  ;;  %v8310_v3 = vsel %vm2940_vm14, %v6140_v57, %v7940_v26  ;;  %v6996_v32 = vld [vmem:[%s7547_s20 + $0x1c] sm:$0xf]  ;;  %v6141_v22 = vcombine.low %v6997_v17, %v6998_v50 }
 0x107   : > { %v1836_v18 = vrot.slane %v10592_v37, 4  ;;  %v1805_v23 = vshll.u32 %v1560_v12, 16  ;;  %v2342_v27 = vrot.slane %v1560_v12, 5  ;;  %v6142_v24 = vcombine.low %v6995_v31, %v6996_v32  ;;  %v2011_v41 = vld [vmem:[%s7547_s20 + $0x78] sm:$0xe]  ;;  %v8319_v37 = vpop.permute.xlu1 %2636  ;;  %v8321_v12 = vpop.permute.xlu0 %2638 }
 0x108   : > { %v924_v43 = vsel %vm7830_vm10, %v709_v5, %v923_v4  ;;  %v1798_v30 = vsel %vm7609_vm8, %v1793_v63, %v8264_v1  ;;  %v2340_v31 = vsel %vm7878_vm13, %v6131_v2, %v2339_v42  ;;  %v10593_v50 = vshll.u32 %v10591_v15, 16  ;;  %v8333_v5 = vld [vmem:[#allocation2 + $0x88] sm:$0xf] }
 0x109   : > { %v1807_v26 = vrot.slane %v1805_v23, 5  ;;  %925 = vst [vmem:[#allocation2 + $0x8c] sm:$0x1] %v924_v43  ;;  %v2343_v48 = vsel %vm7878_vm13, %v2341_v53, %v2342_v27  ;;  %v1826_v4 = vor.u32 %v1825_v20, %v8306_v33  ;;  %v1843_v32 = vshll.u32 %v8333_v5, 16  ;;  %v7000_v53 = vld [vmem:[%s7547_s20 + $0x7c] sm:$0xf] }
 0x10a   : > { %v1839_v57 = vrot.slane %v10593_v50, 5  ;;  %v1847_v1 = vshrl.u32 %v8333_v5, 16  ;;  %v1817_v42 = vrot.slane %v1816_v58, 4  ;;  %v6114_v15 = vrot.slane %v2011_v41, 9  ;;  %v7001_v58 = vld [vmem:[%s7547_s20 + $0x80] sm:$0x1] }
 0x10b   : > { %v1808_v2 = vsel %vm7609_vm8, %v1803_v55, %v1807_v26  ;;  %v1845_v17 = vrot.slane %v1843_v32, 5  ;;  %v2148_v20 = vrot.slane %v7000_v53, 5  ;;  %v8342_v27 = vsel %vm2940_vm14, %v6142_v24, %v7987_v19  ;;  %v1561_v55 = vld [vmem:[#allocation2 + $0x80] sm:$0x1]  ;;  %v2012_v41 = vld [vmem:[%s7547_s20 + $0x84] sm:$0xe]  ;;  %v8353_v19 = vpop.permute.xlu0 %2642 }
 0x10c   : > { %v1840_v63 = vor.u32 %v1839_v57, %v1836_v18  ;;  %v6203_v23 = vcombine.low %v1798_v30, %v1808_v2  ;;  %v1849_v43 = vrot.slane %v1847_v1, 4  ;;  %v8346_v50 = vsel %vm2940_vm14, %v6141_v22, %v7989_v7  ;;  %v8351_v1 = vpop.permute.xlu1 %2640  ;;  %v7002_v24 = vld [vmem:[%s7547_s20 + $0x24] sm:$0xf]  ;;  %v7003_v7 = vld [vmem:[%s7547_s20 + $0x28] sm:$0xf] }
 0x10d   : > { %v6239_v56 = vcombine.low %v2340_v31, %v2343_v48  ;;  %v2151_v18 = vrot.slane %v7001_v58, 5  ;;  %v1827_v30 = vrot.slane %v1826_v4, 4  ;;  %v1829_v26 = vshll.u32 %v1561_v55, 16  ;;  %v7004_v48 = vld [vmem:[%s7547_s20 + $0x78] sm:$0xf] }
 0x10e   : > { %2742 = vrot.lane.b32.xlu1 %v6203_v23, %s7130_s28  ;;  %v1850_v57 = vor.u32 %v1849_v43, %v1845_v17  ;;  %v2150_v32 = vrot.slane %v2148_v20, 4  ;;  %v6143_v22 = vcombine.low %v7002_v24, %v7003_v7  ;;  %v1822_v31 = vsel %vm7609_vm8, %v1817_v42, %v8306_v33  ;;  %v2212_v4 = vld [vmem:[#allocation2 + $0x78] sm:$0xe]  ;;  %v7006_v33 = vld [vmem:[%s7547_s20 + $0x8c] sm:$0x1] }
 0x10f   : > { %v6150_v2 = vcombine.low %v7004_v48, %v7000_v53  ;;  %v1841_v23 = vrot.slane %v1840_v63, 4  ;;  %v1831_v58 = vrot.slane %v1829_v26, 5  ;;  %v2149_v25 = vsel %vm7878_vm13, %v6114_v15, %v2148_v20  ;;  %v2213_v20 = vld [vmem:[#allocation2 + $0x84] sm:$0xe] }
 0x110   : > { %v1562_v43 = vld [vmem:[#allocation2 + $0x8c] sm:$0x1]  ;;  %v6115_v0 = vrot.slane %v2012_v41, 9  ;;  %v2155_v40 = vrot.slane %v8364_v46, 5  ;;  %v1851_v16 = vrot.slane %v1850_v57, 4  ;;  %v2152_v7 = vsel %vm7878_vm13, %v2150_v32, %v2151_v18 }
 0x111   : > { %v1853_v24 = vshll.u32 %v1562_v43, 16  ;;  %v2158_v42 = vrot.slane %v7006_v33, 5  ;;  %v1832_v63 = vsel %vm7609_vm8, %v1827_v30, %v1831_v58  ;;  %v6132_v26 = vrot.slane %v2212_v4, 9  ;;  %v8384_v4 = vpop.permute.xlu1 %2644  ;;  %v7007_v58 = vld [vmem:[%s7547_s20 + $0x84] sm:$0xf] }
 0x112   : > { %2922 = vrot.lane.b32.xlu1 %v6239_v56, %s7132_s17  ;;  %v2157_v53 = vrot.slane %v2155_v40, 4  ;;  %v2346_v15 = vrot.slane %v8298_v59, 5  ;;  %v6204_v41 = vcombine.low %v1822_v31, %v1832_v63  ;;  %v1846_v57 = vsel %vm7609_vm8, %v1841_v23, %v1845_v17  ;;  %v8386_v59 = vpop.permute.xlu0 %2646  ;;  %v930_v23 = vld [vmem:[#allocation2 + $0x98] sm:$0x1] }
 0x113   : > { %v1855_v48 = vrot.slane %v1853_v24, 5  ;;  %v2349_v52 = vrot.slane %v1561_v55, 5  ;;  %v8378_v18 = vsel %vm2940_vm14, %v6143_v22, %v8052_v49  ;;  %v8382_v56 = vsel %vm2940_vm14, %v6150_v2, %v8157_v44  ;;  %10594 = vst [vmem:[#allocation9_spill] sm:$0xff] %v8386_v59 }
 0x114   : > { %v6222_v30 = vcombine.low %v2149_v25, %v2152_v7  ;;  %v2348_v32 = vrot.slane %v2346_v15, 4  ;;  %2744 = vrot.lane.b32.xlu0 %v6204_v41, %s7130_s28  ;;  %v2156_v49 = vsel %vm7878_vm13, %v6115_v0, %v2155_v40  ;;  %v2159_v55 = vsel %vm7878_vm13, %v2157_v53, %v2158_v42  ;;  %v10595_v7 = vld [vmem:[#allocation10_spill] sm:$0xff] }
 0x115   : > { %v1856_v17 = vsel %vm7609_vm8, %v1851_v16, %v1855_v48  ;;  %v6133_v22 = vrot.slane %v2213_v20, 9  ;;  %v2347_v25 = vsel %vm7878_vm13, %v6132_v26, %v2346_v15  ;;  %v2353_v2 = vrot.slane %v8333_v5, 5  ;;  %v937_v15 = vld [vmem:[#allocation2 + $0xa4] sm:$0x1]  ;;  %v10598_v48 = vld [vmem:[#allocation11_spill] sm:$0xff] }
 0x116   : > { %v6205_v44 = vcombine.low %v1846_v57, %v1856_v17  ;;  %v2350_v31 = vsel %vm7878_vm13, %v2348_v32, %v2349_v52  ;;  %v6151_v16 = vcombine.low %v7007_v58, %v8364_v46  ;;  %v2356_v24 = vrot.slane %v1562_v43, 5  ;;  %v8408_v52 = vld [vmem:[#allocation2 + $0x94] sm:$0xf]  ;;  %v8422_v32 = vpop.permute.xlu1 %2648  ;;  %v8424_v17 = vpop.permute.xlu0 %2650 }
 0x117   : > { %v726_v0 = vrot.slane %v10595_v7, 4  ;;  %v10596_v40 = vshrl.u32 %v7551_v8, 16  ;;  %v6223_v42 = vcombine.low %v2156_v49, %v2159_v55  ;;  %v2355_v63 = vrot.slane %v2353_v2, 4  ;;  %10599 = vst [vmem:[#allocation12_spill] sm:$0xff] %v8422_v32  ;;  %10600 = vst [vmem:[#allocation10_spill] sm:$0xff] %v8424_v17 }
 0x118   : > { %2746 = vrot.lane.b32.xlu1 %v6205_v44, %s7130_s28  ;;  %v10597_v53 = vshll.u32 %v8013_v62, 16  ;;  %v1867_v5 = vshll.u32 %v8408_v52, 16  ;;  %2834 = vrot.lane.b32.xlu0 %v6222_v30, %s7131_s30  ;;  %v6240_v46 = vcombine.low %v2347_v25, %v2350_v31  ;;  %v2354_v8 = vsel %vm7878_vm13, %v6133_v22, %v2353_v2  ;;  %v7009_v49 = vld [vmem:[%s7547_s20 + $0x90] sm:$0xf]  ;;  %v7010_v55 = vld [vmem:[%s7547_s20 + $0x94] sm:$0xf] }
 0x119   : > { %v1860_v33 = vrot.slane %v10596_v40, 4  ;;  %v931_v43 = vsel %vm7830_vm10, %v726_v0, %v930_v23  ;;  %v1871_v62 = vshrl.u32 %v8408_v52, 16  ;;  %v2357_v20 = vsel %vm7878_vm13, %v2355_v63, %v2356_v24  ;;  %v7011_v44 = vld [vmem:[%s7547_s20 + $0x9c] sm:$0xf]  ;;  %v8430_v25 = vld [vmem:[%s7547_s20 + $0xa0] sm:$0xf] }
 0x11a   : > { %v1863_v26 = vrot.slane %v10597_v53, 5  ;;  %932 = vst [vmem:[#allocation2 + $0x98] sm:$0x1] %v931_v43  ;;  %v8419_v57 = vrot.slane %v1867_v5, 5  ;;  %v743_v30 = vrot.slane %v10598_v48, 4  ;;  %v6152_v22 = vcombine.low %v7009_v49, %v7010_v55 }
 0x11b   : > { %v6153_v31 = vcombine.low %v7011_v44, %v8430_v25  ;;  %v7013_v2 = vld [vmem:[%s7547_s20 + $0xa8] sm:$0xf]  ;;  %v8435_v23 = vld [vmem:[%s7547_s20 + $0xac] sm:$0xf]  ;;  %v1873_v24 = vrot.slane %v1871_v62, 4  ;;  %v6241_v7 = vcombine.low %v2354_v8, %v2357_v20  ;;  %v10601_v40 = vshrl.u32 %v8174_v51, 16 }
 0x11c   : > { %v1864_v41 = vor.u32 %v1863_v26, %v1860_v33  ;;  %v6154_v58 = vcombine.low %v7013_v2, %v8435_v23  ;;  %2836 = vrot.lane.b32.xlu1 %v6223_v42, %s7131_s30  ;;  %v938_v0 = vsel %vm7830_vm10, %v743_v30, %v937_v15  ;;  %v10602_v63 = vshll.u32 %v8174_v51, 16  ;;  %v2013_v26 = vld [vmem:[%s7547_s20 + $0x90] sm:$0xe]  ;;  %2924 = vrot.lane.b32.xlu0 %v6240_v46, %s7132_s17  ;;  %v7015_v43 = vld [vmem:[%s7547_s20 + $0xb4] sm:$0xf] }
 0x11d   : > { %v1884_v33 = vrot.slane %v10601_v40, 4  ;;  %v8448_v5 = vsel %vm2940_vm14, %v6151_v16, %v8189_v39  ;;  %v8453_v42 = vld [vmem:[%s7547_s20 + $0xb8] sm:$0xf]  ;;  %939 = vst [vmem:[#allocation2 + $0xa4] sm:$0x1] %v938_v0  ;;  %v1874_v39 = vor.u32 %v1873_v24, %v8419_v57  ;;  %v2162_v48 = vrot.slane %v7010_v55, 5  ;;  %v8476_v24 = vpop.permute.xlu1 %2652 }
 0x11e   : > { %v1887_v53 = vrot.slane %v10602_v63, 5  ;;  %v6155_v8 = vcombine.low %v7015_v43, %v8453_v42  ;;  %v8456_v62 = vld [vmem:[#allocation2 + $0xa0] sm:$0xf]  ;;  %v1865_v20 = vrot.slane %v1864_v41, 4  ;;  %v6116_v49 = vrot.slane %v2013_v26, 9  ;;  %10603 = vst [vmem:[#allocation11_spill] sm:$0xff] %v8476_v24 }
 0x11f   : > { %v1891_v51 = vshll.u32 %v8456_v62, 16  ;;  %v1895_v15 = vshrl.u32 %v8456_v62, 16  ;;  %v7018_v44 = vld [vmem:[%s7547_s20 + $0x98] sm:$0x1]  ;;  %v2014_v40 = vld [vmem:[%s7547_s20 + $0x9c] sm:$0xe]  ;;  %v8465_v0 = vsel %vm2940_vm14, %v6152_v22, %v8191_v36  ;;  %v8469_v63 = vsel %vm2940_vm14, %v6153_v31, %v8217_v35 }
 0x120   : > { %v1888_v16 = vor.u32 %v1887_v53, %v1884_v33  ;;  %v2165_v2 = vrot.slane %v7018_v44, 5  ;;  %v8473_v41 = vsel %vm2940_vm14, %v6154_v58, %v8219_v13  ;;  %2926 = vrot.lane.b32.xlu1 %v6241_v7, %s7132_s17  ;;  %v2164_v55 = vrot.slane %v2162_v48, 4  ;;  %v8478_v33 = vpop.permute.xlu0 %2654  ;;  %v8485_v22 = vld [vmem:[%s7547_s20 + $0xc0] sm:$0xf]  ;;  %v8488_v35 = vld [vmem:[%s7547_s20 + $0xc4] sm:$0xf] }
 0x121   : > { %v1893_v46 = vrot.slane %v1891_v51, 5  ;;  %v1897_v30 = vrot.slane %v1895_v15, 4  ;;  %v1563_v53 = vld [vmem:[#allocation2 + $0x98] sm:$0x1]  ;;  %v8482_v36 = vsel %vm2940_vm14, %v6155_v8, %v8248_v60  ;;  %v2214_v7 = vld [vmem:[#allocation2 + $0x90] sm:$0xe]  ;;  %v1870_v60 = vsel %vm7609_vm8, %v1865_v20, %v8419_v57 }
 0x122   : > { %v1889_v31 = vrot.slane %v1888_v16, 4  ;;  %v1875_v26 = vrot.slane %v1874_v39, 4  ;;  %v1877_v43 = vshll.u32 %v1563_v53, 16  ;;  %v6117_v51 = vrot.slane %v2014_v40, 9  ;;  %v7021_v24 = vld [vmem:[%s7547_s20 + $0xa4] sm:$0x1] }
 0x123   : > { %v1898_v58 = vor.u32 %v1897_v30, %v1893_v46  ;;  %v2169_v15 = vrot.slane %v8430_v25, 5  ;;  %v2163_v8 = vsel %vm7878_vm13, %v6116_v49, %v2162_v48  ;;  %v2166_v44 = vsel %vm7878_vm13, %v2164_v55, %v2165_v2  ;;  %v2215_v16 = vld [vmem:[#allocation2 + $0x9c] sm:$0xe] }
 0x124   : > { %v2172_v13 = vrot.slane %v7021_v24, 5  ;;  %v1879_v30 = vrot.slane %v1877_v43, 5  ;;  %v1564_v17 = vld [vmem:[#allocation2 + $0xa4] sm:$0x1]  ;;  %v6134_v32 = vrot.slane %v2214_v7, 9  ;;  %v2360_v40 = vrot.slane %v8408_v52, 5  ;;  %v8508_v24 = vpop.permute.xlu1 %2656  ;;  %v8510_v43 = vpop.permute.xlu0 %2658 }
 0x125   : > { %v2171_v39 = vrot.slane %v2169_v15, 4  ;;  %v1894_v25 = vsel %vm7609_vm8, %v1889_v31, %v1893_v46  ;;  %v1899_v59 = vrot.slane %v1898_v58, 4  ;;  %v1901_v57 = vshll.u32 %v1564_v17, 16 }
 0x126   : > { %v2363_v20 = vrot.slane %v1563_v53, 5  ;;  %v1880_v48 = vsel %vm7609_vm8, %v1875_v26, %v1879_v30  ;;  %v6224_v49 = vcombine.low %v2163_v8, %v2166_v44  ;;  %v2170_v2 = vsel %vm7878_vm13, %v6117_v51, %v2169_v15  ;;  %v944_v53 = vld [vmem:[#allocation2 + $0xb0] sm:$0x1]  ;;  %v10604_v15 = vld [vmem:[#allocation13_spill] sm:$0xff] }
 0x127   : > { %v2362_v55 = vrot.slane %v2360_v40, 4  ;;  %v6206_v7 = vcombine.low %v1870_v60, %v1880_v48  ;;  %v1903_v52 = vrot.slane %v1901_v57, 5  ;;  %v2173_v46 = vsel %vm7878_vm13, %v2171_v39, %v2172_v13  ;;  %v7022_v57 = vld [vmem:[%s7547_s20 + $0xcc] sm:$0xf] }
 0x128   : > { %v6135_v31 = vrot.slane %v2215_v16, 9  ;;  %v2361_v58 = vsel %vm7878_vm13, %v6134_v32, %v2360_v40  ;;  %v2367_v26 = vrot.slane %v8456_v62, 5  ;;  %v2370_v51 = vrot.slane %v1564_v17, 5 }
 0x129   : > { %v760_v8 = vrot.slane %v10604_v15, 4  ;;  %2748 = vrot.lane.b32.xlu0 %v6206_v7, %s7130_s28  ;;  %v1904_v60 = vsel %vm7609_vm8, %v1899_v59, %v1903_v52  ;;  %v2364_v13 = vsel %vm7878_vm13, %v2362_v55, %v2363_v20  ;;  %v10605_v44 = vshrl.u32 %v8221_v21, 16  ;;  %v8533_v59 = vld [vmem:[%s7547_s20 + $0xd0] sm:$0xf]  ;;  %v8536_v55 = vld [vmem:[#allocation2 + $0xac] sm:$0xf] }
 0x12a   : > { %v10606_v30 = vshll.u32 %v8221_v21, 16  ;;  %v6207_v32 = vcombine.low %v1894_v25, %v1904_v60  ;;  %v2368_v17 = vsel %vm7878_vm13, %v6135_v31, %v2367_v26  ;;  %v2369_v62 = vrot.slane %v2367_v26, 4  ;;  %v951_v7 = vld [vmem:[#allocation2 + $0xbc] sm:$0x1]  ;;  %v2015_v60 = vld [vmem:[%s7547_s20 + $0xa8] sm:$0xe] }
 0x12b   : > { %v1908_v16 = vrot.slane %v10605_v44, 4  ;;  %v945_v40 = vsel %vm7830_vm10, %v760_v8, %v944_v53  ;;  %v6157_v20 = vcombine.low %v7022_v57, %v8533_v59  ;;  %v1915_v21 = vshll.u32 %v8536_v55, 16  ;;  %v10607_v53 = vld [vmem:[#allocation14_spill] sm:$0xff]  ;;  %v8547_v44 = vpop.permute.xlu1 %2660 }
 0x12c   : > { %v1911_v39 = vrot.slane %v10606_v30, 5  ;;  %946 = vst [vmem:[#allocation2 + $0xb0] sm:$0x1] %v945_v40  ;;  %v1919_v25 = vshrl.u32 %v8536_v55, 16  ;;  %2750 = vrot.lane.b32.xlu1 %v6207_v32, %s7130_s28  ;;  %v6225_v52 = vcombine.low %v2170_v2, %v2173_v46  ;;  %v2371_v31 = vsel %vm7878_vm13, %v2369_v62, %v2370_v51  ;;  %v8556_v62 = vld [vmem:[#allocation2 + $0xb8] sm:$0xf] }
 0x12d   : > { %v777_v26 = vrot.slane %v10607_v53, 4  ;;  %v10608_v15 = vshrl.u32 %v8267_v38, 16  ;;  %2838 = vrot.lane.b32.xlu0 %v6224_v49, %s7131_s30  ;;  %v6242_v30 = vcombine.low %v2361_v58, %v2364_v13  ;;  %v1917_v40 = vrot.slane %v1915_v21, 5 }
 0x12e   : > { %v1912_v48 = vor.u32 %v1911_v39, %v1908_v16  ;;  %v8549_v16 = vpop.permute.xlu0 %2662  ;;  %v6243_v39 = vcombine.low %v2368_v17, %v2371_v31  ;;  %v1921_v2 = vrot.slane %v1919_v25, 4  ;;  %v10609_v51 = vshll.u32 %v8267_v38, 16  ;;  %v7026_v25 = vld [vmem:[%s7547_s20 + $0xb0] sm:$0x1]  ;;  %v2016_v31 = vld [vmem:[%s7547_s20 + $0xb4] sm:$0xe] }
 0x12f   : > { %v1932_v8 = vrot.slane %v10608_v15, 4  ;;  %v952_v46 = vsel %vm7830_vm10, %v777_v26, %v951_v7  ;;  %v1939_v57 = vshll.u32 %v8556_v62, 16  ;;  %v1943_v53 = vshrl.u32 %v8556_v62, 16 }
 0x130   : > { %v1935_v32 = vrot.slane %v10609_v51, 5  ;;  %v1913_v15 = vrot.slane %v1912_v48, 4  ;;  %v1922_v49 = vor.u32 %v1921_v2, %v1917_v40  ;;  %953 = vst [vmem:[#allocation2 + $0xbc] sm:$0x1] %v952_v46  ;;  %v6118_v58 = vrot.slane %v2015_v60, 9  ;;  %2840 = vrot.lane.b32.xlu1 %v6225_v52, %s7131_s30  ;;  %v8581_v51 = vpop.permute.xlu1 %2664 }
 0x131   : > { %v2176_v13 = vrot.slane %v8435_v23, 5  ;;  %v8562_v21 = vrot.slane %v1939_v57, 5  ;;  %v1945_v38 = vrot.slane %v1943_v53, 4  ;;  %v2179_v7 = vrot.slane %v7026_v25, 5  ;;  %2928 = vrot.lane.b32.xlu0 %v6242_v30, %s7132_s17  ;;  %v2216_v57 = vld [vmem:[#allocation2 + $0xa8] sm:$0xe] }
 0x132   : > { %v1936_v17 = vor.u32 %v1935_v32, %v1932_v8  ;;  %v10610_v26 = vcombine.low %v8485_v22, %v8488_v35  ;;  %v8575_v60 = vsel %vm2940_vm14, %v6157_v20, %v8284_v47  ;;  %vm2995_vm15 = vcmask 179200  }
 0x133   : > { %v2178_v23 = vrot.slane %v2176_v13, 4  ;;  %v1565_v52 = vld [vmem:[#allocation2 + $0xb0] sm:$0x1]  ;;  %v1923_v8 = vrot.slane %v1922_v49, 4  ;;  %v1946_v46 = vor.u32 %v1945_v38, %v8562_v21  ;;  %v2177_v22 = vsel %vm7878_vm13, %v6118_v58, %v2176_v13  ;;  %v7027_v13 = vld [vmem:[%s7547_s20 + $0xbc] sm:$0x1] }
 0x134   : > { %v8571_v48 = vsel %vm2940_vm14, %v10610_v26, %v8250_v11  ;;  %v1937_v2 = vrot.slane %v1936_v17, 4  ;;  %v8583_v11 = vpop.permute.xlu0 %2666  ;;  %v1925_v32 = vshll.u32 %v1565_v52, 16  ;;  %v6119_v20 = vrot.slane %v2016_v31, 9  ;;  %2930 = vrot.lane.b32.xlu1 %v6243_v39, %s7132_s17  ;;  %v2217_v38 = vld [vmem:[#allocation2 + $0xb4] sm:$0xe] }
 0x135   : > { %v2180_v47 = vsel %vm7878_vm13, %v2178_v23, %v2179_v7  ;;  %v2183_v30 = vrot.slane %v8453_v42, 5  ;;  %v8591_v53 = vsel %vm2995_vm15, %v8310_v3, %v8286_v28  ;;  %v8596_v49 = vsel %vm2995_vm15, %v8346_v50, %v8319_v37 }
 0x136   : > { %v1918_v58 = vsel %vm7609_vm8, %v1913_v15, %v1917_v40  ;;  %v2186_v17 = vrot.slane %v7027_v13, 5  ;;  %v1927_v42 = vrot.slane %v1925_v32, 5  ;;  %v1942_v25 = vsel %vm7609_vm8, %v1937_v2, %v8562_v21  ;;  %v958_v13 = vld [vmem:[#allocation2 + $0xc8] sm:$0x1] }
 0x137   : > { %v2185_v3 = vrot.slane %v2183_v30, 4  ;;  %v2374_v28 = vrot.slane %v8536_v55, 5  ;;  %v1566_v7 = vld [vmem:[#allocation2 + $0xbc] sm:$0x1]  ;;  %v1947_v31 = vrot.slane %v1946_v46, 4  ;;  %v6226_v37 = vcombine.low %v2177_v22, %v2180_v47  ;;  %v8613_v46 = vpop.permute.xlu1 %2668 }
 0x138   : > { %v6136_v50 = vrot.slane %v2216_v57, 9  ;;  %v2377_v26 = vrot.slane %v1565_v52, 5  ;;  %v1928_v39 = vsel %vm7609_vm8, %v1923_v8, %v1927_v42  ;;  %v1949_v40 = vshll.u32 %v1566_v7, 16  ;;  %v8615_v52 = vpop.permute.xlu0 %2724  ;;  %v10611_v47 = vld [vmem:[#allocation15_spill] sm:$0xff] }
 0x139   : > { %v2184_v15 = vsel %vm7878_vm13, %v6119_v20, %v2183_v30  ;;  %v6137_v23 = vrot.slane %v2217_v38, 9  ;;  %v6208_v32 = vcombine.low %v1918_v58, %v1928_v39  ;;  %v2187_v21 = vsel %vm7878_vm13, %v2185_v3, %v2186_v17 }
 0x13a   : > { %v2376_v2 = vrot.slane %v2374_v28, 4  ;;  %v2381_v55 = vrot.slane %v8556_v62, 5  ;;  %v1951_v22 = vrot.slane %v1949_v40, 5  ;;  %v2384_v8 = vrot.slane %v1566_v7, 5  ;;  %v8631_v40 = vld [vmem:[#allocation2 + $0xc4] sm:$0xf] }
 0x13b   : > { %v794_v57 = vrot.slane %v10611_v47, 4  ;;  %v10612_v20 = vshrl.u32 %v8277_v61, 16  ;;  %2752 = vrot.lane.b32.xlu0 %v6208_v32, %s7130_s28  ;;  %v2375_v58 = vsel %vm7878_vm13, %v6136_v50, %v2374_v28  ;;  %v10613_v38 = vshll.u32 %v8277_v61, 16  ;;  %v2017_v47 = vld [vmem:[%s7547_s20 + $0xc0] sm:$0xe] }
 0x13c   : > { %v2378_v62 = vsel %vm7878_vm13, %v2376_v2, %v2377_v26  ;;  %v2383_v17 = vrot.slane %v2381_v55, 4  ;;  %v1952_v3 = vsel %vm7609_vm8, %v1947_v31, %v1951_v22  ;;  %v6227_v7 = vcombine.low %v2184_v15, %v2187_v21  ;;  %v8650_v22 = vld [vmem:[#allocation2 + $0xd4] sm:$0x1] }
 0x13d   : > { %v1956_v30 = vrot.slane %v10612_v20, 4  ;;  %v1959_v42 = vrot.slane %v10613_v38, 5  ;;  %v959_v39 = vsel %vm7830_vm10, %v794_v57, %v958_v13  ;;  %v1963_v32 = vshll.u32 %v8631_v40, 16  ;;  %v8652_v57 = vpop.permute.xlu1 %2726  ;;  %v7029_v20 = vld [vmem:[%s7547_s20 + $0xc8] sm:$0x1] }
 0x13e   : > { %v6209_v28 = vcombine.low %v1942_v25, %v1952_v3  ;;  %v2382_v50 = vsel %vm7878_vm13, %v6137_v23, %v2381_v55  ;;  %960 = vst [vmem:[#allocation2 + $0xc8] sm:$0x1] %v959_v39  ;;  %v1967_v26 = vshrl.u32 %v8631_v40, 16  ;;  %v6244_v2 = vcombine.low %v2375_v58, %v2378_v62 }
 0x13f   : > { %v1960_v61 = vor.u32 %v1959_v42, %v1956_v30  ;;  %v2385_v31 = vsel %vm7878_vm13, %v2383_v17, %v2384_v8  ;;  %v8640_v15 = vrot.slane %v1963_v32, 5  ;;  %v8645_v21 = vsel %vm2995_vm15, %v8382_v56, %v8478_v33  ;;  %2842 = vrot.lane.b32.xlu0 %v6226_v37, %s7131_s30  ;;  %v8654_v8 = vpop.permute.xlu0 %2728  ;;  %v2218_v42 = vld [vmem:[#allocation2 + $0xc0] sm:$0xe]  ;;  %v2018_v32 = vld [vmem:[%s7547_s20 + $0xcc] sm:$0xe] }
 0x140   : > { %2754 = vrot.lane.b32.xlu1 %v6209_v28, %s7130_s28  ;;  %v1969_v23 = vrot.slane %v1967_v26, 4  ;;  %v6120_v55 = vrot.slane %v2017_v47, 9  ;;  %v2190_v13 = vrot.slane %v8488_v35, 5  ;;  %v2193_v30 = vrot.slane %v7029_v20, 5  ;;  %v2219_v20 = vld [vmem:[#allocation2 + $0xcc] sm:$0xe] }
 0x141   : > { %v1961_v25 = vrot.slane %v1960_v61, 4  ;;  %v1984_v56 = vor.u32 %v8205_v45, %v8202_v29  ;;  %v1987_v33 = vshll.u32 %v8207_v6, 16  ;;  %v10614_v37 = vshrl.u32 %v8207_v6, 16  ;;  %v8684_v26 = vpop.permute.xlu1 %2730 }
 0x142   : > { %v6245_v62 = vcombine.low %v2382_v50, %v2385_v31  ;;  %v1970_v35 = vor.u32 %v1969_v23, %v8640_v15  ;;  %v2191_v17 = vsel %vm7878_vm13, %v6120_v55, %v2190_v13  ;;  %v2192_v38 = vrot.slane %v2190_v13, 4 }
 0x143   : > { %v1993_v58 = vrot.slane %v10614_v37, 4  ;;  %v1966_v3 = vsel %vm7609_vm8, %v1961_v25, %v8640_v15  ;;  %v1989_v39 = vrot.slane %v1987_v33, 5  ;;  %v1997_v29 = vshll.u32 %v8650_v22, 16  ;;  %2932 = vrot.lane.b32.xlu0 %v6244_v2, %s7132_s17  ;;  %v7030_v33 = vld [vmem:[%s7547_s20 + $0xd4] sm:$0x1] }
 0x144   : > { %v8672_v45 = vsel %vm2995_vm15, %v8448_v5, %v8508_v24  ;;  %2844 = vrot.lane.b32.xlu1 %v6227_v7, %s7131_s30  ;;  %v1971_v47 = vrot.slane %v1970_v35, 4  ;;  %v2194_v28 = vsel %vm7878_vm13, %v2192_v38, %v2193_v30  ;;  %v1985_v50 = vrot.slane %v1984_v56, 4  ;;  %v2815_v5 = vpop.permute.xlu0 %2814 }
 0x145   : > { %v8682_v61 = vsel %vm2995_vm15, %v8465_v0, %v8510_v43  ;;  %v1567_v24 = vld [vmem:[#allocation2 + $0xc8] sm:$0x1]  ;;  %v6228_v31 = vcombine.low %v2191_v17, %v2194_v28  ;;  %v1994_v15 = vor.u32 %v1993_v58, %v1989_v39  ;;  %v1999_v7 = vrot.slane %v1997_v29, 5 }
 0x146   : > { %v6138_v25 = vrot.slane %v2218_v42, 9  ;;  %v1973_v2 = vshll.u32 %v1567_v24, 16  ;;  %v2388_v23 = vrot.slane %v8631_v40, 5  ;;  %v2391_v55 = vrot.slane %v1567_v24, 5 }
 0x147   : > { %v6121_v13 = vrot.slane %v2018_v32, 9  ;;  %v1995_v30 = vrot.slane %v1994_v15, 4  ;;  %v2197_v56 = vrot.slane %v8533_v59, 5  ;;  %v2200_v0 = vrot.slane %v7030_v33, 5  ;;  %v2817_v59 = vpop.permute.xlu1 %2816 }
 0x148   : > { %v8692_v43 = vsel %vm2995_vm15, %v8469_v63, %v8547_v44  ;;  %2934 = vrot.lane.b32.xlu1 %v6245_v62, %s7132_s17  ;;  %v1975_v37 = vrot.slane %v1973_v2, 5  ;;  %v1990_v58 = vsel %vm7609_vm8, %v1985_v50, %v1989_v39  ;;  %v2390_v40 = vrot.slane %v2388_v23, 4  ;;  %v2905_v17 = vpop.permute.xlu0 %2904 }
 0x149   : > { %v8700_v35 = vsel %vm2995_vm15, %v8473_v41, %v8549_v16  ;;  %v2000_v38 = vsel %vm7609_vm8, %v1995_v30, %v1999_v7  ;;  %v2389_v63 = vsel %vm7878_vm13, %v6138_v25, %v2388_v23  ;;  %v2199_v44 = vrot.slane %v2197_v56, 4 }
 0x14a   : > { %v6139_v62 = vrot.slane %v2219_v20, 9  ;;  %v1976_v42 = vsel %vm7609_vm8, %v1971_v47, %v1975_v37  ;;  %v2392_v39 = vsel %vm7878_vm13, %v2390_v40, %v2391_v55  ;;  %v2198_v41 = vsel %vm7878_vm13, %v6121_v13, %v2197_v56  ;;  %v6830_v55 = vld [vmem:[%s10506_s3 + $0x48] sm:$0xff]   ;;  %v7031_v13 = vld [vmem:[%s7547_s20 + $0x30] sm:$0xf]  ;;  %v7032_v20 = vld [vmem:[%s7547_s20 + $0x34] sm:$0xf] }
 0x14b   : > { %v2395_v16 = vrot.slane %v8207_v6, 5  ;;  %v6210_v29 = vcombine.low %v1966_v3, %v1976_v42  ;;  %v6211_v32 = vcombine.low %v1990_v58, %v2000_v38  ;;  %v2201_v28 = vsel %vm7878_vm13, %v2199_v44, %v2200_v0  ;;  %v6827_v6 = vld [vmem:[%s10506_s3 + $0x20] ss:$0 sps:$4 sm:$0x11]   ;;  %v2907_v3 = vpop.permute.xlu1 %2906  ;;  %v6831_v37 = vld [vmem:[%s10506_s3 + $0x50] sm:$0xff]   ;;  %v7033_v40 = vld [vmem:[%s10506_s3 + $0x24] sm:$0xff]  }
 0x14c   : > { %v2398_v50 = vrot.slane %v8650_v22, 5  ;;  %2846 = vrot.lane.b32.xlu1 %v6228_v31, %s7131_s30  ;;  %v6246_v24 = vcombine.low %v2389_v63, %v2392_v39  ;;  %v8722_v15 = vsel %vm2995_vm15, %v8482_v36, %v8581_v51  ;;  %v2819_v7 = vpop.permute.xlu0 %2818  ;;  %v8731_v22 = vsel %vm2995_vm15, %v8571_v48, %v8583_v11  ;;  %v8741_v36 = vld [vmem:[%s10506_s3 + $0x44] ss:$0 sps:$4 sm:$0x11]   ;;  %v6832_v63 = vld [vmem:[%s10506_s3 + $0x58] sm:$0xff]   ;;  %v7036_v39 = vld [vmem:[%s10506_s3 + $0x2c] sm:$0xff]  }
 0x14d   : > { %v2396_v34 = vsel %vm7878_vm13, %v6139_v62, %v2395_v16  ;;  %v2397_v47 = vrot.slane %v2395_v16, 4  ;;  %2756 = vrot.lane.b32.xlu0 %v6210_v29, %s7130_s28  ;;  %v8736_v31 = vsel %vm2995_vm15, %v8575_v60, %v8613_v46  ;;  %vm3032_vm1 = vcmask 228352   ;;  %v7034_v44 = vld [vmem:[%s7547_s20 + $0x3c] sm:$0xf]  ;;  %v7035_v62 = vld [vmem:[%s7547_s20 + $0x40] sm:$0xf] }
 0x14e   : > { %vm3069_vm2 = vcmask 359424   ;;  %v3001_v51 = vsel %vm2995_vm15, %v8342_v27, %v8321_v12  ;;  %v6229_v25 = vcombine.low %v2198_v41, %v2201_v28  ;;  %v3034_v60 = vsel %vm3032_vm1, %v8591_v53, %v8615_v52  ;;  %v8826_v29 = vld [vmem:[%s10506_s3 + $0x60] sm:$0xff]   ;;  %v962_v28 = vld [vmem:[%s8832_s14 + $0x8] sm:$0xff] }
 0x14f   : > { %v2399_v48 = vsel %vm7878_vm13, %v2397_v47, %v2398_v50  ;;  %v3036_v46 = vsel %vm3032_vm1, %v8596_v49, %v8652_v57  ;;  %v3038_v2 = vsel %vm3032_vm1, %v3001_v51, %v8654_v8  ;;  %v3071_v23 = vsel %vm3069_vm2, %v3034_v60, %v2815_v5  ;;  %v2909_v14 = vpop.permute.xlu1 %2908  ;;  %v963_v50 = vld [vmem:[%s8832_s14 + $0x10] sm:$0xff]  ;;  %v965_v47 = vld [vmem:[%s8832_s14 + $0x20] sm:$0xff] }
 0x150   : > { %v6247_v11 = vcombine.low %v2396_v34, %v2399_v48  ;;  %2936 = vrot.lane.b32.xlu1 %v6246_v24, %s7132_s17  ;;  %v3073_v12 = vsel %vm3069_vm2, %v3036_v46, %v2817_v59  ;;  %vm3219_vm3 = vcmask 1040384   ;;  %vm3106_vm6 = vcmask 408576   ;;  %v2821_v27 = vpop.permute.xlu0 %2820  ;;  %v964_v34 = vld [vmem:[%s8832_s14 + $0x18] sm:$0xff]  ;;  %v969_v48 = vld [vmem:[%s8832_s14 + $0x40] sm:$0xff]  ;;  %v970_v46 = vld [vmem:[%s8832_s14 + $0x48] sm:$0xff] }
 0x151   : > { %vm3186_vm7 = vcmask 539648   ;;  %2758 = vrot.lane.b32.xlu0 %v6211_v32, %s7130_s28  ;;  %6730 = vmatprep.subr.msk.bf16.mxu1 %vm3219_vm3, %v6827_v6  ;;  %v3108_v53 = vsel %vm3106_vm6, %v3071_v23, %v2905_v17  ;;  %v3221_v49 = vsel %vm3219_vm3, %v6827_v6, 0  ;;  %v3110_v52 = vsel %vm3106_vm6, %v3073_v12, %v2907_v3  ;;  %v961_v32 = vld [vmem:[%s8832_s14] sm:$0xff]  ;;  %v966_v6 = vld [vmem:[%s8832_s14 + $0x28] sm:$0xff]  ;;  %v7037_v51 = vld [vmem:[%s10506_s3 + $0x34] sm:$0xff]   ;;  %s7135_s28 = smov 112  }
 0x152   : > { %v8766_v57 = vsel %vm3219_vm3, %v8741_v36, 0  ;;  %v3003_v8 = vsel %vm2995_vm15, %v8378_v18, %v8351_v1  ;;  %6508 = vmatprep.mubr.msk.bf16.mxu1 %vm3186_vm7, %v3108_v53  ;;  %6507 = vmatpush3.bf16.msra.mxu1 %v3221_v49  ;;  %v3075_v5 = vsel %vm3069_vm2, %v3038_v2, %v2819_v7  ;;  %v6144_v30 = vcombine.low %v7031_v13, %v7032_v20  ;;  %v6834_v7 = vld [vmem:[%s10506_s3 + $0x68] ss:$0 sps:$4 sm:$0x11]   ;;  %v971_v2 = vld [vmem:[%s8832_s14 + $0x50] sm:$0xff]  ;;  %v972_v23 = vld [vmem:[%s8832_s14 + $0x58] sm:$0xff] }
 0x153   : > { %v3040_v56 = vsel %vm3032_vm1, %v3003_v8, %v8684_v26  ;;  %6731 = vmatprep.subr.msk.bf16.mxu0 %vm3219_vm3, %v8741_v36  ;;  %6550 = vmatprep.mubr.msk.bf16.mxu0 %vm3186_vm7, %v3110_v52  ;;  %v8784_v1 = vsel %vm3106_vm6, %v3075_v5, %v2909_v14  ;;  %v2733_v26 = vpop.permute.xlu1 %2732  ;;  %v6145_v42 = vcombine.low %v7034_v44, %v7035_v62  ;;  %vm993_vm8 = vcmask 130048   ;;  %v973_v14 = vld [vmem:[%s8832_s14 + $0x60] sm:$0xff]  ;;  %v975_v53 = vld [vmem:[%s8832_s14 + $0x70] sm:$0xff]  ;;  %v7038_v49 = vld [vmem:[%s7547_s20 + $0x48] sm:$0xf] }
 0x154   : > { %2938 = vrot.lane.b32.xlu1 %v6247_v11, %s7132_s17  ;;  %6549 = vmatpush3.bf16.msra.mxu0 %v8766_v57  ;;  %v3077_v18 = vsel %vm3069_vm2, %v3040_v56, %v2821_v27  ;;  %v2911_v33 = vpop.permute.xlu0 %2910  ;;  %v2955_v58 = vsel %vm2940_vm14, %v6144_v30, %v8054_v10  ;;  %994 = vst.msk [vmem:[#allocation3] sm:$0xff] %vm993_vm8, %v961_v32  ;;  %995 = vst.msk [vmem:[#allocation3 + $0x8] sm:$0xff] %vm993_vm8, %v962_v28  ;;  %v974_v27 = vld [vmem:[%s8832_s14 + $0x68] sm:$0xff]  ;;  %v977_v13 = vld [vmem:[%s8832_s14 + $0x80] sm:$0xff]  ;;  %vm5871_vm11 = vcmask 261120   ;;  %s297_s17 = sand.u32 1, %s7109_s22  }
 0x155   : > { %2848 = vrot.lane.b32.xlu0 %v6229_v25, %s7131_s30  ;;  %6509 = vmatmul.mubr.msk.bf16.vlgmr.msra.gmra.mrb[0].mxu1 %vm3186_vm7, %v3110_v52  ;;  %v8792_v0 = vsel %vm3106_vm6, %v3077_v18, %v2911_v33  ;;  %v3005_v59 = vsel %vm2995_vm15, %v2955_v58, %v8353_v19  ;;  %v2958_v24 = vsel %vm2940_vm14, %v6145_v42, %v8093_v54  ;;  %v968_v25 = vld [vmem:[%s8832_s14 + $0x38] sm:$0xff]  ;;  %v7039_v52 = vld [vmem:[%s7547_s20 + $0x4c] sm:$0xf]  ;;  %v979_v56 = vld [vmem:[%s8832_s14 + $0x90] sm:$0xff]  ;;  %s10017_s30 = scalar_lea.vmem %s10509_s6, %s7309_s12  ;;  %s6064_s12 = sshll.u32 %s297_s17, 7 }
 0x156   : > { %6512 = vmatprep.mubr.msk.bf16.mxu1 %vm3186_vm7, %v8784_v1  ;;  %6582 = vmatprep.subr.bf16.mxu0 %v6830_v55  ;;  %v3042_v38 = vsel %vm3032_vm1, %v3005_v59, %v2733_v26  ;;  %996 = vst.msk [vmem:[#allocation3 + $0x10] sm:$0xff] %vm993_vm8, %v963_v50  ;;  %v3007_v3 = vsel %vm2995_vm15, %v2958_v24, %v8384_v4  ;;  %997 = vst.msk [vmem:[#allocation3 + $0x18] sm:$0xff] %vm993_vm8, %v964_v34  ;;  %v967_v4 = vld [vmem:[%s8832_s14 + $0x30] sm:$0xff]  ;;  %v978_v20 = vld [vmem:[%s8832_s14 + $0x88] sm:$0xff]  ;;  %s10052_s16 = scalar_lea.vmem [#allocation4], %s6064_s12  ;;  %s10441_s24 = scalar_lea.sflag [#allocation5], %s297_s17 }
 0x157   : > { %6551 = vmatmul.mubr.msk.bf16.vlgmr.msra.gmra.mrb[0].mxu0 %vm3186_vm7, %v8784_v1  ;;  %6624 = vmatprep.subr.bf16.mxu1 %v7033_v40  ;;  %v2823_v10 = vpop.permute.xlu1 %2822  ;;  %998 = vst.msk [vmem:[#allocation3 + $0x20] sm:$0xff] %vm993_vm8, %v965_v47  ;;  %999 = vst.msk [vmem:[#allocation3 + $0x28] sm:$0xff] %vm993_vm8, %v966_v6  ;;  %v6146_v8 = vcombine.low %v7038_v49, %v7039_v52  ;;  %v7040_v30 = vld [vmem:[%s10506_s3 + $0x3c] sm:$0xff]   ;;  %v10615_v59 = vld [vmem:[#allocation17_spill] sm:$0xff]  ;;  %s5925_s19 = sshll.u32 %s10052_s16, 4  ;;  %s10433_s19 = int_to_ptr.vmem [resolvable:$true] %s5925_s19 }
 0x158   : > { %6554 = vmatprep.mubr.msk.bf16.mxu0 %vm3186_vm7, %v8792_v0  ;;  %v2913_v17 = vpop.permute.xlu0 %2912  ;;  %6583 = vmatpush3.bf16.msra.mxu0 %v6830_v55  ;;  %v3079_v19 = vsel %vm3069_vm2, %v3042_v38, %v2823_v10  ;;  %1000 = vst.msk [vmem:[#allocation3 + $0x30] sm:$0xff] %vm993_vm8, %v967_v4  ;;  %1001 = vst.msk [vmem:[#allocation3 + $0x38] sm:$0xff] %vm993_vm8, %v968_v25  ;;  %v976_v55 = vld [vmem:[%s8832_s14 + $0x78] sm:$0xff]  ;;  %v10616_v38 = vld [vmem:[#allocation9_spill] sm:$0xff] }
 0x159   : > { %6584 = vmatprep.subr.bf16.mxu0 %v6831_v37  ;;  %6629 = vmatpush3.bf16.msra.mxu1 %v7033_v40  ;;  %v8821_v41 = vsel %vm3106_vm6, %v3079_v19, %v2913_v17  ;;  %1002 = vst.msk [vmem:[#allocation3 + $0x40] sm:$0xff] %vm993_vm8, %v969_v48  ;;  %1003 = vst.msk [vmem:[#allocation3 + $0x48] sm:$0xff] %vm993_vm8, %v970_v46  ;;  %v980_v18 = vld [vmem:[%s8832_s14 + $0x98] sm:$0xff]  ;;  %v2961_v17 = vsel %vm2940_vm14, %v6146_v8, %v10615_v59  ;;  %v10618_v47 = vld [vmem:[#allocation12_spill] sm:$0xff] }
 0x15a   : > { %6625 = vmatprep.subr.bf16.mxu1 %v7036_v39  ;;  %1004 = vst.msk [vmem:[#allocation3 + $0x50] sm:$0xff] %vm993_vm8, %v971_v2  ;;  %1005 = vst.msk [vmem:[#allocation3 + $0x58] sm:$0xff] %vm993_vm8, %v972_v23  ;;  %v3009_v10 = vsel %vm2995_vm15, %v2961_v17, %v10616_v38  ;;  %v7043_v25 = vld [vmem:[%s7547_s20 + $0x60] sm:$0xf]  ;;  %v7044_v48 = vld [vmem:[%s7547_s20 + $0x64] sm:$0xf] }
 0x15b   : > { %1006 = vst.msk [vmem:[#allocation3 + $0x60] sm:$0xff] %vm993_vm8, %v973_v14  ;;  %1007 = vst.msk [vmem:[#allocation3 + $0x68] sm:$0xff] %vm993_vm8, %v974_v27  ;;  %v4081_v58 = vld [vmem:[#allocation3] sm:$0xff]  ;;  %v4082_v40 = vld [vmem:[#allocation3 + $0x8] sm:$0xff] }
 0x15c   : > { %v2825_v16 = vpop.permute.xlu0 %2824  ;;  %6585 = vmatpush3.bf16.msra.mxu0 %v6831_v37  ;;  %v2735_v54 = vpop.permute.xlu1 %2734  ;;  %1008 = vst.msk [vmem:[#allocation3 + $0x70] sm:$0xff] %vm993_vm8, %v975_v53  ;;  %1009 = vst.msk [vmem:[#allocation3 + $0x78] sm:$0xff] %vm993_vm8, %v976_v55  ;;  %v3691_v37 = vsel %vm3219_vm3, %v6834_v7, 0  ;;  %4145 = vrot.lane.b32.xlu0 %v4081_v58, %s7133_s27  ;;  %v10620_v53 = vld [vmem:[#allocation10_spill] sm:$0xff]  ;;  %v10622_v17 = vld [vmem:[#allocation11_spill] sm:$0xff] }
 0x15d   : > { %6513 = vmatmul.mubr.msk.bf16.gmra.mrb[4].mxu1 %vm3186_vm7, %v8792_v0  ;;  %6586 = vmatprep.subr.bf16.mxu0 %v6832_v63  ;;  %v3044_v60 = vsel %vm3032_vm1, %v3007_v3, %v2735_v54  ;;  %1010 = vst.msk [vmem:[#allocation3 + $0x80] sm:$0xff] %vm993_vm8, %v977_v13  ;;  %1011 = vst.msk [vmem:[#allocation3 + $0x88] sm:$0xff] %vm993_vm8, %v978_v20  ;;  %v4084_v19 = vld [vmem:[#allocation3 + $0x18] sm:$0xff] }
 0x15e   : > { %6516 = vmatprep.mubr.msk.bf16.mxu1 %vm3186_vm7, %v8821_v41  ;;  %6630 = vmatpush3.bf16.msra.mxu1 %v7036_v39  ;;  %v3081_v12 = vsel %vm3069_vm2, %v3044_v60, %v2825_v16  ;;  %1012 = vst.msk [vmem:[#allocation3 + $0x90] sm:$0xff] %vm993_vm8, %v979_v56  ;;  %1013 = vst.msk [vmem:[#allocation3 + $0x98] sm:$0xff] %vm993_vm8, %v980_v18  ;;  %v4085_v28 = vld [vmem:[#allocation3 + $0x20] sm:$0xff]  ;;  %v4086_v50 = vld [vmem:[#allocation3 + $0x28] sm:$0xff]  ;;  %v6148_v60 = vcombine.low %v7043_v25, %v7044_v48 }
 0x15f   : > { %6555 = vmatmul.mubr.msk.bf16.gmra.mrb[4].mxu0 %vm3186_vm7, %v8821_v41  ;;  %6626 = vmatprep.subr.bf16.mxu1 %v7037_v51  ;;  %v4087_v34 = vld [vmem:[#allocation3 + $0x30] sm:$0xff]  ;;  %v4088_v4 = vld [vmem:[#allocation3 + $0x38] sm:$0xff] }
 0x160   : > { %v2915_v11 = vpop.permute.xlu0 %2914  ;;  %6587 = vmatpush3.bf16.msra.mxu0 %v6832_v63  ;;  %4147 = vrot.lane.b32.xlu1 %v4082_v40, %s7133_s27  ;;  %v4083_v63 = vld [vmem:[#allocation3 + $0x10] sm:$0xff]  ;;  %v4089_v46 = vld [vmem:[#allocation3 + $0x40] sm:$0xff]  ;;  %v4090_v23 = vld [vmem:[#allocation3 + $0x48] sm:$0xff] }
 0x161   : > { %6588 = vmatprep.subr.bf16.mxu0 %v8826_v29  ;;  %v8883_v5 = vsel %vm3106_vm6, %v3081_v12, %v2915_v11  ;;  %4149 = vrot.lane.b32.xlu0 %v4083_v63, %s7133_s27  ;;  %v10619_v12 = vld [vmem:[#allocation19_spill] sm:$0xff]  ;;  %v4091_v27 = vld [vmem:[#allocation3 + $0x50] sm:$0xff]  ;;  %v4092_v20 = vld [vmem:[#allocation3 + $0x58] sm:$0xff] }
 0x162   : > { %6631 = vmatpush3.bf16.msra.mxu1 %v7037_v51  ;;  %6558 = vmatprep.mubr.msk.bf16.mxu0 %vm3186_vm7, %v8883_v5  ;;  %v2737_v33 = vpop.permute.xlu1 %2736  ;;  %v2967_v14 = vsel %vm2940_vm14, %v6148_v60, %v10619_v12  ;;  %v4093_v56 = vld [vmem:[#allocation3 + $0x60] sm:$0xff]  ;;  %v7045_v18 = vld [vmem:[%s7547_s20 + $0x6c] sm:$0xf]  ;;  %v10621_v40 = vld [vmem:[#allocation20_spill] sm:$0xff] }
 0x163   : > { %6627 = vmatprep.subr.bf16.mxu1 %v7040_v30  ;;  %v3046_v44 = vsel %vm3032_vm1, %v3009_v10, %v2737_v33  ;;  %v3013_v49 = vsel %vm2995_vm15, %v2967_v14, %v10620_v53  ;;  %v7046_v33 = vld [vmem:[%s7547_s20 + $0x70] sm:$0xf]  ;;  %v4095_v58 = vld [vmem:[#allocation3 + $0x70] sm:$0xff]  ;;  %v984_v12 = vld [vmem:[%s8832_s14 + $0xb8] sm:$0xff] }
 0x164   : > { %v2917_v26 = vpop.permute.xlu0 %2916  ;;  %6589 = vmatpush3.bf16.msra.mxu0 %v8826_v29  ;;  %v7041_v29 = vld [vmem:[%s7547_s20 + $0x54] sm:$0xf]  ;;  %4151 = vrot.lane.b32.xlu1 %v4084_v19, %s7133_s27  ;;  %1017 = vst.msk [vmem:[#allocation3 + $0xb8] sm:$0xff] %vm993_vm8, %v984_v12  ;;  %v985_v53 = vld [vmem:[%s8832_s14 + $0xc0] sm:$0xff] }
 0x165   : > { %6517 = vmatmul.mubr.msk.bf16.gmra.mrb[8].mxu1 %vm3186_vm7, %v8883_v5  ;;  %6733 = vmatprep.subr.msk.bf16.mxu0 %vm3219_vm3, %v6834_v7  ;;  %v4096_v63 = vld [vmem:[#allocation3 + $0x78] sm:$0xff]  ;;  %1018 = vst.msk [vmem:[#allocation3 + $0xc0] sm:$0xff] %vm993_vm8, %v985_v53 }
 0x166   : > { %6632 = vmatpush3.bf16.msra.mxu1 %v7040_v30  ;;  %v2827_v62 = vpop.permute.xlu1 %2826  ;;  %4153 = vrot.lane.b32.xlu0 %v4085_v28, %s7133_s27 }
 0x167   : > { %6732 = vmatprep.subr.msk.bf16.mxu1 %vm3219_vm3, %v8741_v36  ;;  %v3083_v42 = vsel %vm3069_vm2, %v3046_v44, %v2827_v62  ;;  %v7042_v36 = vld [vmem:[%s7547_s20 + $0x58] sm:$0xf] }
 0x168   : > { %6591 = vmatpush3.bf16.msra.mxu0 %v3691_v37  ;;  %v8919_v39 = vsel %vm3106_vm6, %v3083_v42, %v2917_v26  ;;  %v2829_v16 = vpop.permute.xlu0 %2828  ;;  %v6147_v32 = vcombine.low %v7041_v29, %v7042_v36  ;;  %4155 = vrot.lane.b32.xlu1 %v4086_v50, %s7133_s27  ;;  %v6149_v26 = vcombine.low %v7045_v18, %v7046_v33  ;;  %v4094_v37 = vld [vmem:[#allocation3 + $0x68] sm:$0xff]  ;;  %v4097_v62 = vld [vmem:[#allocation3 + $0x80] sm:$0xff]  ;;  %v4099_v36 = vld [vmem:[#allocation3 + $0x90] sm:$0xff] }
 0x169   : > { %6520 = vmatprep.mubr.msk.bf16.mxu1 %vm3186_vm7, %v8919_v39  ;;  %6559 = vmatmul.mubr.msk.bf16.gmra.mrb[8].mxu0 %vm3186_vm7, %v8919_v39  ;;  %v989_v18 = vld [vmem:[%s8832_s14 + $0xe0] sm:$0xff]  ;;  %v990_v33 = vld [vmem:[%s8832_s14 + $0xe8] sm:$0xff] }
 0x16a   : > { %6633 = vmatpush3.bf16.msra.mxu1 %v8766_v57  ;;  %v10617_v57 = vld [vmem:[#allocation18_spill] sm:$0xff]  ;;  %4157 = vrot.lane.b32.xlu0 %v4087_v34, %s7133_s27  ;;  %v2970_v59 = vsel %vm2940_vm14, %v6149_v26, %v10621_v40  ;;  %1022 = vst.msk [vmem:[#allocation3 + $0xe0] sm:$0xff] %vm993_vm8, %v989_v18  ;;  %1023 = vst.msk [vmem:[#allocation3 + $0xe8] sm:$0xff] %vm993_vm8, %v990_v33 }
 0x16b   : > { %v2964_v24 = vsel %vm2940_vm14, %v6147_v32, %v10617_v57  ;;  %v3015_v38 = vsel %vm2995_vm15, %v2970_v59, %v10622_v17  ;;  %v4104_v40 = vld [vmem:[#allocation3 + $0xb8] sm:$0xff] }
 0x16c   : > { %v3011_v6 = vsel %vm2995_vm15, %v2964_v24, %v10618_v47  ;;  %4159 = vrot.lane.b32.xlu1 %v4088_v4, %s7133_s27  ;;  %v4105_v17 = vld [vmem:[#allocation3 + $0xc0] sm:$0xff] }
 0x16d   : > { %v2919_v54 = vpop.permute.xlu0 %2918 }
 0x16e   : > { %v2739_v3 = vpop.permute.xlu1 %2738  ;;  %4161 = vrot.lane.b32.xlu0 %v4089_v46, %s7133_s27 }
 0x16f   : > { %v3048_v7 = vsel %vm3032_vm1, %v3011_v6, %v2739_v3 }
 0x170   : > { %v3085_v51 = vsel %vm3069_vm2, %v3048_v7, %v2829_v16  ;;  %4163 = vrot.lane.b32.xlu1 %v4090_v23, %s7133_s27  ;;  %v4098_v16 = vld [vmem:[#allocation3 + $0x88] sm:$0xff]  ;;  %v983_v23 = vld [vmem:[%s8832_s14 + $0xb0] sm:$0xff] }
 0x171   : > { %v8942_v11 = vsel %vm3106_vm6, %v3085_v51, %v2919_v54  ;;  %v2921_v52 = vpop.permute.xlu0 %2920  ;;  %1016 = vst.msk [vmem:[#allocation3 + $0xb0] sm:$0xff] %vm993_vm8, %v983_v23  ;;  %v9122_v23 = vld [vmem:[%s10507_s4] ss:$0 sm:$0xff] }
 0x172   : > { %6521 = vmatmul.mubr.msk.bf16.gmra.mrb[12].mxu1 %vm3186_vm7, %v8942_v11  ;;  %6562 = vmatprep.mubr.msk.bf16.mxu0 %vm3186_vm7, %v8942_v11  ;;  %v2741_v2 = vpop.permute.xlu1 %2740 }
 0x173   : > { %v3050_v8 = vsel %vm3032_vm1, %v3013_v49, %v2741_v2  ;;  %4165 = vrot.lane.b32.xlu0 %v4091_v27, %s7133_s27  ;;  %v981_v2 = vld [vmem:[%s8832_s14 + $0xa0] sm:$0xff] }
 0x174   : > { %4167 = vrot.lane.b32.xlu1 %v4092_v20, %s7133_s27  ;;  %1014 = vst.msk [vmem:[#allocation3 + $0xa0] sm:$0xff] %vm993_vm8, %v981_v2  ;;  %v987_v20 = vld [vmem:[%s8832_s14 + $0xd0] sm:$0xff] }
 0x175   : > { %1020 = vst.msk [vmem:[#allocation3 + $0xd0] sm:$0xff] %vm993_vm8, %v987_v20 }
 0x176   : > { %v2831_v55 = vpop.permute.xlu1 %2830 }
 0x177   : > { %v3087_v13 = vsel %vm3069_vm2, %v3050_v8, %v2831_v55  ;;  %4169 = vrot.lane.b32.xlu0 %v4093_v56, %s7133_s27  ;;  %v986_v55 = vld [vmem:[%s8832_s14 + $0xc8] sm:$0xff]  ;;  %v988_v56 = vld [vmem:[%s8832_s14 + $0xd8] sm:$0xff] }
 0x178   : > { %v3124_v30 = vsel %vm3106_vm6, %v3087_v13, %v2921_v52  ;;  %4171 = vrot.lane.b32.xlu1 %v4094_v37, %s7133_s27  ;;  %v2833_v44 = vpop.permute.xlu0 %2832  ;;  %v4103_v13 = vld [vmem:[#allocation3 + $0xb0] sm:$0xff]  ;;  %1019 = vst.msk [vmem:[#allocation3 + $0xc8] sm:$0xff] %vm993_vm8, %v986_v55  ;;  %1021 = vst.msk [vmem:[#allocation3 + $0xd8] sm:$0xff] %vm993_vm8, %v988_v56 }
 0x179   : > { %6524 = vmatprep.mubr.msk.bf16.mxu1 %vm3186_vm7, %v3124_v30  ;;  %6563 = vmatmul.mubr.msk.bf16.gmra.mrb[12].mxu0 %vm3186_vm7, %v3124_v30 }
 0x17a   : > { %6592 = vmatprep.mubr.msk.bf16.mxu0 %vm3186_vm7, %v8784_v1 }
 0x17b   : > { %4173 = vrot.lane.b32.xlu0 %v4095_v58, %s7133_s27  ;;  %v4101_v27 = vld [vmem:[#allocation3 + $0xa0] sm:$0xff] }
 0x17c   : > { %4175 = vrot.lane.b32.xlu1 %v4096_v63, %s7133_s27 }
 0x17f   : > { %4177 = vrot.lane.b32.xlu0 %v4097_v62, %s7133_s27  ;;  %v992_v62 = vld [vmem:[%s8832_s14 + $0xf8] sm:$0xff] }
 0x180   : > { %v2743_v10 = vpop.permute.xlu1 %2742  ;;  %4179 = vrot.lane.b32.xlu1 %v4098_v16, %s7133_s27  ;;  %1025 = vst.msk [vmem:[#allocation3 + $0xf8] sm:$0xff] %vm993_vm8, %v992_v62 }
 0x181   : > { %v3052_v1 = vsel %vm3032_vm1, %v3015_v38, %v2743_v10  ;;  %6593 = vmatmul.mubr.msk.bf16.vlgmr.msra.gmra.mrb[0].mxu0 %vm3186_vm7, %v8792_v0  ;;  %v4100_v0 = vld [vmem:[#allocation3 + $0x98] sm:$0xff] }
 0x182   : > { %6596 = vmatprep.mubr.msk.bf16.mxu0 %vm3186_vm7, %v8821_v41  ;;  %v3089_v42 = vsel %vm3069_vm2, %v3052_v1, %v2833_v44  ;;  %v991_v38 = vld [vmem:[%s8832_s14 + $0xf0] sm:$0xff]  ;;  %v4106_v44 = vld [vmem:[#allocation3 + $0xc8] sm:$0xff] }
 0x183   : > { %4181 = vrot.lane.b32.xlu0 %v4099_v36, %s7133_s27  ;;  %1024 = vst.msk [vmem:[#allocation3 + $0xf0] sm:$0xff] %vm993_vm8, %v991_v38  ;;  %v4109_v36 = vld [vmem:[#allocation3 + $0xe0] sm:$0xff] }
 0x184   : > { %v2923_v19 = vpop.permute.xlu1 %2922  ;;  %4183 = vrot.lane.b32.xlu1 %v4100_v0, %s7133_s27 }
 0x185   : > { %v8982_v29 = vsel %vm3106_vm6, %v3089_v42, %v2923_v19  ;;  %v4108_v19 = vld [vmem:[#allocation3 + $0xd8] sm:$0xff] }
 0x186   : > { %6525 = vmatmul.mubr.msk.bf16.gmra.mrb[16].mxu1 %vm3186_vm7, %v8982_v29  ;;  %v2745_v32 = vpop.permute.xlu0 %2744 }
 0x187   : > { %v3054_v50 = vsel %vm3032_vm1, %v8645_v21, %v2745_v32  ;;  %4185 = vrot.lane.b32.xlu0 %v4101_v27, %s7133_s27 }
 0x189   : > { %6597 = vmatmul.mubr.msk.bf16.gmra.mrb[4].mxu0 %vm3186_vm7, %v8883_v5 }
 0x18a   : > { %v2747_v41 = vpop.permute.xlu1 %2746  ;;  %v2835_v28 = vpop.permute.xlu0 %2834  ;;  %6600 = vmatprep.mubr.msk.bf16.mxu0 %vm3186_vm7, %v8919_v39 }
 0x18b   : > { %v3091_v24 = vsel %vm3069_vm2, %v3054_v50, %v2835_v28  ;;  %v3056_v6 = vsel %vm3032_vm1, %v8672_v45, %v2747_v41  ;;  %4189 = vrot.lane.b32.xlu0 %v4103_v13, %s7133_s27  ;;  %v4110_v28 = vld [vmem:[#allocation3 + $0xe8] sm:$0xff] }
 0x18e   : > { %v2837_v57 = vpop.permute.xlu1 %2836  ;;  %v2925_v34 = vpop.permute.xlu0 %2924 }
 0x18f   : > { %v8997_v47 = vsel %vm3106_vm6, %v3091_v24, %v2925_v34  ;;  %v3093_v5 = vsel %vm3069_vm2, %v3056_v6, %v2837_v57  ;;  %4193 = vrot.lane.b32.xlu0 %v4105_v17, %s7133_s27  ;;  %v4111_v57 = vld [vmem:[#allocation3 + $0xf0] sm:$0xff]  ;;  %v4112_v24 = vld [vmem:[#allocation3 + $0xf8] sm:$0xff] }
 0x190   : > { %6528 = vmatprep.mubr.msk.bf16.mxu1 %vm3186_vm7, %v8997_v47 }
 0x191   : > { %6601 = vmatmul.mubr.msk.bf16.gmra.mrb[8].mxu0 %vm3186_vm7, %v8942_v11 }
 0x192   : > { %v2927_v39 = vpop.permute.xlu1 %2926  ;;  %6604 = vmatprep.mubr.msk.bf16.mxu0 %vm3186_vm7, %v3124_v30 }
 0x193   : > { %v9007_v21 = vsel %vm3106_vm6, %v3093_v5, %v2927_v39 }
 0x194   : > { %6529 = vmatmul.mubr.msk.bf16.gmra.mrb[20].mxu1 %vm3186_vm7, %v9007_v21 }
 0x199   : > { %6605 = vmatmul.mubr.msk.bf16.gmra.mrb[12].mxu0 %vm3186_vm7, %v8982_v29 }
 0x19a   : > { %6608 = vmatprep.mubr.msk.bf16.mxu0 %vm3186_vm7, %v8997_v47 }
 0x19b   : > { %v2749_v45 = vpop.permute.xlu0 %2748 }
 0x19c   : > { %v3058_v7 = vsel %vm3032_vm1, %v8682_v61, %v2749_v45 }
 0x19e   : > { %v2751_v3 = vpop.permute.xlu1 %2750 }
 0x19f   : > { %v2839_v54 = vpop.permute.xlu0 %2838  ;;  %v3060_v60 = vsel %vm3032_vm1, %v8692_v43, %v2751_v3  ;;  %v982_v43 = vld [vmem:[%s8832_s14 + $0xa8] sm:$0xff] }
 0x1a0   : > { %v3095_v4 = vsel %vm3069_vm2, %v3058_v7, %v2839_v54  ;;  %1015 = vst.msk [vmem:[#allocation3 + $0xa8] sm:$0xff] %vm993_vm8, %v982_v43  ;;  %v3886_v43 = vlaneseq }
 0x1a1   : > { %6609 = vmatmul.mubr.msk.bf16.gmra.mrb[16].mxu0 %vm3186_vm7, %v9007_v21 }
 0x1a2   : > { %v2841_v51 = vpop.permute.xlu1 %2840  ;;  %v9124_v12 = vand.u32 127, %v3886_v43 }
 0x1a3   : > { %v2929_v25 = vpop.permute.xlu0 %2928  ;;  %v3097_v61 = vsel %vm3069_vm2, %v3060_v60, %v2841_v51 }
 0x1a4   : > { %v9022_v48 = vsel %vm3106_vm6, %v3095_v4, %v2929_v25  ;;  %vm3888_vm9 = vcmp.lt.s32.totalorder %v9124_v12, 48 }
 0x1a5   : > { %6532 = vmatprep.mubr.msk.bf16.mxu1 %vm3186_vm7, %v9022_v48  ;;  %6612 = vmatprep.mubr.msk.bf16.mxu0 %vm3186_vm7, %v9022_v48 }
 0x1a6   : > { %v2931_v11 = vpop.permute.xlu1 %2930 }
 0x1a7   : > { %v9032_v46 = vsel %vm3106_vm6, %v3097_v61, %v2931_v11  ;;  %v4102_v8 = vld [vmem:[#allocation3 + $0xa8] sm:$0xff] }
 0x1a8   : > { %6533 = vmatmul.mubr.msk.bf16.gmra.mrb[24].mxu1 %vm3186_vm7, %v9032_v46  ;;  %4187 = vrot.lane.b32.xlu1 %v4102_v8, %s7133_s27 }
 0x1a9   : > { %6613 = vmatmul.mubr.msk.bf16.gmra.mrb[20].mxu0 %vm3186_vm7, %v9032_v46 }
 0x1ac   : > { %4191 = vrot.lane.b32.xlu1 %v4104_v40, %s7133_s27 }
 0x1ad   : > { %v2753_v14 = vpop.permute.xlu0 %2752 }
 0x1ae   : > { %v3062_v30 = vsel %vm3032_vm1, %v8700_v35, %v2753_v14 }
 0x1b0   : > { %4195 = vrot.lane.b32.xlu1 %v4106_v44, %s7133_s27 }
 0x1b1   : > { %v2843_v52 = vpop.permute.xlu0 %2842 }
 0x1b2   : > { %v2755_v49 = vpop.permute.xlu1 %2754  ;;  %v3099_v26 = vsel %vm3069_vm2, %v3062_v30, %v2843_v52 }
 0x1b3   : > { %v3064_v59 = vsel %vm3032_vm1, %v8722_v15, %v2755_v49  ;;  %v4107_v15 = vld [vmem:[#allocation3 + $0xd0] sm:$0xff] }
 0x1b4   : > { %4197 = vrot.lane.b32.xlu0 %v4107_v15, %s7133_s27  ;;  %4199 = vrot.lane.b32.xlu1 %v4108_v19, %s7133_s27 }
 0x1b5   : > { %v2933_v58 = vpop.permute.xlu0 %2932 }
 0x1b6   : > { %v2845_v37 = vpop.permute.xlu1 %2844  ;;  %v3136_v35 = vsel %vm3106_vm6, %v3099_v26, %v2933_v58 }
 0x1b7   : > { %6536 = vmatprep.mubr.msk.bf16.mxu1 %vm3186_vm7, %v3136_v35  ;;  %6616 = vmatprep.mubr.msk.bf16.mxu0 %vm3186_vm7, %v3136_v35  ;;  %v3101_v10 = vsel %vm3069_vm2, %v3064_v59, %v2845_v37 }
 0x1b8   : > { %4201 = vrot.lane.b32.xlu0 %v4109_v36, %s7133_s27  ;;  %4203 = vrot.lane.b32.xlu1 %v4110_v28, %s7133_s27 }
 0x1ba   : > { %v2935_v63 = vpop.permute.xlu1 %2934 }
 0x1bb   : > { %v3138_v1 = vsel %vm3106_vm6, %v3101_v10, %v2935_v63 }
 0x1bc   : > { %6537 = vmatmul.mubr.msk.bf16.gmra.mrb[28].mxu1 %vm3186_vm7, %v3138_v1  ;;  %6617 = vmatmul.mubr.msk.bf16.gmra.mrb[24].mxu0 %vm3186_vm7, %v3138_v1 }
 0x1bd   : > { %6566 = vmatprep.mubr.msk.bf16.mxu1 %vm3186_vm7, %v8982_v29  ;;  %4205 = vrot.lane.b32.xlu0 %v4111_v57, %s7133_s27 }
 0x1be   : > { %v2847_v42 = vpop.permute.xlu1 %2846  ;;  %4207 = vrot.lane.b32.xlu1 %v4112_v24, %s7133_s27 }
 0x1bf   : > { %v2757_v16 = vpop.permute.xlu0 %2756 }
 0x1c0   : > { %v3066_v32 = vsel %vm3032_vm1, %v8731_v22, %v2757_v16 }
 0x1c1   : > { %v3103_v0 = vsel %vm3069_vm2, %v3066_v32, %v2847_v42 }
 0x1c2   : > { %v2937_v41 = vpop.permute.xlu1 %2936 }
 0x1c3   : > { %v2759_v29 = vpop.permute.xlu0 %2758  ;;  %v3140_v50 = vsel %vm3106_vm6, %v3103_v0, %v2937_v41 }
 0x1c4   : > { %6567 = vmatmul.mubr.msk.bf16.vlgmr.msra.gmra.mrb[16].mxu1 %vm3186_vm7, %v8997_v47  ;;  %6620 = vmatprep.mubr.msk.bf16.mxu0 %vm3186_vm7, %v3140_v50  ;;  %v3068_v34 = vsel %vm3032_vm1, %v8736_v31, %v2759_v29 }
 0x1c5   : > { %6570 = vmatprep.mubr.msk.bf16.mxu1 %vm3186_vm7, %v9007_v21 }
 0x1c6   : > { %v2939_v22 = vpop.permute.xlu1 %2938 }
 0x1c7   : > { %v2849_v6 = vpop.permute.xlu0 %2848 }
 0x1c8   : > { %v3105_v5 = vsel %vm3069_vm2, %v3068_v34, %v2849_v6 }
 0x1c9   : > { %v3142_v39 = vsel %vm3106_vm6, %v3105_v5, %v2939_v22 }
 0x1ca   : > { %6621 = vmatmul.mubr.msk.bf16.gmra.mrb[28].mxu0 %vm3186_vm7, %v3142_v39 }
 0x1cc   : > { %6571 = vmatmul.mubr.msk.bf16.gmra.mrb[20].mxu1 %vm3186_vm7, %v9022_v48 }
 0x1cd   : > { %6574 = vmatprep.mubr.msk.bf16.mxu1 %vm3186_vm7, %v9032_v46 }
 0x1d4   : > { %6575 = vmatmul.mubr.msk.bf16.gmra.mrb[24].mxu1 %vm3186_vm7, %v3136_v35 }
 0x1d5   : > { %6578 = vmatprep.mubr.msk.bf16.mxu1 %vm3186_vm7, %v3138_v1 }
 0x1dc   : > { %6579 = vmatmul.mubr.msk.bf16.gmra.mrb[28].mxu1 %vm3186_vm7, %v3140_v50 }
 0x228   : > { %v6510_v31 = vpop.f32.mrb[0].mxu1 }
 0x229   : > { %v3257_v47 = vpop.f32.mrb[1].mxu1  ;;  %v3386_v14 = vadd.f32 %v6510_v31, %v9122_v23 }
 0x22a   : > { %v6511_v21 = vpop.f32.mrb[2].mxu1  ;;  %v3384_v27 = vadd.f32 %v9122_v23, %v3257_v47 }
 0x22b   : > { %v3260_v45 = vpop.f32.mrb[3].mxu1  ;;  %v3387_v49 = vadd.f32 %v6511_v21, %v9122_v23 }
 0x22c   : > { %v3385_v55 = vadd.f32 %v9122_v23, %v3260_v45 }
 0x230   : > { %v6514_v3 = vpop.f32.mrb[4].mxu1 }
 0x231   : > { %v3273_v54 = vpop.f32.mrb[5].mxu1  ;;  %v3390_v59 = vadd.f32 %v6514_v3, %v9122_v23 }
 0x232   : > { %v6515_v7 = vpop.f32.mrb[6].mxu1  ;;  %v3388_v38 = vadd.f32 %v9122_v23, %v3273_v54 }
 0x233   : > { %v3276_v51 = vpop.f32.mrb[7].mxu1  ;;  %v3391_v1 = vadd.f32 %v6515_v7, %v9122_v23 }
 0x234   : > { %v3389_v15 = vadd.f32 %v9122_v23, %v3276_v51 }
 0x238   : > { %v6518_v4 = vpop.f32.mrb[8].mxu1 }
 0x239   : > { %v3289_v25 = vpop.f32.mrb[9].mxu1  ;;  %v3394_v22 = vadd.f32 %v6518_v4, %v9122_v23 }
 0x23a   : > { %v6519_v48 = vpop.f32.mrb[10].mxu1  ;;  %v3392_v6 = vadd.f32 %v9122_v23, %v3289_v25 }
 0x23b   : > { %v9109_v60 = vpop.f32.mrb[11].mxu1  ;;  %v3395_v47 = vadd.f32 %v6519_v48, %v9122_v23 }
 0x23c   : > { %v3393_v7 = vadd.f32 %v9122_v23, %v9109_v60 }
 0x245   : > { %v9111_v61 = vpop.f32.mrb[12].mxu1 }
 0x246   : > { %v9113_v11 = vpop.f32.mrb[13].mxu1 }
 0x247   : > { %v9115_v46 = vpop.f32.mrb[14].mxu1 }
 0x248   : > { %v9117_v2 = vpop.f32.mrb[15].mxu1 }
 0x254   : > { %v6594_v53 = vpop.f32.mrb[0].mxu0 }
 0x255   : > { %v6635_v52 = vadd.f32 %v6594_v53, %v3386_v14  ;;  %v3727_v8 = vpop.f32.mrb[1].mxu0 }
 0x256   : > { %v6637_v13 = vadd.f32 %v3727_v8, %v3384_v27  ;;  %v6595_v20 = vpop.f32.mrb[2].mxu0 }
 0x257   : > { %v3891_v30 = vmul.f32 0.5, %v6635_v52  ;;  %v6639_v56 = vadd.f32 %v6595_v20, %v3387_v49  ;;  %v3730_v18 = vpop.f32.mrb[3].mxu0 }
 0x258   : > { %v3889_v33 = vmul.f32 0.5, %v6637_v13  ;;  %v6641_v26 = vadd.f32 %v3730_v18, %v3385_v55  ;;  %v3398_v18 = vadd.f32 %v9111_v61, %v9122_v23 }
 0x259   : > { %v3923_v37 = vsel %vm3888_vm9, %v3891_v30, %v6635_v52  ;;  %v3892_v58 = vmul.f32 0.5, %v6639_v56 }
 0x25a   : > { %6835 = vtanh.f32 %v3923_v37  ;;  %v3921_v40 = vsel %vm3888_vm9, %v3889_v33, %v6637_v13  ;;  %v3890_v35 = vmul.f32 0.5, %v6641_v26 }
 0x25b   : > { %6837 = vtanh.f32 %v3921_v40  ;;  %v3924_v17 = vsel %vm3888_vm9, %v3892_v58, %v6639_v56 }
 0x25c   : > { %6839 = vtanh.f32 %v3924_v17  ;;  %v3922_v10 = vsel %vm3888_vm9, %v3890_v35, %v6641_v26  ;;  %v6598_v63 = vpop.f32.mrb[4].mxu0  ;;  %v3396_v35 = vadd.f32 %v9122_v23, %v9113_v11 }
 0x25d   : > { %6841 = vtanh.f32 %v3922_v10  ;;  %v6643_v44 = vadd.f32 %v6598_v63, %v3390_v59  ;;  %v3743_v62 = vpop.f32.mrb[5].mxu0 }
 0x25e   : > { %v6645_v42 = vadd.f32 %v3743_v62, %v3388_v38  ;;  %v6599_v19 = vpop.f32.mrb[6].mxu0  ;;  %v3399_v38 = vadd.f32 %v9115_v46, %v9122_v23  ;;  %v3397_v62 = vadd.f32 %v9122_v23, %v9117_v2 }
 0x25f   : > { %v3895_v16 = vmul.f32 0.5, %v6643_v44  ;;  %v6647_v36 = vadd.f32 %v6599_v19, %v3391_v1  ;;  %v3746_v32 = vpop.f32.mrb[7].mxu0 }
 0x260   : > { %v3893_v0 = vmul.f32 0.5, %v6645_v42  ;;  %v6649_v41 = vadd.f32 %v3746_v32, %v3389_v15 }
 0x261   : > { %v3927_v28 = vsel %vm3888_vm9, %v3895_v16, %v6643_v44  ;;  %v3896_v29 = vmul.f32 0.5, %v6647_v36 }
 0x262   : > { %6843 = vtanh.f32 %v3927_v28  ;;  %v3925_v50 = vsel %vm3888_vm9, %v3893_v0, %v6645_v42  ;;  %v3894_v57 = vmul.f32 0.5, %v6649_v41 }
 0x263   : > { %6845 = vtanh.f32 %v3925_v50  ;;  %v3928_v24 = vsel %vm3888_vm9, %v3896_v29, %v6647_v36 }
 0x264   : > { %v6836_v34 = vpop.eup %6835  ;;  %6847 = vtanh.f32 %v3928_v24  ;;  %v3926_v5 = vsel %vm3888_vm9, %v3894_v57, %v6649_v41  ;;  %v6602_v39 = vpop.f32.mrb[8].mxu0 }
 0x265   : > { %v6838_v31 = vpop.eup %6837  ;;  %6849 = vtanh.f32 %v3926_v5  ;;  %v6651_v21 = vadd.f32 %v6602_v39, %v3394_v22  ;;  %v3759_v45 = vpop.f32.mrb[9].mxu0  ;;  %v3987_v3 = vadd.f32 1.0, %v6836_v34 }
 0x266   : > { %v6840_v54 = vpop.eup %6839  ;;  %v6653_v51 = vadd.f32 %v3759_v45, %v3392_v6  ;;  %v3985_v4 = vadd.f32 1.0, %v6838_v31  ;;  %v6603_v43 = vpop.f32.mrb[10].mxu0 }
 0x267   : > { %v6842_v25 = vpop.eup %6841  ;;  %v3899_v14 = vmul.f32 0.5, %v6651_v21  ;;  %v6655_v27 = vadd.f32 %v6603_v43, %v3395_v47  ;;  %v3762_v53 = vpop.f32.mrb[11].mxu0  ;;  %v4019_v49 = vmul.f32 0.5, %v3987_v3  ;;  %v3988_v52 = vadd.f32 1.0, %v6840_v54 }
 0x268   : > { %v3897_v8 = vmul.f32 0.5, %v6653_v51  ;;  %v4017_v55 = vmul.f32 0.5, %v3985_v4  ;;  %v3986_v48 = vadd.f32 1.0, %v6842_v25  ;;  %v6657_v13 = vadd.f32 %v3762_v53, %v3393_v7 }
 0x269   : > { %v3931_v20 = vsel %vm3888_vm9, %v3899_v14, %v6651_v21  ;;  %v3900_v30 = vmul.f32 0.5, %v6655_v27  ;;  %v9160_v60 = vsel %vm3888_vm9, %v4019_v49, %v6836_v34  ;;  %v4020_v56 = vmul.f32 0.5, %v3988_v52 }
 0x26a   : > { %6851 = vtanh.f32 %v3931_v20  ;;  %v3929_v33 = vsel %vm3888_vm9, %v3897_v8, %v6653_v51  ;;  %4309 = vrot.lane.b32.xlu0 %v9160_v60, %s7134_s11  ;;  %v4018_v37 = vmul.f32 0.5, %v3986_v48  ;;  %v3898_v58 = vmul.f32 0.5, %v6657_v13 }
 0x26b   : > { %6853 = vtanh.f32 %v3929_v33  ;;  %v3932_v26 = vsel %vm3888_vm9, %v3900_v30, %v6655_v27  ;;  %v9174_v61 = vsel %vm3888_vm9, %v4020_v56, %v6840_v54  ;;  %v9180_v10 = vsel %vm3888_vm9, %v4017_v55, %v6838_v31 }
 0x26c   : > { %v6844_v40 = vpop.eup %6843  ;;  %6855 = vtanh.f32 %v3932_v26  ;;  %v6606_v59 = vpop.f32.mrb[12].mxu0  ;;  %v3930_v63 = vsel %vm3888_vm9, %v3898_v58, %v6657_v13  ;;  %4311 = vrot.lane.b32.xlu1 %v9174_v61, %s7134_s11  ;;  %v9192_v16 = vsel %vm3888_vm9, %v4018_v37, %v6842_v25 }
 0x26d   : > { %v6846_v17 = vpop.eup %6845  ;;  %v6659_v11 = vadd.f32 %v6606_v59, %v3398_v18  ;;  %v3775_v1 = vpop.f32.mrb[13].mxu0  ;;  %6857 = vtanh.f32 %v3930_v63  ;;  %v3991_v42 = vadd.f32 1.0, %v6844_v40 }
 0x26e   : > { %v6848_v44 = vpop.eup %6847  ;;  %v6661_v15 = vadd.f32 %v3775_v1, %v3396_v35  ;;  %4305 = vrot.lane.b32.xlu0 %v9180_v10, %s7134_s11  ;;  %v6607_v46 = vpop.f32.mrb[14].mxu0  ;;  %v3989_v29 = vadd.f32 1.0, %v6846_v17 }
 0x26f   : > { %v6850_v19 = vpop.eup %6849  ;;  %v3903_v36 = vmul.f32 0.5, %v6659_v11  ;;  %v6663_v32 = vadd.f32 %v6607_v46, %v3399_v38  ;;  %v3778_v0 = vpop.f32.mrb[15].mxu0  ;;  %v3992_v41 = vadd.f32 1.0, %v6848_v44  ;;  %v4023_v24 = vmul.f32 0.5, %v3991_v42 }
 0x270   : > { %v3901_v28 = vmul.f32 0.5, %v6661_v15  ;;  %v3990_v50 = vadd.f32 1.0, %v6850_v19  ;;  %v6665_v2 = vadd.f32 %v3778_v0, %v3397_v62  ;;  %4307 = vrot.lane.b32.xlu1 %v9192_v16, %s7134_s11  ;;  %v4021_v47 = vmul.f32 0.5, %v3989_v29 }
 0x271   : > { %v3935_v57 = vsel %vm3888_vm9, %v3903_v36, %v6659_v11  ;;  %v3904_v22 = vmul.f32 0.5, %v6663_v32  ;;  %v4024_v34 = vmul.f32 0.5, %v3992_v41  ;;  %v9204_v21 = vsel %vm3888_vm9, %v4023_v24, %v6844_v40 }
 0x272   : > { %6859 = vtanh.f32 %v3935_v57  ;;  %v3933_v6 = vsel %vm3888_vm9, %v3901_v28, %v6661_v15  ;;  %v3902_v39 = vmul.f32 0.5, %v6665_v2  ;;  %v4022_v7 = vmul.f32 0.5, %v3990_v50  ;;  %4317 = vrot.lane.b32.xlu0 %v9204_v21, %s7134_s11 }
 0x273   : > { %6861 = vtanh.f32 %v3933_v6  ;;  %v3936_v5 = vsel %vm3888_vm9, %v3904_v22, %v6663_v32  ;;  %v9208_v45 = vsel %vm3888_vm9, %v4024_v34, %v6848_v44  ;;  %v9226_v52 = vsel %vm3888_vm9, %v4021_v47, %v6846_v17  ;;  %v9256_v44 = vpop.permute.xlu0 %4145  ;;  %v9274_v32 = vpop.permute.xlu1 %4147 }
 0x274   : > { %v6852_v31 = vpop.eup %6851  ;;  %6863 = vtanh.f32 %v3936_v5  ;;  %v9210_v3 = vpop.f32.mrb[16].mxu0  ;;  %v3934_v51 = vsel %vm3888_vm9, %v3902_v39, %v6665_v2  ;;  %4319 = vrot.lane.b32.xlu1 %v9208_v45, %s7134_s11  ;;  %v9230_v48 = vsel %vm3888_vm9, %v4022_v7, %v6850_v19 }
 0x275   : > { %v6854_v54 = vpop.eup %6853  ;;  %v9216_v4 = vpop.f32.mrb[17].mxu0  ;;  %6865 = vtanh.f32 %v3934_v51  ;;  %v3995_v14 = vadd.f32 1.0, %v6852_v31 }
 0x276   : > { %v6856_v43 = vpop.eup %6855  ;;  %v9220_v25 = vpop.f32.mrb[18].mxu0  ;;  %v3993_v8 = vadd.f32 1.0, %v6854_v54  ;;  %4313 = vrot.lane.b32.xlu0 %v9226_v52, %s7134_s11 }
 0x277   : > { %v9222_v27 = vpop.f32.mrb[19].mxu0  ;;  %v3996_v53 = vadd.f32 1.0, %v6856_v43  ;;  %v6858_v49 = vpop.eup %6857  ;;  %v4027_v55 = vmul.f32 0.5, %v3995_v14 }
 0x278   : > { %v3994_v13 = vadd.f32 1.0, %v6858_v49  ;;  %4315 = vrot.lane.b32.xlu1 %v9230_v48, %s7134_s11  ;;  %v4025_v33 = vmul.f32 0.5, %v3993_v8  ;;  %v9282_v29 = vpop.permute.xlu0 %4149  ;;  %v9290_v2 = vpop.permute.xlu1 %4151 }
 0x279   : > { %v4028_v20 = vmul.f32 0.5, %v3996_v53  ;;  %v9238_v30 = vsel %vm3888_vm9, %v4027_v55, %v6852_v31 }
 0x27a   : > { %v4026_v58 = vmul.f32 0.5, %v3994_v13  ;;  %4325 = vrot.lane.b32.xlu0 %v9238_v30, %s7134_s11  ;;  %v9260_v62 = vsel %vm3888_vm9, %v4025_v33, %v6854_v54 }
 0x27b   : > { %v9242_v56 = vsel %vm3888_vm9, %v4028_v20, %v6856_v43 }
 0x27c   : > { %v6860_v18 = vpop.eup %6859  ;;  %v9244_v26 = vpop.f32.mrb[20].mxu0  ;;  %4327 = vrot.lane.b32.xlu1 %v9242_v56, %s7134_s11  ;;  %v9264_v46 = vsel %vm3888_vm9, %v4026_v58, %v6858_v49 }
 0x27d   : > { %v6862_v37 = vpop.eup %6861  ;;  %v9248_v40 = vpop.f32.mrb[21].mxu0  ;;  %v3999_v35 = vadd.f32 1.0, %v6860_v18 }
 0x27e   : > { %v6864_v59 = vpop.eup %6863  ;;  %v9252_v17 = vpop.f32.mrb[22].mxu0  ;;  %v3997_v15 = vadd.f32 1.0, %v6862_v37  ;;  %4321 = vrot.lane.b32.xlu0 %v9260_v62, %s7134_s11 }
 0x27f   : > { %v9254_v38 = vpop.f32.mrb[23].mxu0  ;;  %v4031_v63 = vmul.f32 0.5, %v3999_v35  ;;  %v4000_v11 = vadd.f32 1.0, %v6864_v59  ;;  %v6866_v1 = vpop.eup %6865 }
 0x280   : > { %v3998_v42 = vadd.f32 1.0, %v6866_v1  ;;  %4323 = vrot.lane.b32.xlu1 %v9264_v46, %s7134_s11  ;;  %v4029_v41 = vmul.f32 0.5, %v3997_v15  ;;  %v9300_v22 = vpop.permute.xlu0 %4153  ;;  %v9308_v5 = vpop.permute.xlu1 %4155 }
 0x281   : > { %v4032_v19 = vmul.f32 0.5, %v4000_v11  ;;  %v9272_v36 = vsel %vm3888_vm9, %v4031_v63, %v6860_v18 }
 0x282   : > { %v4030_v28 = vmul.f32 0.5, %v3998_v42  ;;  %4333 = vrot.lane.b32.xlu0 %v9272_v36, %s7134_s11  ;;  %v9288_v50 = vsel %vm3888_vm9, %v4029_v41, %v6862_v37 }
 0x283   : > { %v9278_v0 = vsel %vm3888_vm9, %v4032_v19, %v6864_v59 }
 0x284   : > { %4335 = vrot.lane.b32.xlu1 %v9278_v0, %s7134_s11  ;;  %v9294_v57 = vsel %vm3888_vm9, %v4030_v28, %v6866_v1  ;;  %v9312_v31 = vpop.permute.xlu0 %4157  ;;  %v9314_v54 = vpop.permute.xlu1 %4159 }
 0x286   : > { %4329 = vrot.lane.b32.xlu0 %v9288_v50, %s7134_s11 }
 0x288   : > { %4331 = vrot.lane.b32.xlu1 %v9294_v57, %s7134_s11  ;;  %v9320_v55 = vpop.permute.xlu0 %4161  ;;  %v9328_v59 = vpop.permute.xlu1 %4163 }
 0x28c   : > { %v9343_v28 = vpop.permute.xlu0 %4165 }
 0x28f   : > { %v9302_v24 = vpop.f32.mrb[24].mxu0 }
 0x290   : > { %v9304_v34 = vpop.f32.mrb[25].mxu0 }
 0x291   : > { %v9306_v6 = vpop.f32.mrb[26].mxu0 }
 0x292   : > { %v9310_v39 = vpop.f32.mrb[27].mxu0 }
 0x297   : > { %v6568_v47 = vpop.f32.mrb[16].mxu1 }
 0x298   : > { %v6666_v7 = vadd.f32 %v6568_v47, %v9122_v23  ;;  %v3556_v51 = vpop.f32.mrb[17].mxu1 }
 0x299   : > { %v6668_v43 = vadd.f32 %v9122_v23, %v3556_v51  ;;  %v6569_v14 = vpop.f32.mrb[18].mxu1 }
 0x29a   : > { %v6667_v53 = vadd.f32 %v6666_v7, %v9210_v3  ;;  %v6670_v49 = vadd.f32 %v6569_v14, %v9122_v23  ;;  %v3559_v8 = vpop.f32.mrb[19].mxu1 }
 0x29b   : > { %v6669_v13 = vadd.f32 %v6668_v43, %v9216_v4  ;;  %v6672_v20 = vadd.f32 %v9122_v23, %v3559_v8 }
 0x29c   : > { %v3907_v18 = vmul.f32 0.5, %v6667_v53  ;;  %v6671_v33 = vadd.f32 %v6670_v49, %v9220_v25 }
 0x29d   : > { %v3905_v37 = vmul.f32 0.5, %v6669_v13  ;;  %v6673_v58 = vadd.f32 %v6672_v20, %v9222_v27  ;;  %v9326_v35 = vpop.f32.mrb[28].mxu0 }
 0x29e   : > { %v3939_v3 = vsel %vm3888_vm9, %v3907_v18, %v6667_v53  ;;  %v3908_v63 = vmul.f32 0.5, %v6671_v33  ;;  %v9332_v11 = vpop.f32.mrb[29].mxu0 }
 0x29f   : > { %6867 = vtanh.f32 %v3939_v3  ;;  %v3937_v4 = vsel %vm3888_vm9, %v3905_v37, %v6669_v13  ;;  %v3906_v1 = vmul.f32 0.5, %v6673_v58  ;;  %v6572_v15 = vpop.f32.mrb[20].mxu1  ;;  %v9336_v25 = vpop.f32.mrb[30].mxu0 }
 0x2a0   : > { %6869 = vtanh.f32 %v3937_v4  ;;  %v3940_v27 = vsel %vm3888_vm9, %v3908_v63, %v6671_v33  ;;  %v6674_v42 = vadd.f32 %v6572_v15, %v9122_v23  ;;  %v3572_v19 = vpop.f32.mrb[21].mxu1  ;;  %v9341_v41 = vpop.f32.mrb[31].mxu0 }
 0x2a1   : > { %6871 = vtanh.f32 %v3940_v27  ;;  %v3938_v47 = vsel %vm3888_vm9, %v3906_v1, %v6673_v58  ;;  %v6676_v7 = vadd.f32 %v9122_v23, %v3572_v19  ;;  %v6573_v51 = vpop.f32.mrb[22].mxu1  ;;  %v9352_v13 = vpop.permute.xlu1 %4167 }
 0x2a2   : > { %6873 = vtanh.f32 %v3938_v47  ;;  %v6675_v43 = vadd.f32 %v6674_v42, %v9244_v26  ;;  %v6678_v14 = vadd.f32 %v6573_v51, %v9122_v23  ;;  %v3575_v53 = vpop.f32.mrb[23].mxu1  ;;  %v9358_v26 = vpop.permute.xlu0 %4169 }
 0x2a3   : > { %v6677_v49 = vadd.f32 %v6676_v7, %v9248_v40  ;;  %v6680_v8 = vadd.f32 %v9122_v23, %v3575_v53 }
 0x2a4   : > { %v3911_v20 = vmul.f32 0.5, %v6675_v43  ;;  %v6679_v18 = vadd.f32 %v6678_v14, %v9252_v17 }
 0x2a5   : > { %v3909_v33 = vmul.f32 0.5, %v6677_v49  ;;  %v6681_v37 = vadd.f32 %v6680_v8, %v9254_v38  ;;  %v9368_v7 = vpop.permute.xlu1 %4171 }
 0x2a6   : > { %v3943_v58 = vsel %vm3888_vm9, %v3911_v20, %v6675_v43  ;;  %v3912_v3 = vmul.f32 0.5, %v6679_v18 }
 0x2a7   : > { %6875 = vtanh.f32 %v3943_v58  ;;  %v3941_v40 = vsel %vm3888_vm9, %v3909_v33, %v6677_v49  ;;  %v3910_v63 = vmul.f32 0.5, %v6681_v37  ;;  %v6576_v4 = vpop.f32.mrb[24].mxu1 }
 0x2a8   : > { %6877 = vtanh.f32 %v3941_v40  ;;  %v3944_v1 = vsel %vm3888_vm9, %v3912_v3, %v6679_v18  ;;  %v6682_v17 = vadd.f32 %v6576_v4, %v9122_v23  ;;  %v3588_v15 = vpop.f32.mrb[25].mxu1 }
 0x2a9   : > { %v6868_v38 = vpop.eup %6867  ;;  %6879 = vtanh.f32 %v3944_v1  ;;  %v3942_v27 = vsel %vm3888_vm9, %v3910_v63, %v6681_v37  ;;  %v6684_v42 = vadd.f32 %v9122_v23, %v3588_v15  ;;  %v6577_v19 = vpop.f32.mrb[26].mxu1 }
 0x2aa   : > { %v6870_v47 = vpop.eup %6869  ;;  %6881 = vtanh.f32 %v3942_v27  ;;  %v6683_v51 = vadd.f32 %v6682_v17, %v9302_v24  ;;  %v6686_v43 = vadd.f32 %v6577_v19, %v9122_v23  ;;  %v3591_v14 = vpop.f32.mrb[27].mxu1  ;;  %v4003_v53 = vadd.f32 1.0, %v6868_v38 }
 0x2ab   : > { %v6872_v49 = vpop.eup %6871  ;;  %v6685_v8 = vadd.f32 %v6684_v42, %v9304_v34  ;;  %v6688_v20 = vadd.f32 %v9122_v23, %v3591_v14  ;;  %v4001_v18 = vadd.f32 1.0, %v6870_v47  ;;  %v9375_v63 = vpop.permute.xlu0 %4173 }
 0x2ac   : > { %v6874_v33 = vpop.eup %6873  ;;  %v3915_v37 = vmul.f32 0.5, %v6683_v51  ;;  %v6687_v58 = vadd.f32 %v6686_v43, %v9306_v6  ;;  %v4035_v3 = vmul.f32 0.5, %v4003_v53  ;;  %v4004_v40 = vadd.f32 1.0, %v6872_v49  ;;  %v9388_v43 = vpop.permute.xlu1 %4175 }
 0x2ad   : > { %v3913_v4 = vmul.f32 0.5, %v6685_v8  ;;  %v6689_v24 = vadd.f32 %v6688_v20, %v9310_v39  ;;  %v4002_v1 = vadd.f32 1.0, %v6874_v33  ;;  %v4033_v19 = vmul.f32 0.5, %v4001_v18 }
 0x2ae   : > { %v3947_v17 = vsel %vm3888_vm9, %v3915_v37, %v6683_v51  ;;  %v3916_v15 = vmul.f32 0.5, %v6687_v58  ;;  %v9382_v34 = vsel %vm3888_vm9, %v4035_v3, %v6868_v38  ;;  %v4036_v27 = vmul.f32 0.5, %v4004_v40 }
 0x2af   : > { %6883 = vtanh.f32 %v3947_v17  ;;  %v3945_v6 = vsel %vm3888_vm9, %v3913_v4, %v6685_v8  ;;  %v3914_v42 = vmul.f32 0.5, %v6689_v24  ;;  %4341 = vrot.lane.b32.xlu0 %v9382_v34, %s7134_s11  ;;  %v6580_v39 = vpop.f32.mrb[28].mxu1  ;;  %v9394_v20 = vpop.permute.xlu0 %4177  ;;  %v4034_v8 = vmul.f32 0.5, %v4002_v1 }
 0x2b0   : > { %6885 = vtanh.f32 %v3945_v6  ;;  %v3948_v51 = vsel %vm3888_vm9, %v3916_v15, %v6687_v58  ;;  %v3604_v14 = vpop.f32.mrb[29].mxu1  ;;  %v6690_v18 = vadd.f32 %v6580_v39, %v9122_v23  ;;  %v9399_v40 = vsel %vm3888_vm9, %v4036_v27, %v6872_v49 }
 0x2b1   : > { %v6876_v38 = vpop.eup %6875  ;;  %6887 = vtanh.f32 %v3948_v51  ;;  %v3946_v53 = vsel %vm3888_vm9, %v3914_v42, %v6689_v24  ;;  %v6581_v37 = vpop.f32.mrb[30].mxu1  ;;  %v6692_v58 = vadd.f32 %v9122_v23, %v3604_v14  ;;  %v9404_v15 = vsel %vm3888_vm9, %v4033_v19, %v6870_v47  ;;  %4343 = vrot.lane.b32.xlu1 %v9399_v40, %s7134_s11 }
 0x2b2   : > { %v6878_v3 = vpop.eup %6877  ;;  %6889 = vtanh.f32 %v3946_v53  ;;  %v3607_v4 = vpop.f32.mrb[31].mxu1  ;;  %v6691_v24 = vadd.f32 %v6690_v18, %v9326_v35  ;;  %v6694_v1 = vadd.f32 %v6581_v37, %v9122_v23  ;;  %v4007_v39 = vadd.f32 1.0, %v6876_v38 }
 0x2b3   : > { %v6880_v17 = vpop.eup %6879  ;;  %v9410_v42 = vpop.permute.xlu1 %4179  ;;  %v6693_v49 = vadd.f32 %v6692_v58, %v9332_v11  ;;  %v6696_v27 = vadd.f32 %v9122_v23, %v3607_v4  ;;  %4337 = vrot.lane.b32.xlu0 %v9404_v15, %s7134_s11  ;;  %v9418_v47 = vsel %vm3888_vm9, %v4034_v8, %v6874_v33  ;;  %v4005_v18 = vadd.f32 1.0, %v6878_v3 }
 0x2b4   : > { %v6882_v6 = vpop.eup %6881  ;;  %v3919_v35 = vmul.f32 0.5, %v6691_v24  ;;  %v6695_v19 = vadd.f32 %v6694_v1, %v9336_v25  ;;  %v4008_v51 = vadd.f32 1.0, %v6880_v17  ;;  %v4039_v37 = vmul.f32 0.5, %v4007_v39  ;;  %v9422_v11 = vpop.permute.xlu0 %4181 }
 0x2b5   : > { %v3917_v14 = vmul.f32 0.5, %v6693_v49  ;;  %v6697_v53 = vadd.f32 %v6696_v27, %v9341_v41  ;;  %v4006_v4 = vadd.f32 1.0, %v6882_v6  ;;  %4339 = vrot.lane.b32.xlu1 %v9418_v47, %s7134_s11 }
 0x2b6   : > { %v3951_v23 = vsel %vm3888_vm9, %v3919_v35, %v6691_v24  ;;  %v3920_v58 = vmul.f32 0.5, %v6695_v19  ;;  %v4040_v33 = vmul.f32 0.5, %v4008_v51  ;;  %v4037_v35 = vmul.f32 0.5, %v4005_v18 }
 0x2b7   : > { %6891 = vtanh.f32 %v3951_v23  ;;  %v3949_v25 = vsel %vm3888_vm9, %v3917_v14, %v6693_v49  ;;  %v3918_v8 = vmul.f32 0.5, %v6697_v53  ;;  %v9432_v39 = vpop.permute.xlu1 %4183  ;;  %v9438_v51 = vsel %vm3888_vm9, %v4039_v37, %v6876_v38 }
 0x2b8   : > { %6893 = vtanh.f32 %v3949_v25  ;;  %v3952_v41 = vsel %vm3888_vm9, %v3920_v58, %v6695_v19  ;;  %v4038_v49 = vmul.f32 0.5, %v4006_v4  ;;  %4349 = vrot.lane.b32.xlu0 %v9438_v51, %s7134_s11  ;;  %v9444_v19 = vsel %vm3888_vm9, %v4040_v33, %v6880_v17  ;;  %v9448_v58 = vpop.permute.xlu0 %4185 }
 0x2b9   : > { %v6884_v1 = vpop.eup %6883  ;;  %6895 = vtanh.f32 %v3952_v41  ;;  %v3950_v24 = vsel %vm3888_vm9, %v3918_v8, %v6697_v53  ;;  %4351 = vrot.lane.b32.xlu1 %v9444_v19, %s7134_s11  ;;  %10623 = vst [vmem:[#allocation13_spill] sm:$0xff] %v9448_v58  ;;  %v9452_v38 = vsel %vm3888_vm9, %v4037_v35, %v6878_v3 }
 0x2ba   : > { %v6886_v27 = vpop.eup %6885  ;;  %6897 = vtanh.f32 %v3950_v24  ;;  %v4011_v53 = vadd.f32 1.0, %v6884_v1  ;;  %v9456_v8 = vsel %vm3888_vm9, %v4038_v49, %v6882_v6 }
 0x2bb   : > { %v6888_v23 = vpop.eup %6887  ;;  %v4009_v37 = vadd.f32 1.0, %v6886_v27  ;;  %v9460_v33 = vpop.permute.xlu1 %4187 }
 0x2bc   : > { %v6890_v14 = vpop.eup %6889  ;;  %v4012_v18 = vadd.f32 1.0, %v6888_v23  ;;  %v4043_v4 = vmul.f32 0.5, %v4011_v53  ;;  %4345 = vrot.lane.b32.xlu0 %v9452_v38, %s7134_s11  ;;  %10624 = vst [vmem:[#allocation14_spill] sm:$0xff] %v9460_v33  ;;  %v9472_v49 = vpop.permute.xlu0 %4189 }
 0x2bd   : > { %v4010_v17 = vadd.f32 1.0, %v6890_v14  ;;  %4347 = vrot.lane.b32.xlu1 %v9456_v8, %s7134_s11  ;;  %v4041_v6 = vmul.f32 0.5, %v4009_v37  ;;  %10625 = vst [vmem:[#allocation15_spill] sm:$0xff] %v9472_v49 }
 0x2be   : > { %v4044_v25 = vmul.f32 0.5, %v4012_v18  ;;  %v9466_v3 = vsel %vm3888_vm9, %v4043_v4, %v6884_v1 }
 0x2bf   : > { %v4042_v53 = vmul.f32 0.5, %v4010_v17  ;;  %v9478_v58 = vpop.permute.xlu1 %4191 }
 0x2c0   : > { %v9470_v41 = vsel %vm3888_vm9, %v4044_v25, %v6888_v23  ;;  %4357 = vrot.lane.b32.xlu0 %v9466_v3, %s7134_s11  ;;  %10626 = vst [vmem:[#allocation17_spill] sm:$0xff] %v9478_v58  ;;  %v9482_v23 = vsel %vm3888_vm9, %v4041_v6, %v6886_v27  ;;  %v9496_v58 = vpop.permute.xlu0 %4193 }
 0x2c1   : > { %v6892_v24 = vpop.eup %6891  ;;  %4359 = vrot.lane.b32.xlu1 %v9470_v41, %s7134_s11  ;;  %v9486_v25 = vsel %vm3888_vm9, %v4042_v53, %v6890_v14  ;;  %10627 = vst [vmem:[#allocation9_spill] sm:$0xff] %v9496_v58 }
 0x2c2   : > { %v6894_v35 = vpop.eup %6893  ;;  %v4015_v18 = vadd.f32 1.0, %v6892_v24 }
 0x2c3   : > { %v6896_v9 = vpop.eup %6895  ;;  %v4013_v37 = vadd.f32 1.0, %v6894_v35  ;;  %v9504_v53 = vpop.permute.xlu1 %4195 }
 0x2c4   : > { %v6898_v1 = vpop.eup %6897  ;;  %v4047_v4 = vmul.f32 0.5, %v4015_v18  ;;  %v4016_v33 = vadd.f32 1.0, %v6896_v9  ;;  %4353 = vrot.lane.b32.xlu0 %v9482_v23, %s7134_s11  ;;  %10628 = vst [vmem:[#allocation18_spill] sm:$0xff] %v9504_v53 }
 0x2c5   : > { %v4014_v17 = vadd.f32 1.0, %v6898_v1  ;;  %4355 = vrot.lane.b32.xlu1 %v9486_v25, %s7134_s11  ;;  %v4045_v14 = vmul.f32 0.5, %v4013_v37 }
 0x2c6   : > { %v4048_v49 = vmul.f32 0.5, %v4016_v33  ;;  %v9494_v18 = vsel %vm3888_vm9, %v4047_v4, %v6892_v24  ;;  %v9512_v24 = vpop.permute.xlu0 %4197 }
 0x2c7   : > { %v4046_v6 = vmul.f32 0.5, %v4014_v17  ;;  %v9510_v33 = vsel %vm3888_vm9, %v4045_v14, %v6894_v35 }
 0x2c8   : > { %v9500_v27 = vsel %vm3888_vm9, %v4048_v49, %v6896_v9  ;;  %4365 = vrot.lane.b32.xlu0 %v9494_v18, %s7134_s11  ;;  %v9522_v49 = vpop.permute.xlu1 %4199 }
 0x2c9   : > { %4367 = vrot.lane.b32.xlu1 %v9500_v27, %s7134_s11  ;;  %v9516_v9 = vsel %vm3888_vm9, %v4046_v6, %v6898_v1 }
 0x2ca   : > { %v9524_v4 = vpop.permute.xlu0 %4201 }
 0x2cb   : > { %10629 = vst [vmem:[#allocation12_spill] sm:$0xff] %v9524_v4 }
 0x2cc   : > { %4361 = vrot.lane.b32.xlu0 %v9510_v33, %s7134_s11  ;;  %v9526_v37 = vpop.permute.xlu1 %4203 }
 0x2cd   : > { %4363 = vrot.lane.b32.xlu1 %v9516_v9, %s7134_s11  ;;  %10630 = vst [vmem:[#allocation19_spill] sm:$0xff] %v9526_v37  ;;  %s7047_s11 = scalar_lea.vmem %s10433_s19, 2048 }
 0x2ce   : > { %v9528_v35 = vpop.permute.xlu0 %4205  ;;  %p7048_p12 = scmp.ne.s32.totalorder %s10433_s19, %s7047_s11 }
 0x2cf   : > { %10631 = vst [vmem:[#allocation10_spill] sm:$0xff] %v9528_v35 }
 0x2d0   : > { %v9530_v17 = vpop.permute.xlu1 %4207  ;;  %p7049_p13 = pnand %p7048_p12, %p7215_p4 }
 0x2d1   : > { %10632 = vst [vmem:[#allocation20_spill] sm:$0xff] %v9530_v17 }
 0x2d2   : > { %p7050_p0 = pneg %p7049_p13 }
 0x2dc   : > { %v4310_v14 = vpop.permute.xlu0 %4309 }
 0x2dd   : > { %v4403_v12 = vmul.f32 %v4310_v14, %v9160_v60 }
 0x2de   : > { %v4312_v1 = vpop.permute.xlu1 %4311 }
 0x2df   : > { %4469 = vrot.lane.b32.xlu0 %v4403_v12, %s7133_s27  ;;  %v4404_v6 = vmul.f32 %v4312_v1, %v9174_v61 }
 0x2e0   : > { %v4306_v53 = vpop.permute.xlu0 %4305 }
 0x2e1   : > { %v4401_v58 = vmul.f32 %v4306_v53, %v9180_v10  ;;  %4471 = vrot.lane.b32.xlu1 %v4404_v6, %s7133_s27 }
 0x2e2   : > { %v4308_v4 = vpop.permute.xlu1 %4307 }
 0x2e3   : > { %4465 = vrot.lane.b32.xlu0 %v4401_v58, %s7133_s27  ;;  %v4402_v37 = vmul.f32 %v4308_v4, %v9192_v16 }
 0x2e4   : > { %v4318_v17 = vpop.permute.xlu0 %4317 }
 0x2e5   : > { %4467 = vrot.lane.b32.xlu1 %v4402_v37, %s7133_s27  ;;  %v4407_v14 = vmul.f32 %v4318_v17, %v9204_v21 }
 0x2e6   : > { %v4320_v35 = vpop.permute.xlu1 %4319 }
 0x2e7   : > { %v4408_v12 = vmul.f32 %v4320_v35, %v9208_v45  ;;  %4477 = vrot.lane.b32.xlu0 %v4407_v14, %s7133_s27 }
 0x2e8   : > { %v4314_v1 = vpop.permute.xlu0 %4313 }
 0x2e9   : > { %4479 = vrot.lane.b32.xlu1 %v4408_v12, %s7133_s27  ;;  %v4405_v53 = vmul.f32 %v4314_v1, %v9226_v52 }
 0x2ea   : > { %v4316_v6 = vpop.permute.xlu1 %4315 }
 0x2eb   : > { %v4406_v58 = vmul.f32 %v4316_v6, %v9230_v48  ;;  %4473 = vrot.lane.b32.xlu0 %v4405_v53, %s7133_s27 }
 0x2ec   : > { %v4326_v4 = vpop.permute.xlu0 %4325 }
 0x2ed   : > { %4475 = vrot.lane.b32.xlu1 %v4406_v58, %s7133_s27  ;;  %v4411_v37 = vmul.f32 %v4326_v4, %v9238_v30 }
 0x2ee   : > { %v4328_v17 = vpop.permute.xlu1 %4327 }
 0x2ef   : > { %v4412_v35 = vmul.f32 %v4328_v17, %v9242_v56  ;;  %4485 = vrot.lane.b32.xlu0 %v4411_v37, %s7133_s27 }
 0x2f0   : > { %v4322_v14 = vpop.permute.xlu0 %4321 }
 0x2f1   : > { %4487 = vrot.lane.b32.xlu1 %v4412_v35, %s7133_s27  ;;  %v4409_v12 = vmul.f32 %v4322_v14, %v9260_v62 }
 0x2f2   : > { %v4324_v1 = vpop.permute.xlu1 %4323 }
 0x2f3   : > { %v4410_v6 = vmul.f32 %v4324_v1, %v9264_v46  ;;  %4481 = vrot.lane.b32.xlu0 %v4409_v12, %s7133_s27 }
 0x2f4   : > { %v4334_v53 = vpop.permute.xlu0 %4333 }
 0x2f5   : > { %4483 = vrot.lane.b32.xlu1 %v4410_v6, %s7133_s27  ;;  %v4415_v58 = vmul.f32 %v4334_v53, %v9272_v36 }
 0x2f6   : > { %v4336_v4 = vpop.permute.xlu1 %4335 }
 0x2f7   : > { %v4416_v17 = vmul.f32 %v4336_v4, %v9278_v0  ;;  %4493 = vrot.lane.b32.xlu0 %v4415_v58, %s7133_s27 }
 0x2f8   : > { %v4330_v37 = vpop.permute.xlu0 %4329 }
 0x2f9   : > { %4495 = vrot.lane.b32.xlu1 %v4416_v17, %s7133_s27  ;;  %v4413_v35 = vmul.f32 %v4330_v37, %v9288_v50 }
 0x2fa   : > { %v4332_v14 = vpop.permute.xlu1 %4331 }
 0x2fb   : > { %v4414_v1 = vmul.f32 %v4332_v14, %v9294_v57  ;;  %4489 = vrot.lane.b32.xlu0 %v4413_v35, %s7133_s27 }
 0x2fd   : > { %4491 = vrot.lane.b32.xlu1 %v4414_v1, %s7133_s27 }
 0x321   : > { %v4342_v12 = vpop.permute.xlu0 %4341 }
 0x322   : > { %v4419_v6 = vmul.f32 %v4342_v12, %v9382_v34 }
 0x323   : > { %v4344_v53 = vpop.permute.xlu1 %4343 }
 0x324   : > { %4501 = vrot.lane.b32.xlu0 %v4419_v6, %s7133_s27  ;;  %v4420_v58 = vmul.f32 %v4344_v53, %v9399_v40 }
 0x325   : > { %v4338_v4 = vpop.permute.xlu0 %4337 }
 0x326   : > { %v4417_v17 = vmul.f32 %v4338_v4, %v9404_v15  ;;  %4503 = vrot.lane.b32.xlu1 %v4420_v58, %s7133_s27 }
 0x327   : > { %v4340_v37 = vpop.permute.xlu1 %4339 }
 0x328   : > { %4497 = vrot.lane.b32.xlu0 %v4417_v17, %s7133_s27  ;;  %v4418_v35 = vmul.f32 %v4340_v37, %v9418_v47 }
 0x32a   : > { %4499 = vrot.lane.b32.xlu1 %v4418_v35, %s7133_s27  ;;  %v4350_v14 = vpop.permute.xlu0 %4349 }
 0x32b   : > { %v4423_v1 = vmul.f32 %v4350_v14, %v9438_v51  ;;  %v4352_v12 = vpop.permute.xlu1 %4351 }
 0x32c   : > { %v4424_v6 = vmul.f32 %v4352_v12, %v9444_v19 }
 0x32d   : > { %4509 = vrot.lane.b32.xlu0 %v4423_v1, %s7133_s27 }
 0x32e   : > { %v4346_v53 = vpop.permute.xlu0 %4345  ;;  %4511 = vrot.lane.b32.xlu1 %v4424_v6, %s7133_s27 }
 0x32f   : > { %v4421_v58 = vmul.f32 %v4346_v53, %v9452_v38  ;;  %v4348_v4 = vpop.permute.xlu1 %4347 }
 0x330   : > { %v4422_v17 = vmul.f32 %v4348_v4, %v9456_v8 }
 0x331   : > { %4505 = vrot.lane.b32.xlu0 %v4421_v58, %s7133_s27 }
 0x332   : > { %v4358_v37 = vpop.permute.xlu0 %4357  ;;  %4507 = vrot.lane.b32.xlu1 %v4422_v17, %s7133_s27 }
 0x333   : > { %v4427_v35 = vmul.f32 %v4358_v37, %v9466_v3  ;;  %v4360_v14 = vpop.permute.xlu1 %4359 }
 0x334   : > { %v4428_v12 = vmul.f32 %v4360_v14, %v9470_v41 }
 0x335   : > { %4517 = vrot.lane.b32.xlu0 %v4427_v35, %s7133_s27 }
 0x336   : > { %v4354_v1 = vpop.permute.xlu0 %4353  ;;  %4519 = vrot.lane.b32.xlu1 %v4428_v12, %s7133_s27 }
 0x337   : > { %v4425_v6 = vmul.f32 %v4354_v1, %v9482_v23  ;;  %v4356_v53 = vpop.permute.xlu1 %4355 }
 0x338   : > { %v4426_v4 = vmul.f32 %v4356_v53, %v9486_v25 }
 0x339   : > { %4513 = vrot.lane.b32.xlu0 %v4425_v6, %s7133_s27  ;;  %v4243_v6 = vmul.f32 %v9282_v29, %v9160_v60  ;;  %v4242_v29 = vmul.f32 %v9274_v32, %v9192_v16 }
 0x33a   : > { %v4366_v58 = vpop.permute.xlu0 %4365  ;;  %4515 = vrot.lane.b32.xlu1 %v4426_v4, %s7133_s27 }
 0x33b   : > { %v4431_v17 = vmul.f32 %v4366_v58, %v9494_v18  ;;  %v4368_v37 = vpop.permute.xlu1 %4367 }
 0x33c   : > { %v4432_v14 = vmul.f32 %v4368_v37, %v9500_v27  ;;  %v4241_v37 = vmul.f32 %v9256_v44, %v9180_v10 }
 0x33d   : > { %4525 = vrot.lane.b32.xlu0 %v4431_v17, %s7133_s27  ;;  %v4244_v17 = vmul.f32 %v9290_v2, %v9174_v61 }
 0x33e   : > { %v4362_v35 = vpop.permute.xlu0 %4361  ;;  %4527 = vrot.lane.b32.xlu1 %v4432_v14, %s7133_s27 }
 0x33f   : > { %v4429_v12 = vmul.f32 %v4362_v35, %v9510_v33  ;;  %v4364_v1 = vpop.permute.xlu1 %4363 }
 0x340   : > { %v4430_v53 = vmul.f32 %v4364_v1, %v9516_v9 }
 0x341   : > { %4521 = vrot.lane.b32.xlu0 %v4429_v12, %s7133_s27 }
 0x342   : > { %4523 = vrot.lane.b32.xlu1 %v4430_v53, %s7133_s27  ;;  %v4247_v53 = vmul.f32 %v9312_v31, %v9204_v21  ;;  %v4246_v31 = vmul.f32 %v9308_v5, %v9230_v48 }
 0x351   : > { %v4470_v4 = vpop.permute.xlu0 %4469 }
 0x352   : > { %v9598_v58 = vadd.f32 %v4470_v4, %v4243_v6  ;;  %v4248_v6 = vmul.f32 %v9314_v54, %v9208_v45 }
 0x353   : > { %v4472_v14 = vpop.permute.xlu1 %4471 }
 0x354   : > { %4821 = vrot.lane.b32.xlu0 %v9598_v58, %s7135_s28  ;;  %v9606_v35 = vadd.f32 %v4472_v14, %v4244_v17  ;;  %6899 = vtanh.f32 %v9598_v58  ;;  %v4245_v14 = vmul.f32 %v9300_v22, %v9226_v52 }
 0x355   : > { %v4466_v12 = vpop.permute.xlu0 %4465 }
 0x356   : > { %v9608_v1 = vadd.f32 %v4466_v12, %v4241_v37  ;;  %4823 = vrot.lane.b32.xlu1 %v9606_v35, %s7135_s28  ;;  %6901 = vtanh.f32 %v9606_v35 }
 0x357   : > { %v4468_v2 = vpop.permute.xlu1 %4467 }
 0x358   : > { %4817 = vrot.lane.b32.xlu0 %v9608_v1, %s7135_s28  ;;  %v9616_v44 = vadd.f32 %v4468_v2, %v4242_v29  ;;  %6903 = vtanh.f32 %v9608_v1 }
 0x359   : > { %v4478_v32 = vpop.permute.xlu0 %4477 }
 0x35a   : > { %4819 = vrot.lane.b32.xlu1 %v9616_v44, %s7135_s28  ;;  %v9626_v4 = vadd.f32 %v4478_v32, %v4247_v53  ;;  %6905 = vtanh.f32 %v9616_v44 }
 0x35b   : > { %v4480_v17 = vpop.permute.xlu1 %4479 }
 0x35c   : > { %v9628_v37 = vadd.f32 %v4480_v17, %v4248_v6  ;;  %4829 = vrot.lane.b32.xlu0 %v9626_v4, %s7135_s28  ;;  %6907 = vtanh.f32 %v9626_v4 }
 0x35d   : > { %v4474_v54 = vpop.permute.xlu0 %4473 }
 0x35e   : > { %4831 = vrot.lane.b32.xlu1 %v9628_v37, %s7135_s28  ;;  %v9640_v12 = vadd.f32 %v4474_v54, %v4245_v14  ;;  %v6900_v22 = vpop.eup %6899  ;;  %v4251_v14 = vmul.f32 %v9343_v28, %v9238_v30  ;;  %6909 = vtanh.f32 %v9628_v37 }
 0x35f   : > { %v4476_v29 = vpop.permute.xlu1 %4475 }
 0x360   : > { %v9642_v2 = vadd.f32 %v4476_v29, %v4246_v31  ;;  %4825 = vrot.lane.b32.xlu0 %v9640_v12, %s7135_s28  ;;  %v6902_v5 = vpop.eup %6901  ;;  %v4252_v31 = vmul.f32 %v9352_v13, %v9242_v56  ;;  %v4250_v13 = vmul.f32 %v9328_v59, %v9264_v46  ;;  %6911 = vtanh.f32 %v9640_v12 }
 0x361   : > { %v4486_v53 = vpop.permute.xlu0 %4485 }
 0x362   : > { %4827 = vrot.lane.b32.xlu1 %v9642_v2, %s7135_s28  ;;  %v6904_v32 = vpop.eup %6903  ;;  %v9658_v54 = vadd.f32 %v4486_v53, %v4251_v14  ;;  %6913 = vtanh.f32 %v9642_v2 }
 0x363   : > { %v4488_v6 = vpop.permute.xlu1 %4487 }
 0x364   : > { %4661 = vrot.lane.b32.xlu0 %v6900_v22, %s7133_s27  ;;  %v6906_v17 = vpop.eup %6905  ;;  %v9660_v29 = vadd.f32 %v4488_v6, %v4252_v31  ;;  %6915 = vtanh.f32 %v9658_v54 }
 0x365   : > { %v4482_v22 = vpop.permute.xlu0 %4481 }
 0x366   : > { %4663 = vrot.lane.b32.xlu1 %v6902_v5, %s7133_s27  ;;  %v4249_v5 = vmul.f32 %v9320_v55, %v9260_v62  ;;  %v6908_v55 = vpop.eup %6907  ;;  %6917 = vtanh.f32 %v9660_v29 }
 0x367   : > { %v4484_v28 = vpop.permute.xlu1 %4483 }
 0x368   : > { %4657 = vrot.lane.b32.xlu0 %v6904_v32, %s7133_s27  ;;  %v9672_v53 = vadd.f32 %v4482_v22, %v4249_v5  ;;  %v9674_v6 = vadd.f32 %v4484_v28, %v4250_v13  ;;  %v6910_v32 = vpop.eup %6909  ;;  %v4255_v22 = vmul.f32 %v9375_v63, %v9272_v36  ;;  %v4256_v5 = vmul.f32 %v9388_v43, %v9278_v0 }
 0x369   : > { %v4494_v59 = vpop.permute.xlu0 %4493  ;;  %v4254_v43 = vmul.f32 %v9368_v7, %v9294_v57 }
 0x36a   : > { %4659 = vrot.lane.b32.xlu1 %v6906_v17, %s7133_s27  ;;  %v6912_v14 = vpop.eup %6911  ;;  %v9690_v28 = vadd.f32 %v4494_v59, %v4255_v22  ;;  %6919 = vtanh.f32 %v9672_v53  ;;  %v4259_v22 = vmul.f32 %v9422_v11, %v9382_v34 }
 0x36b   : > { %v4496_v17 = vpop.permute.xlu1 %4495  ;;  %6921 = vtanh.f32 %v9674_v6 }
 0x36c   : > { %4837 = vrot.lane.b32.xlu0 %v9658_v54, %s7135_s28  ;;  %v6914_v31 = vpop.eup %6913  ;;  %v9692_v13 = vadd.f32 %v4496_v17, %v4256_v5  ;;  %6923 = vtanh.f32 %v9690_v28 }
 0x36e   : > { %4839 = vrot.lane.b32.xlu1 %v9660_v29, %s7135_s28  ;;  %10633 = vst [vmem:[#allocation11_spill] sm:$0xff] %v9692_v13  ;;  %6925 = vtanh.f32 %v9692_v13 }
 0x36f   : > { %v4492_v63 = vpop.permute.xlu1 %4491 }
 0x370   : > { %4833 = vrot.lane.b32.xlu0 %v9672_v53, %s7135_s28  ;;  %v9706_v17 = vadd.f32 %v4492_v63, %v4254_v43  ;;  %v4257_v63 = vmul.f32 %v9394_v20, %v9404_v15 }
 0x372   : > { %4835 = vrot.lane.b32.xlu1 %v9674_v6, %s7135_s28  ;;  %10634 = vst [vmem:[#allocation21_spill] sm:$0xff] %v9706_v17 }
 0x374   : > { %4669 = vrot.lane.b32.xlu0 %v6908_v55, %s7133_s27  ;;  %v4490_v55 = vpop.permute.xlu0 %4489 }
 0x376   : > { %4671 = vrot.lane.b32.xlu1 %v6910_v32, %s7133_s27  ;;  %v4253_v32 = vmul.f32 %v9358_v26, %v9288_v50  ;;  %v6916_v26 = vpop.eup %6915 }
 0x378   : > { %4665 = vrot.lane.b32.xlu0 %v6912_v14, %s7133_s27  ;;  %v9704_v59 = vadd.f32 %v4490_v55, %v4253_v32  ;;  %v6918_v14 = vpop.eup %6917  ;;  %v4260_v32 = vmul.f32 %v9432_v39, %v9399_v40 }
 0x379   : > { %v6920_v7 = vpop.eup %6919 }
 0x37a   : > { %4667 = vrot.lane.b32.xlu1 %v6914_v31, %s7133_s27  ;;  %v6922_v31 = vpop.eup %6921  ;;  %6927 = vtanh.f32 %v9704_v59 }
 0x37b   : > { %6929 = vtanh.f32 %v9706_v17 }
 0x37c   : > { %4845 = vrot.lane.b32.xlu0 %v9690_v28, %s7135_s28 }
 0x37e   : > { %4847 = vrot.lane.b32.xlu1 %v9692_v13, %s7135_s28  ;;  %v10642_v13 = vld [vmem:[#allocation13_spill] sm:$0xff] }
 0x380   : > { %4841 = vrot.lane.b32.xlu0 %v9704_v59, %s7135_s28 }
 0x382   : > { %4843 = vrot.lane.b32.xlu1 %v9706_v17, %s7135_s28 }
 0x384   : > { %4677 = vrot.lane.b32.xlu0 %v6916_v26, %s7133_s27 }
 0x386   : > { %4679 = vrot.lane.b32.xlu1 %v6918_v14, %s7133_s27 }
 0x388   : > { %4673 = vrot.lane.b32.xlu0 %v6920_v7, %s7133_s27  ;;  %v4258_v7 = vmul.f32 %v9410_v42, %v9418_v47 }
 0x38a   : > { %4675 = vrot.lane.b32.xlu1 %v6922_v31, %s7133_s27  ;;  %v6924_v31 = vpop.eup %6923 }
 0x396   : > { %v4502_v5 = vpop.permute.xlu0 %4501 }
 0x397   : > { %v9719_v55 = vadd.f32 %v4502_v5, %v4259_v22  ;;  %v6926_v5 = vpop.eup %6925 }
 0x398   : > { %v4504_v43 = vpop.permute.xlu1 %4503  ;;  %v6928_v42 = vpop.eup %6927 }
 0x399   : > { %10635 = vst [vmem:[#allocation22_spill] sm:$0xff] %v9719_v55  ;;  %4853 = vrot.lane.b32.xlu0 %v9719_v55, %s7135_s28  ;;  %v9729_v11 = vadd.f32 %v4504_v43, %v4260_v32  ;;  %v10639_v32 = vld [vmem:[#allocation15_spill] sm:$0xff]  ;;  %6931 = vtanh.f32 %v9719_v55  ;;  %v10655_v55 = vld [vmem:[#allocation12_spill] sm:$0xff] }
 0x39a   : > { %v4498_v26 = vpop.permute.xlu0 %4497 }
 0x39b   : > { %10636 = vst [vmem:[#allocation23_spill] sm:$0xff] %v9729_v11  ;;  %v9731_v14 = vadd.f32 %v4498_v26, %v4257_v63  ;;  %4855 = vrot.lane.b32.xlu1 %v9729_v11, %s7135_s28  ;;  %v4263_v63 = vmul.f32 %v10639_v32, %v9438_v51  ;;  %v6930_v26 = vpop.eup %6929  ;;  %6933 = vtanh.f32 %v9729_v11  ;;  %v10647_v11 = vld [vmem:[#allocation9_spill] sm:$0xff] }
 0x39c   : > { %v4500_v39 = vpop.permute.xlu1 %4499 }
 0x39d   : > { %10637 = vst [vmem:[#allocation24_spill] sm:$0xff] %v9731_v14  ;;  %4849 = vrot.lane.b32.xlu0 %v9731_v14, %s7135_s28  ;;  %v9740_v20 = vadd.f32 %v4500_v39, %v4258_v7  ;;  %v10641_v39 = vld [vmem:[#allocation17_spill] sm:$0xff]  ;;  %6935 = vtanh.f32 %v9731_v14 }
 0x39e   : > { %v4264_v17 = vmul.f32 %v10641_v39, %v9444_v19 }
 0x39f   : > { %10638 = vst [vmem:[#allocation25_spill] sm:$0xff] %v9740_v20  ;;  %4851 = vrot.lane.b32.xlu1 %v9740_v20, %s7135_s28  ;;  %v4510_v22 = vpop.permute.xlu0 %4509  ;;  %6937 = vtanh.f32 %v9740_v20  ;;  %v4268_v20 = vmul.f32 %v9522_v49, %v9470_v41  ;;  %v10650_v49 = vld [vmem:[#allocation18_spill] sm:$0xff] }
 0x3a0   : > { %v4512_v43 = vpop.permute.xlu1 %4511  ;;  %v9750_v7 = vadd.f32 %v4510_v22, %v4263_v63  ;;  %v10645_v63 = vld [vmem:[#allocation14_spill] sm:$0xff] }
 0x3a1   : > { %4685 = vrot.lane.b32.xlu0 %v6924_v31, %s7133_s27  ;;  %v4262_v39 = vmul.f32 %v10645_v63, %v9456_v8 }
 0x3a2   : > { %10640 = vst [vmem:[#allocation15_spill] sm:$0xff] %v9750_v7  ;;  %6939 = vtanh.f32 %v9750_v7 }
 0x3a3   : > { %4687 = vrot.lane.b32.xlu1 %v6926_v5, %s7133_s27  ;;  %v4506_v31 = vpop.permute.xlu0 %4505  ;;  %v4261_v5 = vmul.f32 %v10642_v13, %v9452_v38 }
 0x3a4   : > { %v4508_v32 = vpop.permute.xlu1 %4507 }
 0x3a5   : > { %4681 = vrot.lane.b32.xlu0 %v6928_v42, %s7133_s27  ;;  %v9761_v42 = vadd.f32 %v4512_v43, %v4264_v17  ;;  %v9763_v22 = vadd.f32 %v4506_v31, %v4261_v5  ;;  %v9772_v13 = vadd.f32 %v4508_v32, %v4262_v39  ;;  %v4267_v5 = vmul.f32 %v9512_v24, %v9466_v3 }
 0x3a7   : > { %4683 = vrot.lane.b32.xlu1 %v6930_v26, %s7133_s27  ;;  %10643 = vst [vmem:[#allocation17_spill] sm:$0xff] %v9761_v42  ;;  %10644 = vst [vmem:[#allocation13_spill] sm:$0xff] %v9763_v22  ;;  %v6932_v26 = vpop.eup %6931  ;;  %v4518_v17 = vpop.permute.xlu0 %4517  ;;  %6941 = vtanh.f32 %v9761_v42 }
 0x3a8   : > { %10646 = vst [vmem:[#allocation14_spill] sm:$0xff] %v9772_v13  ;;  %v6934_v43 = vpop.eup %6933  ;;  %v4520_v63 = vpop.permute.xlu1 %4519  ;;  %v9782_v39 = vadd.f32 %v4518_v17, %v4267_v5  ;;  %6943 = vtanh.f32 %v9763_v22  ;;  %v4266_v5 = vmul.f32 %v10650_v49, %v9486_v25  ;;  %v10652_v49 = vld [vmem:[#allocation10_spill] sm:$0xff] }
 0x3a9   : > { %4861 = vrot.lane.b32.xlu0 %v9750_v7, %s7135_s28  ;;  %v6936_v31 = vpop.eup %6935  ;;  %v9793_v24 = vadd.f32 %v4520_v63, %v4268_v20  ;;  %6945 = vtanh.f32 %v9772_v13  ;;  %v10654_v7 = vld [vmem:[#allocation20_spill] sm:$0xff] }
 0x3aa   : > { %v6938_v32 = vpop.eup %6937  ;;  %6947 = vtanh.f32 %v9782_v39  ;;  %v4272_v14 = vmul.f32 %v10654_v7, %v9500_v27 }
 0x3ab   : > { %4863 = vrot.lane.b32.xlu1 %v9761_v42, %s7135_s28  ;;  %10648 = vst [vmem:[#allocation9_spill] sm:$0xff] %v9793_v24  ;;  %6949 = vtanh.f32 %v9793_v24 }
 0x3ac   : > { %v6940_v42 = vpop.eup %6939 }
 0x3ad   : > { %4857 = vrot.lane.b32.xlu0 %v9763_v22, %s7135_s28 }
 0x3af   : > { %4859 = vrot.lane.b32.xlu1 %v9772_v13, %s7135_s28  ;;  %v4271_v13 = vmul.f32 %v10652_v49, %v9494_v18 }
 0x3b1   : > { %4693 = vrot.lane.b32.xlu0 %v6932_v26, %s7133_s27  ;;  %v4514_v26 = vpop.permute.xlu0 %4513  ;;  %v6942_v63 = vpop.eup %6941 }
 0x3b3   : > { %4695 = vrot.lane.b32.xlu1 %v6934_v43, %s7133_s27  ;;  %v4265_v43 = vmul.f32 %v10647_v11, %v9482_v23 }
 0x3b5   : > { %4689 = vrot.lane.b32.xlu0 %v6936_v31, %s7133_s27  ;;  %v9795_v17 = vadd.f32 %v4514_v26, %v4265_v43  ;;  %v4516_v31 = vpop.permute.xlu1 %4515  ;;  %v6944_v26 = vpop.eup %6943 }
 0x3b6   : > { %v9804_v11 = vadd.f32 %v4516_v31, %v4266_v5  ;;  %v6946_v31 = vpop.eup %6945 }
 0x3b7   : > { %4691 = vrot.lane.b32.xlu1 %v6938_v32, %s7133_s27  ;;  %10649 = vst [vmem:[#allocation26_spill] sm:$0xff] %v9795_v17  ;;  %v4526_v32 = vpop.permute.xlu0 %4525  ;;  %6951 = vtanh.f32 %v9795_v17 }
 0x3b8   : > { %10651 = vst [vmem:[#allocation18_spill] sm:$0xff] %v9804_v11  ;;  %v9814_v5 = vadd.f32 %v4526_v32, %v4271_v13  ;;  %6953 = vtanh.f32 %v9804_v11 }
 0x3b9   : > { %4869 = vrot.lane.b32.xlu0 %v9782_v39, %s7135_s28  ;;  %v4528_v20 = vpop.permute.xlu1 %4527 }
 0x3ba   : > { %10653 = vst [vmem:[#allocation10_spill] sm:$0xff] %v9814_v5  ;;  %v9826_v13 = vadd.f32 %v4528_v20, %v4272_v14  ;;  %6955 = vtanh.f32 %v9814_v5 }
 0x3bb   : > { %4871 = vrot.lane.b32.xlu1 %v9793_v24, %s7135_s28  ;;  %v4522_v43 = vpop.permute.xlu0 %4521 }
 0x3bc   : > { %10656 = vst [vmem:[#allocation20_spill] sm:$0xff] %v9826_v13  ;;  %6957 = vtanh.f32 %v9826_v13 }
 0x3bd   : > { %4865 = vrot.lane.b32.xlu0 %v9795_v17, %s7135_s28  ;;  %v4524_v22 = vpop.permute.xlu1 %4523 }
 0x3bf   : > { %4867 = vrot.lane.b32.xlu1 %v9804_v11, %s7135_s28 }
 0x3c1   : > { %4701 = vrot.lane.b32.xlu0 %v6940_v42, %s7133_s27 }
 0x3c3   : > { %4703 = vrot.lane.b32.xlu1 %v6942_v63, %s7133_s27  ;;  %v4269_v63 = vmul.f32 %v10655_v55, %v9510_v33 }
 0x3c5   : > { %4697 = vrot.lane.b32.xlu0 %v6944_v26, %s7133_s27  ;;  %v9828_v32 = vadd.f32 %v4522_v43, %v4269_v63  ;;  %v10658_v26 = vld [vmem:[#allocation19_spill] sm:$0xff]  ;;  %v6948_v43 = vpop.eup %6947 }
 0x3c6   : > { %v4822_v42 = vpop.permute.xlu0 %4821  ;;  %v4270_v49 = vmul.f32 %v10658_v26, %v9516_v9 }
 0x3c7   : > { %4699 = vrot.lane.b32.xlu1 %v6946_v31, %s7133_s27  ;;  %4916 = vst.msk [vmem:[#allocation3 + $0x10] sm:$0xff] %vm993_vm8, %v4822_v42  ;;  %10657 = vst [vmem:[#allocation12_spill] sm:$0xff] %v9828_v32  ;;  %6959 = vtanh.f32 %v9828_v32  ;;  %v6950_v31 = vpop.eup %6949 }
 0x3c8   : > { %v4824_v7 = vpop.permute.xlu1 %4823  ;;  %v9840_v14 = vadd.f32 %v4524_v22, %v4270_v49  ;;  %v6952_v63 = vpop.eup %6951 }
 0x3c9   : > { %4877 = vrot.lane.b32.xlu0 %v9814_v5, %s7135_s28  ;;  %4917 = vst.msk [vmem:[#allocation3 + $0x18] sm:$0xff] %vm993_vm8, %v4824_v7  ;;  %v6954_v7 = vpop.eup %6953 }
 0x3ca   : > { %v4818_v55 = vpop.permute.xlu0 %4817  ;;  %10659 = vst [vmem:[#allocation19_spill] sm:$0xff] %v9840_v14  ;;  %6961 = vtanh.f32 %v9840_v14  ;;  %v6956_v49 = vpop.eup %6955 }
 0x3cb   : > { %4879 = vrot.lane.b32.xlu1 %v9826_v13, %s7135_s28  ;;  %4914 = vst.msk [vmem:[#allocation3] sm:$0xff] %vm993_vm8, %v4818_v55 }
 0x3cc   : > { %v4820_v20 = vpop.permute.xlu1 %4819 }
 0x3cd   : > { %4873 = vrot.lane.b32.xlu0 %v9828_v32, %s7135_s28  ;;  %4915 = vst.msk [vmem:[#allocation3 + $0x8] sm:$0xff] %vm993_vm8, %v4820_v20  ;;  %v6958_v20 = vpop.eup %6957 }
 0x3ce   : > { %v4830_v42 = vpop.permute.xlu0 %4829 }
 0x3cf   : > { %4875 = vrot.lane.b32.xlu1 %v9840_v14, %s7135_s28  ;;  %4920 = vst.msk [vmem:[#allocation3 + $0x30] sm:$0xff] %vm993_vm8, %v4830_v42  ;;  %s7137_s28 = smov [#allocation4]  }
 0x3d0   : > { %v4832_v22 = vpop.permute.xlu1 %4831 }
 0x3d1   : > { %4709 = vrot.lane.b32.xlu0 %v6948_v43, %s7133_s27  ;;  %4921 = vst.msk [vmem:[#allocation3 + $0x38] sm:$0xff] %vm993_vm8, %v4832_v22 }
 0x3d2   : > { %v4826_v26 = vpop.permute.xlu0 %4825 }
 0x3d3   : > { %4711 = vrot.lane.b32.xlu1 %v6950_v31, %s7133_s27  ;;  %4918 = vst.msk [vmem:[#allocation3 + $0x20] sm:$0xff] %vm993_vm8, %v4826_v26  ;;  %v6960_v31 = vpop.eup %6959 }
 0x3d4   : > { %v4828_v55 = vpop.permute.xlu1 %4827  ;;  %v6962_v22 = vpop.eup %6961 }
 0x3d5   : > { %4705 = vrot.lane.b32.xlu0 %v6952_v63, %s7133_s27  ;;  %4919 = vst.msk [vmem:[#allocation3 + $0x28] sm:$0xff] %vm993_vm8, %v4828_v55 }
 0x3d6   : > { %v4662_v43 = vpop.permute.xlu0 %4661 }
 0x3d7   : > { %4707 = vrot.lane.b32.xlu1 %v6954_v7, %s7133_s27  ;;  %v4755_v63 = vmul.f32 %v4662_v43, %v9160_v60 }
 0x3d8   : > { %v4664_v42 = vpop.permute.xlu1 %4663 }
 0x3d9   : > { %4717 = vrot.lane.b32.xlu0 %v6956_v49, %s7133_s27  ;;  %v4756_v7 = vmul.f32 %v4664_v42, %v9174_v61  ;;  %v6404_v43 = vpack.c.bf16 %v4755_v63, %v4755_v63 }
 0x3da   : > { %v4658_v13 = vpop.permute.xlu0 %4657 }
 0x3db   : > { %4719 = vrot.lane.b32.xlu1 %v6958_v20, %s7133_s27  ;;  %v4753_v49 = vmul.f32 %v4658_v13, %v9180_v10  ;;  %v6405_v13 = vpack.c.bf16 %v4756_v7, %v4756_v7  ;;  %v5066_v14 = vshll.u32 %v6404_v43, 16 }
 0x3dc   : > { %v4660_v26 = vpop.permute.xlu1 %4659 }
 0x3dd   : > { %4713 = vrot.lane.b32.xlu0 %v6960_v31, %s7133_s27  ;;  %v4754_v20 = vmul.f32 %v4660_v26, %v9192_v16  ;;  %v6402_v61 = vpack.c.bf16 %v4753_v49, %v4753_v49  ;;  %v5063_v16 = vshrl.u32 %v6404_v43, 16 }
 0x3de   : > { %v4838_v55 = vpop.permute.xlu0 %4837 }
 0x3df   : > { %4715 = vrot.lane.b32.xlu1 %v6962_v22, %s7133_s27  ;;  %4924 = vst.msk [vmem:[#allocation3 + $0x50] sm:$0xff] %vm993_vm8, %v4838_v55  ;;  %v5046_v42 = vshrl.u32 %v6402_v61, 16  ;;  %v5071_v55 = vshrl.u32 %v6405_v13, 16  ;;  %v5049_v32 = vshll.u32 %v6402_v61, 16 }
 0x3e0   : > { %v4840_v60 = vpop.permute.xlu1 %4839 }
 0x3e1   : > { %5747 = vrot.lane.b32.xlu0 %v4755_v63, %s7136_s13  ;;  %4925 = vst.msk [vmem:[#allocation3 + $0x58] sm:$0xff] %vm993_vm8, %v4840_v60  ;;  %v6403_v60 = vpack.c.bf16 %v4754_v20, %v4754_v20 }
 0x3e2   : > { %v4834_v31 = vpop.permute.xlu0 %4833 }
 0x3e3   : > { %5749 = vrot.lane.b32.xlu1 %v4756_v7, %s7136_s13  ;;  %4922 = vst.msk [vmem:[#allocation3 + $0x40] sm:$0xff] %vm993_vm8, %v4834_v31  ;;  %v5048_v31 = vrot.slane %v5046_v42, 7  ;;  %v5073_v7 = vrot.slane %v5071_v55, 7 }
 0x3e4   : > { %v4836_v10 = vpop.permute.xlu1 %4835 }
 0x3e5   : > { %5743 = vrot.lane.b32.xlu0 %v4753_v49, %s7136_s13  ;;  %4923 = vst.msk [vmem:[#allocation3 + $0x48] sm:$0xff] %vm993_vm8, %v4836_v10  ;;  %v5065_v49 = vrot.slane %v5063_v16, 7  ;;  %v5051_v24 = vor.u32 %v5049_v32, %v5048_v31 }
 0x3e6   : > { %v4670_v22 = vpop.permute.xlu0 %4669 }
 0x3e7   : > { %5745 = vrot.lane.b32.xlu1 %v4754_v20, %s7136_s13  ;;  %v4759_v63 = vmul.f32 %v4670_v22, %v9204_v21  ;;  %v5068_v11 = vor.u32 %v5066_v14, %v5065_v49  ;;  %v5078_v20 = vrot.slane %v5073_v7, 4  ;;  %v5057_v14 = vshll.u32 %v6403_v60, 16 }
 0x3e8   : > { %v4672_v26 = vpop.permute.xlu1 %4671 }
 0x3e9   : > { %5584 = vrot.lane.b32.xlu0 %v6404_v43, %s7136_s13  ;;  %v5054_v43 = vshrl.u32 %v6403_v60, 16 }
 0x3ea   : > { %v4666_v5 = vpop.permute.xlu0 %4665 }
 0x3eb   : > { %5586 = vrot.lane.b32.xlu1 %v6405_v13, %s7136_s13  ;;  %v4757_v16 = vmul.f32 %v4666_v5, %v9226_v52  ;;  %v5074_v52 = vshll.u32 %v6405_v13, 16 }
 0x3ec   : > { %v4668_v10 = vpop.permute.xlu1 %4667 }
 0x3ed   : > { %5580 = vrot.lane.b32.xlu0 %v6402_v61, %s7136_s13  ;;  %v4758_v5 = vmul.f32 %v4668_v10, %v9230_v48 }
 0x3ee   : > { %v4846_v17 = vpop.permute.xlu0 %4845 }
 0x3ef   : > { %5582 = vrot.lane.b32.xlu1 %v6403_v60, %s7136_s13  ;;  %4928 = vst.msk [vmem:[#allocation3 + $0x70] sm:$0xff] %vm993_vm8, %v4846_v17  ;;  %v4760_v17 = vmul.f32 %v4672_v26, %v9208_v45  ;;  %v5069_v26 = vrot.slane %v5065_v49, 4 }
 0x3f0   : > { %v4848_v21 = vpop.permute.xlu1 %4847 }
 0x3f1   : > { %5755 = vrot.lane.b32.xlu0 %v4759_v63, %s7136_s13  ;;  %4929 = vst.msk [vmem:[#allocation3 + $0x78] sm:$0xff] %vm993_vm8, %v4848_v21  ;;  %v5076_v21 = vor.u32 %v5074_v52, %v5073_v7  ;;  %v6409_v10 = vpack.c.bf16 %v4760_v17, %v4760_v17 }
 0x3f2   : > { %v4842_v61 = vpop.permute.xlu0 %4841 }
 0x3f3   : > { %5323 = vrot.lane.b32.xlu1 %v5068_v11, %s7136_s13  ;;  %4926 = vst.msk [vmem:[#allocation3 + $0x60] sm:$0xff] %vm993_vm8, %v4842_v61  ;;  %v5056_v11 = vrot.slane %v5054_v43, 7  ;;  %v5077_v48 = vsel %vm7331_vm4, %v5069_v26, %v5076_v21 }
 0x3f4   : > { %v4844_v32 = vpop.permute.xlu1 %4843 }
 0x3f5   : > { %5317 = vrot.lane.b32.xlu0 %v5051_v24, %s7136_s13  ;;  %4927 = vst.msk [vmem:[#allocation3 + $0x68] sm:$0xff] %vm993_vm8, %v4844_v32  ;;  %v6408_v24 = vpack.c.bf16 %v4759_v63, %v4759_v63  ;;  %v5061_v22 = vrot.slane %v5056_v11, 4  ;;  %v5059_v55 = vor.u32 %v5057_v14, %v5056_v11  ;;  %v6406_v63 = vpack.c.bf16 %v4757_v16, %v4757_v16 }
 0x3f6   : > { %v4678_v42 = vpop.permute.xlu0 %4677 }
 0x3f7   : > { %5327 = vrot.lane.b32.xlu1 %v5078_v20, %s7136_s13  ;;  %v5052_v20 = vrot.slane %v5048_v31, 4  ;;  %v5097_v13 = vshrl.u32 %v6408_v24, 16  ;;  %v5080_v7 = vshrl.u32 %v6406_v63, 16  ;;  %v5105_v31 = vshrl.u32 %v6409_v10, 16 }
 0x3f8   : > { %v4680_v45 = vpop.permute.xlu1 %4679  ;;  %v4763_v52 = vmul.f32 %v4678_v42, %v9238_v30 }
 0x3f9   : > { %5751 = vrot.lane.b32.xlu0 %v4757_v16, %s7136_s13  ;;  %v5060_v60 = vsel %vm7331_vm4, %v5052_v20, %v5059_v55  ;;  %v5099_v49 = vrot.slane %v5097_v13, 7  ;;  %v6407_v16 = vpack.c.bf16 %v4758_v5, %v4758_v5  ;;  %v5082_v14 = vrot.slane %v5080_v7, 7 }
 0x3fa   : > { %v4674_v61 = vpop.permute.xlu0 %4673  ;;  %v5083_v55 = vshll.u32 %v6406_v63, 16 }
 0x3fb   : > { %5757 = vrot.lane.b32.xlu1 %v4760_v17, %s7136_s13  ;;  %v5107_v17 = vrot.slane %v5105_v31, 7  ;;  %v4761_v42 = vmul.f32 %v4674_v61, %v9260_v62  ;;  %v6412_v31 = vpack.c.bf16 %v4763_v52, %v4763_v52  ;;  %v5108_v62 = vshll.u32 %v6409_v10, 16 }
 0x3fc   : > { %v4676_v32 = vpop.permute.xlu1 %4675 }
 0x3fd   : > { %5592 = vrot.lane.b32.xlu0 %v6408_v24, %s7136_s13  ;;  %v4762_v61 = vmul.f32 %v4676_v32, %v9264_v46 }
 0x3ff   : > { %5753 = vrot.lane.b32.xlu1 %v4758_v5, %s7136_s13  ;;  %v5088_v5 = vshrl.u32 %v6407_v16, 16 }
 0x401   : > { %5321 = vrot.lane.b32.xlu0 %v5061_v22, %s7136_s13  ;;  %v5100_v22 = vshll.u32 %v6408_v24, 16  ;;  %v5112_v24 = vrot.slane %v5107_v17, 4  ;;  %v5090_v7 = vrot.slane %v5088_v5, 7 }
 0x403   : > { %5319 = vrot.lane.b32.xlu1 %v5060_v60, %s7136_s13  ;;  %v5102_v20 = vor.u32 %v5100_v22, %v5099_v49  ;;  %v5085_v60 = vor.u32 %v5083_v55, %v5082_v14  ;;  %v5091_v22 = vshll.u32 %v6407_v16, 16 }
 0x405   : > { %5325 = vrot.lane.b32.xlu0 %v5077_v48, %s7136_s13  ;;  %v4764_v48 = vmul.f32 %v4680_v45, %v9242_v56  ;;  %v5110_v56 = vor.u32 %v5108_v62, %v5107_v17  ;;  %v5086_v45 = vrot.slane %v5082_v14, 4  ;;  %v5131_v17 = vshrl.u32 %v6412_v31, 16 }
 0x407   : > { %5594 = vrot.lane.b32.xlu1 %v6409_v10, %s7136_s13  ;;  %v6413_v14 = vpack.c.bf16 %v4764_v48, %v4764_v48  ;;  %v5133_v5 = vrot.slane %v5131_v17, 7 }
 0x409   : > { %5588 = vrot.lane.b32.xlu0 %v6406_v63, %s7136_s13 }
 0x40b   : > { %v4854_v11 = vpop.permute.xlu0 %4853  ;;  %5590 = vrot.lane.b32.xlu1 %v6407_v16, %s7136_s13  ;;  %v5103_v16 = vrot.slane %v5099_v49, 4 }
 0x40c   : > { %4932 = vst.msk [vmem:[#allocation3 + $0x90] sm:$0xff] %vm993_vm8, %v4854_v11 }
 0x40d   : > { %5763 = vrot.lane.b32.xlu0 %v4763_v52, %s7136_s13  ;;  %v4856_v21 = vpop.permute.xlu1 %4855  ;;  %v5111_v32 = vsel %vm7331_vm4, %v5103_v16, %v5110_v56 }
 0x40e   : > { %4933 = vst.msk [vmem:[#allocation3 + $0x98] sm:$0xff] %vm993_vm8, %v4856_v21 }
 0x40f   : > { %v4850_v26 = vpop.permute.xlu0 %4849  ;;  %5335 = vrot.lane.b32.xlu1 %v5102_v20, %s7136_s13  ;;  %v5095_v20 = vrot.slane %v5090_v7, 4 }
 0x410   : > { %4930 = vst.msk [vmem:[#allocation3 + $0x80] sm:$0xff] %vm993_vm8, %v4850_v26  ;;  %v5093_v26 = vor.u32 %v5091_v22, %v5090_v7  ;;  %v6411_v7 = vpack.c.bf16 %v4762_v61, %v4762_v61 }
 0x411   : > { %5329 = vrot.lane.b32.xlu0 %v5085_v60, %s7136_s13  ;;  %v4852_v30 = vpop.permute.xlu1 %4851  ;;  %v6410_v60 = vpack.c.bf16 %v4761_v42, %v4761_v42 }
 0x412   : > { %4931 = vst.msk [vmem:[#allocation3 + $0x88] sm:$0xff] %vm993_vm8, %v4852_v30  ;;  %v5094_v46 = vsel %vm7331_vm4, %v5086_v45, %v5093_v26 }
 0x413   : > { %v4686_v63 = vpop.permute.xlu0 %4685  ;;  %5339 = vrot.lane.b32.xlu1 %v5112_v24, %s7136_s13  ;;  %v5114_v49 = vshrl.u32 %v6410_v60, 16  ;;  %v5117_v26 = vshll.u32 %v6410_v60, 16 }
 0x415   : > { %5759 = vrot.lane.b32.xlu0 %v4761_v42, %s7136_s13  ;;  %v9914_v13 = vpop.permute.xlu1 %4687  ;;  %v5139_v42 = vshrl.u32 %v6413_v14, 16  ;;  %v5116_v62 = vrot.slane %v5114_v49, 7 }
 0x417   : > { %v4682_v11 = vpop.permute.xlu0 %4681  ;;  %5765 = vrot.lane.b32.xlu1 %v4764_v48, %s7136_s13  ;;  %v5134_v48 = vshll.u32 %v6412_v31, 16  ;;  %v5141_v56 = vrot.slane %v5139_v42, 7 }
 0x419   : > { %5600 = vrot.lane.b32.xlu0 %v6412_v31, %s7136_s13  ;;  %v9919_v55 = vpop.permute.xlu1 %4683  ;;  %v5122_v31 = vshrl.u32 %v6411_v7, 16 }
 0x41a   : > { %v4766_v42 = vmul.f32 %v9919_v55, %v9294_v57 }
 0x41b   : > { %v4862_v21 = vpop.permute.xlu0 %4861  ;;  %5761 = vrot.lane.b32.xlu1 %v4762_v61, %s7136_s13  ;;  %v4765_v61 = vmul.f32 %v4682_v11, %v9288_v50  ;;  %v5124_v17 = vrot.slane %v5122_v31, 7  ;;  %v5125_v50 = vshll.u32 %v6411_v7, 16  ;;  %v5142_v11 = vshll.u32 %v6413_v14, 16 }
 0x41c   : > { %4936 = vst.msk [vmem:[#allocation3 + $0xb0] sm:$0xff] %vm993_vm8, %v4862_v21  ;;  %v4767_v21 = vmul.f32 %v4686_v63, %v9272_v36  ;;  %v5146_v63 = vrot.slane %v5141_v56, 4 }
 0x41d   : > { %5333 = vrot.lane.b32.xlu0 %v5095_v20, %s7136_s13  ;;  %v4864_v52 = vpop.permute.xlu1 %4863 }
 0x41e   : > { %4937 = vst.msk [vmem:[#allocation3 + $0xb8] sm:$0xff] %vm993_vm8, %v4864_v52  ;;  %v5136_v52 = vor.u32 %v5134_v48, %v5133_v5 }
 0x41f   : > { %v4858_v10 = vpop.permute.xlu0 %4857  ;;  %5331 = vrot.lane.b32.xlu1 %v5094_v46, %s7136_s13  ;;  %v4768_v46 = vmul.f32 %v9914_v13, %v9278_v0  ;;  %v5129_v13 = vrot.slane %v5124_v17, 4 }
 0x420   : > { %4934 = vst.msk [vmem:[#allocation3 + $0xa0] sm:$0xff] %vm993_vm8, %v4858_v10  ;;  %v5119_v10 = vor.u32 %v5117_v26, %v5116_v62  ;;  %v6414_v26 = vpack.c.bf16 %v4765_v61, %v4765_v61 }
 0x421   : > { %5337 = vrot.lane.b32.xlu0 %v5111_v32, %s7136_s13  ;;  %v4860_v30 = vpop.permute.xlu1 %4859 }
 0x422   : > { %4935 = vst.msk [vmem:[#allocation3 + $0xa8] sm:$0xff] %vm993_vm8, %v4860_v30  ;;  %v6416_v30 = vpack.c.bf16 %v4767_v21, %v4767_v21 }
 0x423   : > { %v9933_v24 = vpop.permute.xlu0 %4693  ;;  %5602 = vrot.lane.b32.xlu1 %v6413_v14, %s7136_s13  ;;  %v5148_v14 = vshrl.u32 %v6414_v26, 16 }
 0x425   : > { %5596 = vrot.lane.b32.xlu0 %v6410_v60, %s7136_s13  ;;  %v9937_v22 = vpop.permute.xlu1 %4695  ;;  %v5150_v31 = vrot.slane %v5148_v14, 7 }
 0x427   : > { %v9940_v20 = vpop.permute.xlu0 %4689  ;;  %5598 = vrot.lane.b32.xlu1 %v6411_v7, %s7136_s13 }
 0x429   : > { %5771 = vrot.lane.b32.xlu0 %v4767_v21, %s7136_s13  ;;  %v9944_v45 = vpop.permute.xlu1 %4691  ;;  %v5127_v21 = vor.u32 %v5125_v50, %v5124_v17  ;;  %v6415_v17 = vpack.c.bf16 %v4766_v42, %v4766_v42 }
 0x42b   : > { %v4870_v16 = vpop.permute.xlu0 %4869  ;;  %5347 = vrot.lane.b32.xlu1 %v5136_v52, %s7136_s13  ;;  %v5144_v52 = vor.u32 %v5142_v11, %v5141_v56  ;;  %v5165_v56 = vshrl.u32 %v6416_v30, 16 }
 0x42c   : > { %4940 = vst.msk [vmem:[#allocation3 + $0xd0] sm:$0xff] %vm993_vm8, %v4870_v16  ;;  %v5120_v16 = vrot.slane %v5116_v62, 4 }
 0x42d   : > { %5341 = vrot.lane.b32.xlu0 %v5119_v10, %s7136_s13  ;;  %v4872_v36 = vpop.permute.xlu1 %4871  ;;  %v5137_v10 = vrot.slane %v5133_v5, 4 }
 0x42e   : > { %4941 = vst.msk [vmem:[#allocation3 + $0xd8] sm:$0xff] %vm993_vm8, %v4872_v36  ;;  %v5128_v57 = vsel %vm7331_vm4, %v5120_v16, %v5127_v21 }
 0x42f   : > { %v4866_v60 = vpop.permute.xlu0 %4865  ;;  %5351 = vrot.lane.b32.xlu1 %v5146_v63, %s7136_s13  ;;  %v5145_v55 = vsel %vm7331_vm4, %v5137_v10, %v5144_v52  ;;  %v6417_v63 = vpack.c.bf16 %v4768_v46, %v4768_v46  ;;  %v5156_v10 = vshrl.u32 %v6415_v17, 16 }
 0x430   : > { %4938 = vst.msk [vmem:[#allocation3 + $0xc0] sm:$0xff] %vm993_vm8, %v4866_v60  ;;  %v5167_v60 = vrot.slane %v5165_v56, 7  ;;  %v5159_v56 = vshll.u32 %v6415_v17, 16 }
 0x431   : > { %5767 = vrot.lane.b32.xlu0 %v4765_v61, %s7136_s13  ;;  %v4868_v32 = vpop.permute.xlu1 %4867  ;;  %v5151_v61 = vshll.u32 %v6414_v26, 16 }
 0x432   : > { %4939 = vst.msk [vmem:[#allocation3 + $0xc8] sm:$0xff] %vm993_vm8, %v4868_v32  ;;  %v5173_v32 = vshrl.u32 %v6417_v63, 16 }
 0x433   : > { %v9957_v49 = vpop.permute.xlu0 %4701  ;;  %5773 = vrot.lane.b32.xlu1 %v4768_v46, %s7136_s13  ;;  %v5153_v46 = vor.u32 %v5151_v61, %v5150_v31 }
 0x434   : > { %v5175_v21 = vrot.slane %v5173_v32, 7 }
 0x435   : > { %5608 = vrot.lane.b32.xlu0 %v6416_v30, %s7136_s13  ;;  %v9963_v48 = vpop.permute.xlu1 %4703 }
 0x437   : > { %v9965_v0 = vpop.permute.xlu0 %4697  ;;  %5769 = vrot.lane.b32.xlu1 %v4766_v42, %s7136_s13 }
 0x439   : > { %5345 = vrot.lane.b32.xlu0 %v5129_v13, %s7136_s13  ;;  %v9969_v7 = vpop.permute.xlu1 %4699  ;;  %v5168_v13 = vshll.u32 %v6416_v30, 16  ;;  %v5180_v30 = vrot.slane %v5175_v21, 4 }
 0x43b   : > { %v4878_v36 = vpop.permute.xlu0 %4877  ;;  %5343 = vrot.lane.b32.xlu1 %v5128_v57, %s7136_s13  ;;  %v5170_v16 = vor.u32 %v5168_v13, %v5167_v60  ;;  %v4769_v57 = vmul.f32 %v9940_v20, %v9404_v15  ;;  %v5154_v20 = vrot.slane %v5150_v31, 4 }
 0x43c   : > { %4944 = vst.msk [vmem:[#allocation3 + $0xf0] sm:$0xff] %vm993_vm8, %v4878_v36  ;;  %v5158_v36 = vrot.slane %v5156_v10, 7 }
 0x43d   : > { %5349 = vrot.lane.b32.xlu0 %v5145_v55, %s7136_s13  ;;  %v4880_v62 = vpop.permute.xlu1 %4879 }
 0x43e   : > { %4945 = vst.msk [vmem:[#allocation3 + $0xf8] sm:$0xff] %vm993_vm8, %v4880_v62  ;;  %v5163_v61 = vrot.slane %v5158_v36, 4  ;;  %v5161_v32 = vor.u32 %v5159_v56, %v5158_v36 }
 0x43f   : > { %v4874_v5 = vpop.permute.xlu0 %4873  ;;  %5610 = vrot.lane.b32.xlu1 %v6417_v63, %s7136_s13 }
 0x440   : > { %4942 = vst.msk [vmem:[#allocation3 + $0xe0] sm:$0xff] %vm993_vm8, %v4874_v5 }
 0x441   : > { %5604 = vrot.lane.b32.xlu0 %v6414_v26, %s7136_s13  ;;  %v4876_v50 = vpop.permute.xlu1 %4875  ;;  %v4771_v26 = vmul.f32 %v9933_v24, %v9382_v34  ;;  %v5176_v34 = vshll.u32 %v6417_v63, 16  ;;  %v4772_v24 = vmul.f32 %v9937_v22, %v9399_v40  ;;  %v5171_v40 = vrot.slane %v5167_v60, 4 }
 0x442   : > { %4943 = vst.msk [vmem:[#allocation3 + $0xe8] sm:$0xff] %vm993_vm8, %v4876_v50  ;;  %v5162_v22 = vsel %vm7331_vm4, %v5154_v20, %v5161_v32 }
 0x443   : > { %v9983_v11 = vpop.permute.xlu0 %4709  ;;  %5606 = vrot.lane.b32.xlu1 %v6415_v17, %s7136_s13  ;;  %v5178_v15 = vor.u32 %v5176_v34, %v5175_v21  ;;  %v6420_v60 = vpack.c.bf16 %v4771_v26, %v4771_v26  ;;  %v6418_v21 = vpack.c.bf16 %v4769_v57, %v4769_v57 }
 0x445   : > { %5353 = vrot.lane.b32.xlu0 %v5153_v46, %s7136_s13  ;;  %v9987_v52 = vpop.permute.xlu1 %4711  ;;  %v5179_v50 = vsel %vm7331_vm4, %v5171_v40, %v5178_v15  ;;  %v4770_v46 = vmul.f32 %v9944_v45, %v9418_v47  ;;  %v5199_v47 = vshrl.u32 %v6420_v60, 16  ;;  %v10044_v45 = vpack.c.bf16 %v4772_v24, %v4772_v24 }
 0x446   : > { %v5202_v32 = vshll.u32 %v6420_v60, 16  ;;  %v5185_v15 = vshll.u32 %v6418_v21, 16 }
 0x447   : > { %v9991_v42 = vpop.permute.xlu0 %4705  ;;  %5359 = vrot.lane.b32.xlu1 %v5170_v16, %s7136_s13 }
 0x449   : > { %5779 = vrot.lane.b32.xlu0 %v4771_v26, %s7136_s13  ;;  %v9995_v14 = vpop.permute.xlu1 %4707 }
 0x44b   : > { %v9999_v55 = vpop.permute.xlu0 %4717  ;;  %5363 = vrot.lane.b32.xlu1 %v5180_v30, %s7136_s13  ;;  %v5182_v30 = vshrl.u32 %v6418_v21, 16 }
 0x44d   : > { %5775 = vrot.lane.b32.xlu0 %v4769_v57, %s7136_s13  ;;  %v10005_v62 = vpop.permute.xlu1 %4719  ;;  %v6419_v57 = vpack.c.bf16 %v4770_v46, %v4770_v46  ;;  %v10060_v34 = vrot.slane %v5182_v30, 7 }
 0x44f   : > { %v10007_v5 = vpop.permute.xlu0 %4713  ;;  %5781 = vrot.lane.b32.xlu1 %v4772_v24, %s7136_s13  ;;  %v4775_v24 = vmul.f32 %v9957_v49, %v9438_v51  ;;  %v5187_v51 = vor.u32 %v5185_v15, %v10060_v34 }
 0x451   : > { %5357 = vrot.lane.b32.xlu0 %v5163_v61, %s7136_s13  ;;  %v10011_v17 = vpop.permute.xlu1 %4715 }
 0x453   : > { %v5748_v63 = vpop.permute.xlu0 %5747  ;;  %5355 = vrot.lane.b32.xlu1 %v5162_v22, %s7136_s13 }
 0x454   : > { %v5841_v31 = vsel %vm993_vm8, %v5748_v63, %v9598_v58 }
 0x455   : > { %5874 = vst.msk [vmem:[%s10017_s30 + $0x10] sm:$0xff] %vm5871_vm11, %v5841_v31  ;;  %5361 = vrot.lane.b32.xlu0 %v5179_v50, %s7136_s13  ;;  %v5750_v13 = vpop.permute.xlu1 %5749  ;;  %v5475_v31 = vld [vmem:[#allocation2 + $0x18] sm:$0xf]  ;;  %v5465_v50 = vld [vmem:[#allocation2 + $0xc] sm:$0xf] }
 0x456   : > { %v5842_v16 = vsel %vm993_vm8, %v5750_v13, %v9606_v35  ;;  %v5190_v13 = vshrl.u32 %v6419_v57, 16 }
 0x457   : > { %v5744_v58 = vpop.permute.xlu0 %5743  ;;  %5875 = vst.msk [vmem:[%s10017_s30 + $0x18] sm:$0xff] %vm5871_vm11, %v5842_v16  ;;  %5777 = vrot.lane.b32.xlu1 %v4770_v46, %s7136_s13 }
 0x458   : > { %v5839_v10 = vsel %vm993_vm8, %v5744_v58, %v9608_v1  ;;  %v10057_v1 = vrot.slane %v5199_v47, 7  ;;  %v5479_v47 = vld [vmem:[#allocation2 + $0x20] sm:$0x1] }
 0x459   : > { %5872 = vst.msk [vmem:[%s10017_s30] sm:$0xff] %vm5871_vm11, %v5839_v10  ;;  %5616 = vrot.lane.b32.xlu0 %v6420_v60, %s7136_s13  ;;  %v5746_v26 = vpop.permute.xlu1 %5745 }
 0x45a   : > { %v5840_v35 = vsel %vm993_vm8, %v5746_v26, %v9616_v44  ;;  %v5207_v44 = vshrl.u32 %v10044_v45, 16  ;;  %v5204_v22 = vor.u32 %v5202_v32, %v10057_v1  ;;  %v4776_v26 = vmul.f32 %v9963_v48, %v9444_v19 }
 0x45b   : > { %v5585_v36 = vpop.permute.xlu0 %5584  ;;  %5873 = vst.msk [vmem:[%s10017_s30 + $0x8] sm:$0xff] %vm5871_vm11, %v5840_v35  ;;  %5618 = vrot.lane.b32.xlu1 %v10044_v45, %s7136_s13  ;;  %v5210_v19 = vshll.u32 %v10044_v45, 16  ;;  %v4774_v48 = vmul.f32 %v9969_v7, %v9456_v8  ;;  %v5188_v45 = vrot.slane %v10060_v34, 4  ;;  %v5472_v8 = vld [vmem:[#allocation2 + $0x14] sm:$0x1] }
 0x45c   : > { %5678 = vst.msk [vmem:[%s10052_s16 + $0x8] sm:$0xf] %vm336_vm0, %v5585_v36  ;;  %v5209_v20 = vrot.slane %v5207_v44, 7 }
 0x45d   : > { %5612 = vrot.lane.b32.xlu0 %v6418_v21, %s7136_s13  ;;  %v5587_v56 = vpop.permute.xlu1 %5586  ;;  %v4773_v21 = vmul.f32 %v9965_v0, %v9452_v38  ;;  %v5192_v38 = vrot.slane %v5190_v13, 7  ;;  %v6424_v0 = vpack.c.bf16 %v4775_v24, %v4775_v24 }
 0x45e   : > { %5679 = vst.msk [vmem:[%s10052_s16 + $0xc] sm:$0xf] %vm336_vm0, %v5587_v56  ;;  %v5214_v46 = vrot.slane %v5209_v20, 4 }
 0x45f   : > { %v5581_v61 = vpop.permute.xlu0 %5580  ;;  %5614 = vrot.lane.b32.xlu1 %v6419_v57, %s7136_s13 }
 0x460   : > { %5676 = vst.msk [vmem:[%s10052_s16] sm:$0xf] %vm336_vm0, %v5581_v61  ;;  %v5193_v61 = vshll.u32 %v6419_v57, 16  ;;  %v5205_v57 = vrot.slane %v10057_v1, 4  ;;  %v5233_v1 = vshrl.u32 %v6424_v0, 16 }
 0x461   : > { %5787 = vrot.lane.b32.xlu0 %v4775_v24, %s7136_s13  ;;  %v5583_v40 = vpop.permute.xlu1 %5582 }
 0x462   : > { %5677 = vst.msk [vmem:[%s10052_s16 + $0x4] sm:$0xf] %vm336_vm0, %v5583_v40  ;;  %v5197_v40 = vrot.slane %v5192_v38, 4 }
 0x463   : > { %v5756_v63 = vpop.permute.xlu0 %5755  ;;  %5371 = vrot.lane.b32.xlu1 %v5204_v22, %s7136_s13  ;;  %v5195_v22 = vor.u32 %v5193_v61, %v5192_v38  ;;  %v5482_v61 = vld [vmem:[#allocation2 + $0x24] sm:$0xf] }
 0x464   : > { %v5845_v49 = vsel %vm993_vm8, %v5756_v63, %v9626_v4 }
 0x465   : > { %5878 = vst.msk [vmem:[%s10017_s30 + $0x30] sm:$0xff] %vm5871_vm11, %v5845_v49  ;;  %5365 = vrot.lane.b32.xlu0 %v5187_v51, %s7136_s13  ;;  %v5324_v60 = vpop.permute.xlu1 %5323  ;;  %v5196_v51 = vsel %vm7331_vm4, %v5188_v45, %v5195_v22  ;;  %v5493_v22 = vld [vmem:[#allocation2 + $0x38] sm:$0x1] }
 0x466   : > { %v5476_v58 = vsel %vm7338_vm5, %v5324_v60, %v5475_v31 }
 0x467   : > { %v5318_v10 = vpop.permute.xlu0 %5317  ;;  %5477 = vst [vmem:[#allocation2 + $0x18] sm:$0xf] %v5476_v58  ;;  %5375 = vrot.lane.b32.xlu1 %v5214_v46, %s7136_s13  ;;  %v10130_v46 = vrot.slane %v5233_v1, 7 }
 0x468   : > { %v5466_v4 = vsel %vm7338_vm5, %v5318_v10, %v5465_v50 }
 0x469   : > { %5467 = vst [vmem:[#allocation2 + $0xc] sm:$0xf] %v5466_v4  ;;  %5783 = vrot.lane.b32.xlu0 %v4773_v21, %s7136_s13  ;;  %v5328_v30 = vpop.permute.xlu1 %5327  ;;  %v4779_v4 = vmul.f32 %v9983_v11, %v9466_v3 }
 0x46a   : > { %v5480_v36 = vsel %vm7830_vm10, %v5328_v30, %v5479_v47 }
 0x46b   : > { %v5752_v44 = vpop.permute.xlu0 %5751  ;;  %5481 = vst [vmem:[#allocation2 + $0x20] sm:$0x1] %v5480_v36  ;;  %5789 = vrot.lane.b32.xlu1 %v4776_v26, %s7136_s13 }
 0x46c   : > { %v5843_v56 = vsel %vm993_vm8, %v5752_v44, %v9640_v12  ;;  %v5212_v12 = vor.u32 %v5210_v19, %v5209_v20 }
 0x46d   : > { %5876 = vst.msk [vmem:[%s10017_s30 + $0x20] sm:$0xff] %vm5871_vm11, %v5843_v56  ;;  %5624 = vrot.lane.b32.xlu0 %v6424_v0, %s7136_s13  ;;  %v5758_v24 = vpop.permute.xlu1 %5757 }
 0x46e   : > { %v5846_v32 = vsel %vm993_vm8, %v5758_v24, %v9628_v37  ;;  %v6422_v37 = vpack.c.bf16 %v4773_v21, %v4773_v21  ;;  %v5213_v34 = vsel %vm7331_vm4, %v5205_v57, %v5212_v12  ;;  %v6423_v21 = vpack.c.bf16 %v4774_v48, %v4774_v48 }
 0x46f   : > { %v5593_v15 = vpop.permute.xlu0 %5592  ;;  %5879 = vst.msk [vmem:[%s10017_s30 + $0x38] sm:$0xff] %vm5871_vm11, %v5846_v32  ;;  %5785 = vrot.lane.b32.xlu1 %v4774_v48, %s7136_s13  ;;  %v4777_v32 = vmul.f32 %v9991_v42, %v9482_v23  ;;  %v4780_v12 = vmul.f32 %v9987_v52, %v9470_v41  ;;  %v6428_v42 = vpack.c.bf16 %v4779_v4, %v4779_v4 }
 0x470   : > { %5682 = vst.msk [vmem:[%s10052_s16 + $0x18] sm:$0xf] %vm336_vm0, %v5593_v15  ;;  %v5216_v50 = vshrl.u32 %v6422_v37, 16  ;;  %v5219_v30 = vshll.u32 %v6422_v37, 16  ;;  %v5224_v24 = vshrl.u32 %v6423_v21, 16  ;;  %v4778_v52 = vmul.f32 %v9995_v14, %v9486_v25 }
 0x471   : > { %5369 = vrot.lane.b32.xlu0 %v5197_v40, %s7136_s13  ;;  %v5754_v7 = vpop.permute.xlu1 %5753  ;;  %v5486_v14 = vld [vmem:[#allocation2 + $0x2c] sm:$0x1] }
 0x472   : > { %v5844_v63 = vsel %vm993_vm8, %v5754_v7, %v9642_v2  ;;  %v10123_v2 = vpack.c.bf16 %v4776_v26, %v4776_v26  ;;  %v10133_v10 = vrot.slane %v5216_v50, 7  ;;  %v5236_v26 = vshll.u32 %v6424_v0, 16  ;;  %v5489_v0 = vld [vmem:[#allocation2 + $0x30] sm:$0xf] }
 0x473   : > { %v5322_v49 = vpop.permute.xlu0 %5321  ;;  %5877 = vst.msk [vmem:[%s10017_s30 + $0x28] sm:$0xff] %vm5871_vm11, %v5844_v63  ;;  %5367 = vrot.lane.b32.xlu1 %v5196_v51, %s7136_s13  ;;  %v5226_v23 = vrot.slane %v5224_v24, 7  ;;  %v6426_v51 = vpack.c.bf16 %v4777_v32, %v4777_v32  ;;  %v10214_v24 = vmul.f32 %v9999_v55, %v9494_v18 }
 0x474   : > { %v5473_v20 = vsel %vm7830_vm10, %v5322_v49, %v5472_v8  ;;  %v5241_v13 = vshrl.u32 %v10123_v2, 16  ;;  %v5238_v44 = vor.u32 %v5236_v26, %v10130_v46  ;;  %v5221_v3 = vor.u32 %v5219_v30, %v10133_v10 }
 0x475   : > { %5474 = vst [vmem:[#allocation2 + $0x14] sm:$0x1] %v5473_v20  ;;  %5373 = vrot.lane.b32.xlu0 %v5213_v34, %s7136_s13  ;;  %v5320_v31 = vpop.permute.xlu1 %5319  ;;  %v5244_v41 = vshll.u32 %v10123_v2, 16  ;;  %v5231_v34 = vrot.slane %v5226_v23, 4  ;;  %v5222_v25 = vrot.slane %v10133_v10, 4  ;;  %v5253_v26 = vshll.u32 %v6426_v51, 16 }
 0x476   : > { %5469 = vst.msk [vmem:[#allocation2 + $0x10] sm:$0xf] %vm336_vm0, %v5320_v31  ;;  %v5243_v38 = vrot.slane %v5241_v13, 7  ;;  %v5239_v31 = vrot.slane %v10130_v46, 4  ;;  %v5267_v46 = vshrl.u32 %v6428_v42, 16 }
 0x477   : > { %v5326_v60 = vpop.permute.xlu0 %5325  ;;  %5626 = vrot.lane.b32.xlu1 %v10123_v2, %s7136_s13 }
 0x478   : > { %5478 = vst.msk [vmem:[#allocation2 + $0x1c] sm:$0xf] %vm336_vm0, %v5326_v60  ;;  %v5248_v48 = vrot.slane %v5243_v38, 4  ;;  %v10202_v30 = vrot.slane %v5267_v46, 7 }
 0x479   : > { %5620 = vrot.lane.b32.xlu0 %v6422_v37, %s7136_s13  ;;  %v5595_v58 = vpop.permute.xlu1 %5594  ;;  %v5227_v37 = vshll.u32 %v6423_v21, 16 }
 0x47a   : > { %5683 = vst.msk [vmem:[%s10052_s16 + $0x1c] sm:$0xf] %vm336_vm0, %v5595_v58 }
 0x47b   : > { %v5589_v47 = vpop.permute.xlu0 %5588  ;;  %5622 = vrot.lane.b32.xlu1 %v6423_v21, %s7136_s13  ;;  %v5229_v1 = vor.u32 %v5227_v37, %v5226_v23  ;;  %v5507_v23 = vld [vmem:[#allocation2 + $0x50] sm:$0x1] }
 0x47c   : > { %5680 = vst.msk [vmem:[%s10052_s16 + $0x10] sm:$0xf] %vm336_vm0, %v5589_v47 }
 0x47d   : > { %5795 = vrot.lane.b32.xlu0 %v4779_v4, %s7136_s13  ;;  %v5591_v36 = vpop.permute.xlu1 %5590  ;;  %v5230_v60 = vsel %vm7331_vm4, %v5222_v25, %v5229_v1  ;;  %v5273_v1 = vrot.slane %v10202_v30, 4 }
 0x47e   : > { %5681 = vst.msk [vmem:[%s10052_s16 + $0x14] sm:$0xf] %vm336_vm0, %v5591_v36  ;;  %v6427_v36 = vpack.c.bf16 %v4778_v52, %v4778_v52 }
 0x47f   : > { %v5764_v56 = vpop.permute.xlu0 %5763  ;;  %5383 = vrot.lane.b32.xlu1 %v5238_v44, %s7136_s13 }
 0x480   : > { %v5849_v11 = vsel %vm993_vm8, %v5764_v56, %v9658_v54 }
 0x481   : > { %5882 = vst.msk [vmem:[%s10017_s30 + $0x50] sm:$0xff] %vm5871_vm11, %v5849_v11  ;;  %5377 = vrot.lane.b32.xlu0 %v5221_v3, %s7136_s13  ;;  %v5336_v19 = vpop.permute.xlu1 %5335  ;;  %v5270_v11 = vshll.u32 %v6428_v42, 16 }
 0x482   : > { %v5490_v15 = vsel %vm7338_vm5, %v5336_v19, %v5489_v0 }
 0x483   : > { %v5330_v40 = vpop.permute.xlu0 %5329  ;;  %5491 = vst [vmem:[#allocation2 + $0x30] sm:$0xf] %v5490_v15  ;;  %5387 = vrot.lane.b32.xlu1 %v5248_v48, %s7136_s13  ;;  %v5272_v19 = vor.u32 %v5270_v11, %v10202_v30  ;;  %v5258_v48 = vshrl.u32 %v6427_v36, 16 }
 0x484   : > { %v5483_v54 = vsel %vm7338_vm5, %v5330_v40, %v5482_v61 }
 0x485   : > { %5484 = vst [vmem:[#allocation2 + $0x24] sm:$0xf] %v5483_v54  ;;  %5791 = vrot.lane.b32.xlu0 %v4777_v32, %s7136_s13  ;;  %v5340_v45 = vpop.permute.xlu1 %5339  ;;  %v4781_v32 = vmul.f32 %v10007_v5, %v9510_v33  ;;  %v5503_v54 = vld [vmem:[#allocation2 + $0x48] sm:$0xf]  ;;  %v5260_v55 = vrot.slane %v5258_v48, 7  ;;  %v10228_v33 = vpack.c.bf16 %v10214_v24, %v10214_v24 }
 0x486   : > { %v5494_v8 = vsel %vm7830_vm10, %v5340_v45, %v5493_v22  ;;  %v5496_v22 = vld [vmem:[#allocation2 + $0x3c] sm:$0xf] }
 0x487   : > { %v5760_v7 = vpop.permute.xlu0 %5759  ;;  %5495 = vst [vmem:[#allocation2 + $0x38] sm:$0x1] %v5494_v8  ;;  %5797 = vrot.lane.b32.xlu1 %v4780_v12, %s7136_s13  ;;  %v6430_v37 = vpack.c.bf16 %v4781_v32, %v4781_v32 }
 0x488   : > { %v5847_v57 = vsel %vm993_vm8, %v5760_v7, %v9672_v53  ;;  %v5246_v53 = vor.u32 %v5244_v41, %v5243_v38  ;;  %v4782_v7 = vmul.f32 %v10011_v17, %v9516_v9 }
 0x489   : > { %5880 = vst.msk [vmem:[%s10017_s30 + $0x40] sm:$0xff] %vm5871_vm11, %v5847_v57  ;;  %5632 = vrot.lane.b32.xlu0 %v6428_v42, %s7136_s13  ;;  %v5766_v63 = vpop.permute.xlu1 %5765  ;;  %v5261_v42 = vshll.u32 %v6427_v36, 16 }
 0x48a   : > { %v5850_v49 = vsel %vm993_vm8, %v5766_v63, %v9660_v29  ;;  %v5250_v29 = vshrl.u32 %v6426_v51, 16  ;;  %v5247_v58 = vsel %vm7331_vm4, %v5239_v31, %v5246_v53  ;;  %v5265_v63 = vrot.slane %v5260_v55, 4  ;;  %v10663_v53 = vld [vmem:[#allocation11_spill] sm:$0xff] }
 0x48b   : > { %v5601_v20 = vpop.permute.xlu0 %5600  ;;  %5883 = vst.msk [vmem:[%s10017_s30 + $0x58] sm:$0xff] %vm5871_vm11, %v5850_v49  ;;  %5793 = vrot.lane.b32.xlu1 %v4778_v52, %s7136_s13  ;;  %v10243_v49 = vmul.f32 %v10005_v62, %v9500_v27  ;;  %v5284_v27 = vshrl.u32 %v6430_v37, 16  ;;  %v6431_v62 = vpack.c.bf16 %v4782_v7, %v4782_v7 }
 0x48c   : > { %5686 = vst.msk [vmem:[%s10052_s16 + $0x28] sm:$0xf] %vm336_vm0, %v5601_v20  ;;  %v10196_v4 = vrot.slane %v5250_v29, 7  ;;  %v5500_v29 = vld [vmem:[#allocation2 + $0x44] sm:$0x1] }
 0x48d   : > { %5381 = vrot.lane.b32.xlu0 %v5231_v34, %s7136_s13  ;;  %v5762_v2 = vpop.permute.xlu1 %5761 }
 0x48e   : > { %v5848_v50 = vsel %vm993_vm8, %v5762_v2, %v9674_v6  ;;  %v6429_v6 = vpack.c.bf16 %v4780_v12, %v4780_v12  ;;  %v5255_v3 = vor.u32 %v5253_v26, %v10196_v4  ;;  %v5256_v20 = vrot.slane %v10196_v4, 4 }
 0x48f   : > { %v5334_v13 = vpop.permute.xlu0 %5333  ;;  %5881 = vst.msk [vmem:[%s10017_s30 + $0x48] sm:$0xff] %vm5871_vm11, %v5848_v50  ;;  %5379 = vrot.lane.b32.xlu1 %v5230_v60, %s7136_s13  ;;  %v6433_v2 = vpack.c.bf16 %v10243_v49, %v10243_v49  ;;  %v5301_v50 = vshrl.u32 %v10228_v33, 16 }
 0x490   : > { %v5487_v21 = vsel %vm7830_vm10, %v5334_v13, %v5486_v14  ;;  %v5275_v38 = vshrl.u32 %v6429_v6, 16  ;;  %v5278_v8 = vshll.u32 %v6429_v6, 16  ;;  %v5286_v13 = vrot.slane %v5284_v27, 7 }
 0x491   : > { %5488 = vst [vmem:[#allocation2 + $0x2c] sm:$0x1] %v5487_v21  ;;  %5385 = vrot.lane.b32.xlu0 %v5247_v58, %s7136_s13  ;;  %v5332_v10 = vpop.permute.xlu1 %5331  ;;  %v5292_v21 = vshrl.u32 %v6431_v62, 16  ;;  %v10664_v58 = vld [vmem:[#allocation21_spill] sm:$0xff]  ;;  %v5303_v26 = vrot.slane %v5301_v50, 7  ;;  %v5312_v11 = vshll.u32 %v6433_v2, 16 }
 0x492   : > { %5485 = vst.msk [vmem:[#allocation2 + $0x28] sm:$0xf] %vm336_vm0, %v5332_v10  ;;  %v5277_v0 = vrot.slane %v5275_v38, 7  ;;  %v5309_v10 = vshrl.u32 %v6433_v2, 16 }
 0x493   : > { %v5338_v47 = vpop.permute.xlu0 %5337  ;;  %5634 = vrot.lane.b32.xlu1 %v6429_v6, %s7136_s13  ;;  %v5294_v38 = vrot.slane %v5292_v21, 7  ;;  %v5531_v21 = vld [vmem:[#allocation2 + $0x78] sm:$0xf] }
 0x494   : > { %5492 = vst.msk [vmem:[#allocation2 + $0x34] sm:$0xf] %vm336_vm0, %v5338_v47  ;;  %v5282_v18 = vrot.slane %v5277_v0, 4  ;;  %v5280_v17 = vor.u32 %v5278_v8, %v5277_v0  ;;  %v5287_v47 = vshll.u32 %v6430_v37, 16 }
 0x495   : > { %5628 = vrot.lane.b32.xlu0 %v6426_v51, %s7136_s13  ;;  %v5603_v44 = vpop.permute.xlu1 %5602  ;;  %v5263_v51 = vor.u32 %v5261_v42, %v5260_v55  ;;  %v5299_v48 = vrot.slane %v5294_v38, 4 }
 0x496   : > { %5687 = vst.msk [vmem:[%s10052_s16 + $0x2c] sm:$0xf] %vm336_vm0, %v5603_v44  ;;  %v5281_v31 = vsel %vm7331_vm4, %v5273_v1, %v5280_v17  ;;  %v5289_v44 = vor.u32 %v5287_v47, %v5286_v13  ;;  %v5514_v17 = vld [vmem:[#allocation2 + $0x5c] sm:$0x1]  ;;  %v5535_v47 = vld [vmem:[#allocation2 + $0x80] sm:$0x1] }
 0x497   : > { %v5597_v56 = vpop.permute.xlu0 %5596  ;;  %5630 = vrot.lane.b32.xlu1 %v6427_v36, %s7136_s13  ;;  %v5264_v14 = vsel %vm7331_vm4, %v5256_v20, %v5263_v51  ;;  %v10666_v51 = vld [vmem:[#allocation24_spill] sm:$0xff] }
 0x498   : > { %5684 = vst.msk [vmem:[%s10052_s16 + $0x20] sm:$0xf] %vm336_vm0, %v5597_v56  ;;  %v5304_v56 = vshll.u32 %v10228_v33, 16 }
 0x499   : > { %5389 = vrot.lane.b32.xlu0 %v5255_v3, %s7136_s13  ;;  %v5599_v61 = vpop.permute.xlu1 %5598  ;;  %v5311_v3 = vrot.slane %v5309_v10, 7 }
 0x49a   : > { %5685 = vst.msk [vmem:[%s10052_s16 + $0x24] sm:$0xf] %vm336_vm0, %v5599_v61  ;;  %v5306_v61 = vor.u32 %v5304_v56, %v5303_v26 }
 0x49b   : > { %v5772_v15 = vpop.permute.xlu0 %5771  ;;  %5395 = vrot.lane.b32.xlu1 %v5272_v19, %s7136_s13 }
 0x49c   : > { %v5853_v40 = vsel %vm993_vm8, %v5772_v15, %v9690_v28  ;;  %v5295_v15 = vshll.u32 %v6431_v62, 16 }
 0x49d   : > { %5886 = vst.msk [vmem:[%s10017_s30 + $0x70] sm:$0xff] %vm5871_vm11, %v5853_v40  ;;  %5799 = vrot.lane.b32.xlu0 %v4781_v32, %s7136_s13  ;;  %v5348_v12 = vpop.permute.xlu1 %5347  ;;  %v5314_v32 = vor.u32 %v5312_v11, %v5311_v3  ;;  %v5510_v40 = vld [vmem:[#allocation2 + $0x54] sm:$0xf] }
 0x49e   : > { %v5504_v5 = vsel %vm7338_vm5, %v5348_v12, %v5503_v54  ;;  %v5307_v12 = vrot.slane %v5303_v26, 4  ;;  %v5297_v55 = vor.u32 %v5295_v15, %v5294_v38 }
 0x49f   : > { %v5342_v45 = vpop.permute.xlu0 %5341  ;;  %5505 = vst [vmem:[#allocation2 + $0x48] sm:$0xf] %v5504_v5  ;;  %5399 = vrot.lane.b32.xlu1 %v5282_v18, %s7136_s13  ;;  %v5517_v5 = vld [vmem:[#allocation2 + $0x60] sm:$0xf] }
 0x4a0   : > { %v5497_v28 = vsel %vm7338_vm5, %v5342_v45, %v5496_v22  ;;  %v5316_v22 = vrot.slane %v5311_v3, 4  ;;  %v5315_v45 = vsel %vm7331_vm4, %v5307_v12, %v5314_v32  ;;  %v10671_v3 = vld [vmem:[#allocation17_spill] sm:$0xff] }
 0x4a1   : > { %5498 = vst [vmem:[#allocation2 + $0x3c] sm:$0xf] %v5497_v28  ;;  %5640 = vrot.lane.b32.xlu0 %v10228_v33, %s7136_s13  ;;  %v5352_v57 = vpop.permute.xlu1 %5351  ;;  %v5290_v28 = vrot.slane %v5286_v13, 4 }
 0x4a2   : > { %v5508_v41 = vsel %vm7830_vm10, %v5352_v57, %v5507_v23  ;;  %v10665_v57 = vld [vmem:[#allocation22_spill] sm:$0xff] }
 0x4a3   : > { %v5768_v52 = vpop.permute.xlu0 %5767  ;;  %5509 = vst [vmem:[#allocation2 + $0x50] sm:$0x1] %v5508_v41  ;;  %5801 = vrot.lane.b32.xlu1 %v4782_v7, %s7136_s13  ;;  %v5298_v8 = vsel %vm7331_vm4, %v5290_v28, %v5297_v55  ;;  %v5521_v41 = vld [vmem:[#allocation2 + $0x68] sm:$0x1]  ;;  %v5538_v28 = vld [vmem:[#allocation2 + $0x84] sm:$0xf] }
 0x4a4   : > { %v5851_v9 = vsel %vm993_vm8, %v5768_v52, %v9704_v59 }
 0x4a5   : > { %5884 = vst.msk [vmem:[%s10017_s30 + $0x60] sm:$0xff] %vm5871_vm11, %v5851_v9  ;;  %5393 = vrot.lane.b32.xlu0 %v5265_v63, %s7136_s13  ;;  %v5774_v34 = vpop.permute.xlu1 %5773 }
 0x4a6   : > { %v5854_v25 = vsel %vm993_vm8, %v5774_v34, %v10663_v53  ;;  %v10667_v34 = vld [vmem:[#allocation23_spill] sm:$0xff] }
 0x4a7   : > { %v5609_v59 = vpop.permute.xlu0 %5608  ;;  %5887 = vst.msk [vmem:[%s10017_s30 + $0x78] sm:$0xff] %vm5871_vm11, %v5854_v25  ;;  %5391 = vrot.lane.b32.xlu1 %v5264_v14, %s7136_s13  ;;  %v10668_v25 = vld [vmem:[#allocation25_spill] sm:$0xff] }
 0x4a8   : > { %5690 = vst.msk [vmem:[%s10052_s16 + $0x38] sm:$0xf] %vm336_vm0, %v5609_v59 }
 0x4a9   : > { %5397 = vrot.lane.b32.xlu0 %v5281_v31, %s7136_s13  ;;  %v5770_v60 = vpop.permute.xlu1 %5769 }
 0x4aa   : > { %v5852_v46 = vsel %vm993_vm8, %v5770_v60, %v10664_v58  ;;  %v10669_v60 = vld [vmem:[#allocation15_spill] sm:$0xff]  ;;  %v5524_v58 = vld [vmem:[#allocation2 + $0x6c] sm:$0xf] }
 0x4ab   : > { %v5346_v6 = vpop.permute.xlu0 %5345  ;;  %5885 = vst.msk [vmem:[%s10017_s30 + $0x68] sm:$0xff] %vm5871_vm11, %v5852_v46  ;;  %5642 = vrot.lane.b32.xlu1 %v6433_v2, %s7136_s13 }
 0x4ac   : > { %v5501_v4 = vsel %vm7830_vm10, %v5346_v6, %v5500_v29 }
 0x4ad   : > { %5502 = vst [vmem:[#allocation2 + $0x44] sm:$0x1] %v5501_v4  ;;  %5636 = vrot.lane.b32.xlu0 %v6430_v37, %s7136_s13  ;;  %v5344_v30 = vpop.permute.xlu1 %5343 }
 0x4ae   : > { %5499 = vst.msk [vmem:[#allocation2 + $0x40] sm:$0xf] %vm336_vm0, %v5344_v30 }
 0x4af   : > { %v5350_v36 = vpop.permute.xlu0 %5349  ;;  %5638 = vrot.lane.b32.xlu1 %v6431_v62, %s7136_s13 }
 0x4b0   : > { %5506 = vst.msk [vmem:[#allocation2 + $0x4c] sm:$0xf] %vm336_vm0, %v5350_v36  ;;  %v10670_v36 = vld [vmem:[#allocation13_spill] sm:$0xff] }
 0x4b1   : > { %5401 = vrot.lane.b32.xlu0 %v5289_v44, %s7136_s13  ;;  %v5611_v0 = vpop.permute.xlu1 %5610 }
 0x4b2   : > { %5691 = vst.msk [vmem:[%s10052_s16 + $0x3c] sm:$0xf] %vm336_vm0, %v5611_v0 }
 0x4b3   : > { %v5605_v19 = vpop.permute.xlu0 %5604  ;;  %5407 = vrot.lane.b32.xlu1 %v5306_v61, %s7136_s13  ;;  %v5528_v61 = vld [vmem:[#allocation2 + $0x74] sm:$0x1] }
 0x4b4   : > { %5688 = vst.msk [vmem:[%s10052_s16 + $0x30] sm:$0xf] %vm336_vm0, %v5605_v19 }
 0x4b5   : > { %5405 = vrot.lane.b32.xlu0 %v5299_v48, %s7136_s13  ;;  %v5607_v54 = vpop.permute.xlu1 %5606  ;;  %v10672_v48 = vld [vmem:[#allocation14_spill] sm:$0xff] }
 0x4b6   : > { %5689 = vst.msk [vmem:[%s10052_s16 + $0x34] sm:$0xf] %vm336_vm0, %v5607_v54 }
 0x4b7   : > { %v5354_v18 = vpop.permute.xlu0 %5353  ;;  %5411 = vrot.lane.b32.xlu1 %v5316_v22, %s7136_s13 }
 0x4b8   : > { %v5511_v33 = vsel %vm7338_vm5, %v5354_v18, %v5510_v40 }
 0x4b9   : > { %5512 = vst [vmem:[#allocation2 + $0x54] sm:$0xf] %v5511_v33  ;;  %5409 = vrot.lane.b32.xlu0 %v5315_v45, %s7136_s13  ;;  %v5360_v23 = vpop.permute.xlu1 %5359  ;;  %v5545_v45 = vld [vmem:[#allocation2 + $0x90] sm:$0xf] }
 0x4ba   : > { %v5518_v42 = vsel %vm7338_vm5, %v5360_v23, %v5517_v5 }
 0x4bb   : > { %v5780_v7 = vpop.permute.xlu0 %5779  ;;  %5519 = vst [vmem:[#allocation2 + $0x60] sm:$0xf] %v5518_v42  ;;  %5403 = vrot.lane.b32.xlu1 %v5298_v8, %s7136_s13 }
 0x4bc   : > { %v5857_v37 = vsel %vm993_vm8, %v5780_v7, %v10665_v57  ;;  %v5549_v57 = vld [vmem:[#allocation2 + $0x98] sm:$0x1] }
 0x4bd   : > { %5890 = vst.msk [vmem:[%s10017_s30 + $0x90] sm:$0xff] %vm5871_vm11, %v5857_v37  ;;  %5803 = vrot.lane.b32.xlu0 %v10214_v24, %s7136_s13  ;;  %v5364_v52 = vpop.permute.xlu1 %5363 }
 0x4be   : > { %v5522_v63 = vsel %vm7830_vm10, %v5364_v52, %v5521_v41  ;;  %v10673_v52 = vld [vmem:[#allocation26_spill] sm:$0xff] }
 0x4bf   : > { %v5776_v43 = vpop.permute.xlu0 %5775  ;;  %5523 = vst [vmem:[#allocation2 + $0x68] sm:$0x1] %v5522_v63  ;;  %5805 = vrot.lane.b32.xlu1 %v10243_v49, %s7136_s13  ;;  %s7051_s13 = sshll.u32 %s7137_s28, 4  ;;  %s7052_s13 = int_to_ptr.vmem [resolvable:$false] %s7051_s13 }
 0x4c0   : > { %v5855_v9 = vsel %vm993_vm8, %v5776_v43, %v10666_v51  ;;  %v10674_v51 = vld [vmem:[#allocation9_spill] sm:$0xff]  ;;  %s7053_s14 = scalar_lea.vmem %s7052_s13, 4096  ;;  %p7054_p1 = scmp.lt.s32.totalorder %s10433_s19, %s7052_s13 }
 0x4c1   : > { %5888 = vst.msk [vmem:[%s10017_s30 + $0x80] sm:$0xff] %vm5871_vm11, %v5855_v9  ;;  %v5782_v20 = vpop.permute.xlu1 %5781  ;;  %p7055_p2 = scmp.lt.s32.totalorder %s7053_s14, %s7047_s11 }
 0x4c2   : > { %v5858_v24 = vsel %vm993_vm8, %v5782_v20, %v10667_v34  ;;  %v5542_v20 = vld [vmem:[#allocation2 + $0x8c] sm:$0x1] }
 0x4c3   : > { %v5358_v1 = vpop.permute.xlu0 %5357  ;;  %5891 = vst.msk [vmem:[%s10017_s30 + $0x98] sm:$0xff] %vm5871_vm11, %v5858_v24  ;;  %v10675_v24 = vld [vmem:[#allocation18_spill] sm:$0xff]  ;;  %p7056_p3 = por %p7055_p2, %p7054_p1 }
 0x4c4   : > { %v5515_v49 = vsel %vm7830_vm10, %v5358_v1, %v5514_v17 }
 0x4c5   : > { %5516 = vst [vmem:[#allocation2 + $0x5c] sm:$0x1] %v5515_v49  ;;  %v5356_v27 = vpop.permute.xlu1 %5355  ;;  %p7057_p5 = pnand %p7056_p3, %p7050_p0 }
 0x4c6   : > { %5513 = vst.msk [vmem:[#allocation2 + $0x58] sm:$0xf] %vm336_vm0, %v5356_v27 }
 0x4c7   : > { %v5362_v62 = vpop.permute.xlu0 %5361 }
 0x4c8   : > { %5520 = vst.msk [vmem:[#allocation2 + $0x64] sm:$0xf] %vm336_vm0, %v5362_v62 }
 0x4c9   : > { %v5778_v53 = vpop.permute.xlu1 %5777 }
 0x4ca   : > { %v5856_v14 = vsel %vm993_vm8, %v5778_v53, %v10668_v25 }
 0x4cb   : > { %v5617_v59 = vpop.permute.xlu0 %5616  ;;  %5889 = vst.msk [vmem:[%s10017_s30 + $0x88] sm:$0xff] %vm5871_vm11, %v5856_v14 }
 0x4cc   : > { %5694 = vst.msk [vmem:[%s10052_s16 + $0x48] sm:$0xf] %vm336_vm0, %v5617_v59  ;;  %v5552_v59 = vld [vmem:[#allocation2 + $0x9c] sm:$0xf] }
 0x4cd   : > { %v5619_v2 = vpop.permute.xlu1 %5618 }
 0x4ce   : > { %5695 = vst.msk [vmem:[%s10052_s16 + $0x4c] sm:$0xf] %vm336_vm0, %v5619_v2 }
 0x4cf   : > { %v5613_v31 = vpop.permute.xlu0 %5612 }
 0x4d0   : > { %5692 = vst.msk [vmem:[%s10052_s16 + $0x40] sm:$0xf] %vm336_vm0, %v5613_v31 }
 0x4d1   : > { %v5615_v29 = vpop.permute.xlu1 %5614 }
 0x4d2   : > { %5693 = vst.msk [vmem:[%s10052_s16 + $0x44] sm:$0xf] %vm336_vm0, %v5615_v29 }
 0x4d3   : > { %v5788_v50 = vpop.permute.xlu0 %5787 }
 0x4d4   : > { %v5861_v13 = vsel %vm993_vm8, %v5788_v50, %v10669_v60  ;;  %v5559_v50 = vld [vmem:[#allocation2 + $0xa8] sm:$0xf] }
 0x4d5   : > { %5894 = vst.msk [vmem:[%s10017_s30 + $0xb0] sm:$0xff] %vm5871_vm11, %v5861_v13  ;;  %v5372_v46 = vpop.permute.xlu1 %5371 }
 0x4d6   : > { %v5532_v6 = vsel %vm7338_vm5, %v5372_v46, %v5531_v21 }
 0x4d7   : > { %v5366_v10 = vpop.permute.xlu0 %5365  ;;  %5533 = vst [vmem:[#allocation2 + $0x78] sm:$0xf] %v5532_v6  ;;  %v5563_v6 = vld [vmem:[#allocation2 + $0xb0] sm:$0x1] }
 0x4d8   : > { %v5525_v4 = vsel %vm7338_vm5, %v5366_v10, %v5524_v58  ;;  %v10676_v58 = vld [vmem:[#allocation12_spill] sm:$0xff] }
 0x4d9   : > { %5526 = vst [vmem:[#allocation2 + $0x6c] sm:$0xf] %v5525_v4  ;;  %v5376_v26 = vpop.permute.xlu1 %5375 }
 0x4da   : > { %v5536_v30 = vsel %vm7830_vm10, %v5376_v26, %v5535_v47  ;;  %v5556_v26 = vld [vmem:[#allocation2 + $0xa4] sm:$0x1] }
 0x4db   : > { %v5784_v38 = vpop.permute.xlu0 %5783  ;;  %5537 = vst [vmem:[#allocation2 + $0x80] sm:$0x1] %v5536_v30 }
 0x4dc   : > { %v5859_v44 = vsel %vm993_vm8, %v5784_v38, %v10670_v36  ;;  %v10677_v38 = vld [vmem:[#allocation19_spill] sm:$0xff] }
 0x4dd   : > { %5892 = vst.msk [vmem:[%s10017_s30 + $0xa0] sm:$0xff] %vm5871_vm11, %v5859_v44  ;;  %v5790_v56 = vpop.permute.xlu1 %5789 }
 0x4de   : > { %v5862_v11 = vsel %vm993_vm8, %v5790_v56, %v10671_v3 }
 0x4df   : > { %v5625_v0 = vpop.permute.xlu0 %5624  ;;  %5895 = vst.msk [vmem:[%s10017_s30 + $0xb8] sm:$0xff] %vm5871_vm11, %v5862_v11 }
 0x4e0   : > { %5698 = vst.msk [vmem:[%s10052_s16 + $0x58] sm:$0xf] %vm336_vm0, %v5625_v0 }
 0x4e1   : > { %v5786_v19 = vpop.permute.xlu1 %5785 }
 0x4e2   : > { %v5860_v32 = vsel %vm993_vm8, %v5786_v19, %v10672_v48  ;;  %v5566_v19 = vld [vmem:[#allocation2 + $0xb4] sm:$0xf] }
 0x4e3   : > { %v5370_v15 = vpop.permute.xlu0 %5369  ;;  %5893 = vst.msk [vmem:[%s10017_s30 + $0xa8] sm:$0xff] %vm5871_vm11, %v5860_v32 }
 0x4e4   : > { %v5529_v40 = vsel %vm7830_vm10, %v5370_v15, %v5528_v61 }
 0x4e5   : > { %5530 = vst [vmem:[#allocation2 + $0x74] sm:$0x1] %v5529_v40  ;;  %v5368_v54 = vpop.permute.xlu1 %5367  ;;  %v5573_v40 = vld [vmem:[#allocation2 + $0xc0] sm:$0xf] }
 0x4e6   : > { %5527 = vst.msk [vmem:[#allocation2 + $0x70] sm:$0xf] %vm336_vm0, %v5368_v54 }
 0x4e7   : > { %v5374_v22 = vpop.permute.xlu0 %5373 }
 0x4e8   : > { %5534 = vst.msk [vmem:[#allocation2 + $0x7c] sm:$0xf] %vm336_vm0, %v5374_v22 }
 0x4e9   : > { %v5627_v12 = vpop.permute.xlu1 %5626 }
 0x4ea   : > { %5699 = vst.msk [vmem:[%s10052_s16 + $0x5c] sm:$0xf] %vm336_vm0, %v5627_v12 }
 0x4eb   : > { %v5621_v18 = vpop.permute.xlu0 %5620 }
 0x4ec   : > { %5696 = vst.msk [vmem:[%s10052_s16 + $0x50] sm:$0xf] %vm336_vm0, %v5621_v18 }
 0x4ed   : > { %v5623_v55 = vpop.permute.xlu1 %5622 }
 0x4ee   : > { %5697 = vst.msk [vmem:[%s10052_s16 + $0x54] sm:$0xf] %vm336_vm0, %v5623_v55 }
 0x4ef   : > { %v5796_v33 = vpop.permute.xlu0 %5795 }
 0x4f0   : > { %v5865_v5 = vsel %vm993_vm8, %v5796_v33, %v9782_v39 }
 0x4f1   : > { %5898 = vst.msk [vmem:[%s10017_s30 + $0xd0] sm:$0xff] %vm5871_vm11, %v5865_v5  ;;  %v5384_v23 = vpop.permute.xlu1 %5383 }
 0x4f2   : > { %v5546_v42 = vsel %vm7338_vm5, %v5384_v23, %v5545_v45 }
 0x4f3   : > { %v5378_v8 = vpop.permute.xlu0 %5377  ;;  %5547 = vst [vmem:[#allocation2 + $0x90] sm:$0xf] %v5546_v42 }
 0x4f4   : > { %v5539_v7 = vsel %vm7338_vm5, %v5378_v8, %v5538_v28 }
 0x4f5   : > { %5540 = vst [vmem:[#allocation2 + $0x84] sm:$0xf] %v5539_v7  ;;  %v5388_v39 = vpop.permute.xlu1 %5387 }
 0x4f6   : > { %v5550_v37 = vsel %vm7830_vm10, %v5388_v39, %v5549_v57 }
 0x4f7   : > { %v5792_v41 = vpop.permute.xlu0 %5791  ;;  %5551 = vst [vmem:[#allocation2 + $0x98] sm:$0x1] %v5550_v37 }
 0x4f8   : > { %v5863_v63 = vsel %vm993_vm8, %v5792_v41, %v10673_v52 }
 0x4f9   : > { %5896 = vst.msk [vmem:[%s10017_s30 + $0xc0] sm:$0xff] %vm5871_vm11, %v5863_v63  ;;  %v5798_v43 = vpop.permute.xlu1 %5797 }
 0x4fa   : > { %v5866_v9 = vsel %vm993_vm8, %v5798_v43, %v10674_v51 }
 0x4fb   : > { %v5633_v17 = vpop.permute.xlu0 %5632  ;;  %5899 = vst.msk [vmem:[%s10017_s30 + $0xd8] sm:$0xff] %vm5871_vm11, %v5866_v9 }
 0x4fc   : > { %5702 = vst.msk [vmem:[%s10052_s16 + $0x68] sm:$0xf] %vm336_vm0, %v5633_v17 }
 0x4fd   : > { %v5794_v34 = vpop.permute.xlu1 %5793 }
 0x4fe   : > { %v5864_v1 = vsel %vm993_vm8, %v5794_v34, %v10675_v24 }
 0x4ff   : > { %v5382_v49 = vpop.permute.xlu0 %5381  ;;  %5897 = vst.msk [vmem:[%s10017_s30 + $0xc8] sm:$0xff] %vm5871_vm11, %v5864_v1 }
 0x500   : > { %v5543_v27 = vsel %vm7830_vm10, %v5382_v49, %v5542_v20 }
 0x501   : > { %5544 = vst [vmem:[#allocation2 + $0x8c] sm:$0x1] %v5543_v27  ;;  %v5380_v62 = vpop.permute.xlu1 %5379 }
 0x502   : > { %5541 = vst.msk [vmem:[#allocation2 + $0x88] sm:$0xf] %vm336_vm0, %v5380_v62 }
 0x503   : > { %v5386_v53 = vpop.permute.xlu0 %5385 }
 0x504   : > { %5548 = vst.msk [vmem:[#allocation2 + $0x94] sm:$0xf] %vm336_vm0, %v5386_v53 }
 0x505   : > { %v5635_v25 = vpop.permute.xlu1 %5634 }
 0x506   : > { %5703 = vst.msk [vmem:[%s10052_s16 + $0x6c] sm:$0xf] %vm336_vm0, %v5635_v25 }
 0x507   : > { %v5629_v14 = vpop.permute.xlu0 %5628 }
 0x508   : > { %5700 = vst.msk [vmem:[%s10052_s16 + $0x60] sm:$0xf] %vm336_vm0, %v5629_v14 }
 0x509   : > { %v5631_v2 = vpop.permute.xlu1 %5630 }
 0x50a   : > { %5701 = vst.msk [vmem:[%s10052_s16 + $0x64] sm:$0xf] %vm336_vm0, %v5631_v2 }
 0x50b   : > { %v5390_v31 = vpop.permute.xlu0 %5389 }
 0x50c   : > { %v5553_v29 = vsel %vm7338_vm5, %v5390_v31, %v5552_v59 }
 0x50d   : > { %5554 = vst [vmem:[#allocation2 + $0x9c] sm:$0xf] %v5553_v29  ;;  %v5396_v60 = vpop.permute.xlu1 %5395 }
 0x50e   : > { %v5560_v13 = vsel %vm7338_vm5, %v5396_v60, %v5559_v50 }
 0x50f   : > { %v5800_v21 = vpop.permute.xlu0 %5799  ;;  %5561 = vst [vmem:[#allocation2 + $0xa8] sm:$0xf] %v5560_v13 }
 0x510   : > { %v5867_v46 = vsel %vm993_vm8, %v5800_v21, %v10676_v58 }
 0x511   : > { %5900 = vst.msk [vmem:[%s10017_s30 + $0xe0] sm:$0xff] %vm5871_vm11, %v5867_v46  ;;  %v5400_v10 = vpop.permute.xlu1 %5399 }
 0x512   : > { %v5564_v4 = vsel %vm7830_vm10, %v5400_v10, %v5563_v6 }
 0x513   : > { %v5641_v47 = vpop.permute.xlu0 %5640  ;;  %5565 = vst [vmem:[#allocation2 + $0xb0] sm:$0x1] %v5564_v4 }
 0x514   : > { %5706 = vst.msk [vmem:[%s10052_s16 + $0x78] sm:$0xf] %vm336_vm0, %v5641_v47 }
 0x515   : > { %v5802_v30 = vpop.permute.xlu1 %5801 }
 0x516   : > { %v5868_v36 = vsel %vm993_vm8, %v5802_v30, %v10677_v38 }
 0x517   : > { %v5394_v44 = vpop.permute.xlu0 %5393  ;;  %5901 = vst.msk [vmem:[%s10017_s30 + $0xe8] sm:$0xff] %vm5871_vm11, %v5868_v36 }
 0x518   : > { %v5557_v56 = vsel %vm7830_vm10, %v5394_v44, %v5556_v26 }
 0x519   : > { %5558 = vst [vmem:[#allocation2 + $0xa4] sm:$0x1] %v5557_v56  ;;  %v5392_v3 = vpop.permute.xlu1 %5391 }
 0x51a   : > { %5555 = vst.msk [vmem:[#allocation2 + $0xa0] sm:$0xf] %vm336_vm0, %v5392_v3 }
 0x51b   : > { %v5398_v11 = vpop.permute.xlu0 %5397 }
 0x51c   : > { %5562 = vst.msk [vmem:[#allocation2 + $0xac] sm:$0xf] %vm336_vm0, %v5398_v11 }
 0x51d   : > { %v5643_v0 = vpop.permute.xlu1 %5642 }
 0x51e   : > { %5707 = vst.msk [vmem:[%s10052_s16 + $0x7c] sm:$0xf] %vm336_vm0, %v5643_v0 }
 0x51f   : > { %v5637_v61 = vpop.permute.xlu0 %5636 }
 0x520   : > { %5704 = vst.msk [vmem:[%s10052_s16 + $0x70] sm:$0xf] %vm336_vm0, %v5637_v61 }
 0x521   : > { %v5639_v48 = vpop.permute.xlu1 %5638 }
 0x522   : > { %5705 = vst.msk [vmem:[%s10052_s16 + $0x74] sm:$0xf] %vm336_vm0, %v5639_v48 }
 0x523   : > { %v5402_v32 = vpop.permute.xlu0 %5401 }
 0x524   : > { %v5567_v15 = vsel %vm7338_vm5, %v5402_v32, %v5566_v19 }
 0x525   : > { %7060 = shalt.err (!%p7057_p5)
}
 0x526   : > { %s7061_s15 = scalar_lea.hbm %s10431_s8, 2048  ;;  %s7065_s16 = scalar_lea.hbm %s10508_s5, 4096 }
 0x527   : > { %p7062_p6 = scmp.ne.s32.totalorder %s10431_s8, %s7061_s15  ;;  %p7066_p10 = scmp.lt.u32.totalorder %s10431_s8, %s10508_s5 }
 0x528   : > { %p7067_p11 = scmp.lt.u32.totalorder %s7065_s16, %s7061_s15  ;;  %p7069_p13 = scmp.lt.u32.totalorder %s7061_s15, %s10431_s8 }
 0x529   : > { %p7063_p7 = pnand %p7062_p6, %p7215_p4 }
 0x52a   : > { %p7068_p12 = por %p7067_p11, %p7066_p10 }
 0x52b   : > { %p7064_p9 = pneg %p7063_p7 }
 0x52c   : > { %p7070_p0 = por %p7069_p13, %p7068_p12 }
 0x52e   : > { %p7071_p1 = pnand %p7070_p0, %p7064_p9 }
 0x530   : > { %7074 = shalt.err (!%p7071_p1)
}
 0x531   : > { %s7138_s20 = smov 64   ;;  %s7139_s11 = smov 4   ;;  %5568 = vst [vmem:[#allocation2 + $0xb4] sm:$0xf] %v5567_v15  ;;  %v5570_v54 = vld [vmem:[#allocation2 + $0xbc] sm:$0x1]  ;;  %v5408_v22 = vpop.permute.xlu1 %5407  ;;  %v5406_v18 = vpop.permute.xlu0 %5405 }
 0x532   : > { %6735 = dma.vmem_to_hbm [thread:$0]  (%p7215_p4), %s10433_s19, 2048, %s10431_s8, %s10441_s24, %s7138_s20, %s7138_s20, %s7139_s11   ;;  %v5574_v12 = vsel %vm7338_vm5, %v5408_v22, %v5573_v40  ;;  %v5571_v55 = vsel %vm7830_vm10, %v5406_v18, %v5570_v54  ;;  %v5577_v33 = vld [vmem:[#allocation2 + $0xc8] sm:$0x1]  ;;  %v10678_v42 = vld [vmem:[#allocation10_spill] sm:$0xff]  ;;  %v10679_v57 = vld [vmem:[#allocation20_spill] sm:$0xff] }
 0x533   : > { %5575 = vst [vmem:[#allocation2 + $0xc0] sm:$0xf] %v5574_v12  ;;  %5572 = vst [vmem:[#allocation2 + $0xbc] sm:$0x1] %v5571_v55 }
 0x535   : > { %v5412_v5 = vpop.permute.xlu1 %5411  ;;  %v5410_v28 = vpop.permute.xlu0 %5409 }
 0x536   : > { %v5578_v45 = vsel %vm7830_vm10, %v5412_v5, %v5577_v33  ;;  %5576 = vst.msk [vmem:[#allocation2 + $0xc4] sm:$0xf] %vm336_vm0, %v5410_v28 }
 0x537   : > { %5579 = vst [vmem:[#allocation2 + $0xc8] sm:$0x1] %v5578_v45 }
 0x539   : > { %v5404_v23 = vpop.permute.xlu1 %5403  ;;  %v5804_v16 = vpop.permute.xlu0 %5803 }
 0x53a   : > { %5569 = vst.msk [vmem:[#allocation2 + $0xb8] sm:$0xf] %vm336_vm0, %v5404_v23  ;;  %v5869_v8 = vsel %vm993_vm8, %v5804_v16, %v10678_v42 }
 0x53b   : > { %5902 = vst.msk [vmem:[%s10017_s30 + $0xf0] sm:$0xff] %vm5871_vm11, %v5869_v8 }
 0x53d   : > { %v5806_v7 = vpop.permute.xlu1 %5805 }
 0x53e   : > { %v5870_v39 = vsel %vm993_vm8, %v5806_v7, %v10679_v57 }
 0x53f   : > { %5903 = vst.msk [vmem:[%s10017_s30 + $0xf8] sm:$0xff] %vm5871_vm11, %v5870_v39 }
 0x540 PF: > { %p6741_p4 = scmp.ge.s32.totalorder %s7125_s26, 2  ;;  %s5943_s7 = sand.u32 1, %s7105_s21  }
 0x541   : > { %s5944_s19 = scalar_lea.sflag [#allocation5], %s5943_s7 }
 0x542   : > { %p6738_p2 = pnand %p6741_p4, %p7222_p8 }
 0x544   : > { %7100 = dma.done.wait (!%p6738_p2), %s5944_s19, 2048  }
 0x545   : > { %7102 = vsyncadd (!%p6738_p2), %s5944_s19, 4294965248  ;;  %s20_s26 = sadd.s32 1, %s7125_s26   ;;  %s10680_s21 = smov %s7109_s22 }
 0x546   : > { %p17_p3 = scmp.ge.s32.totalorder %s20_s26, 4   ;;  %s10681_s22 = smov %s7113_s23 }
 0x547   : > { %s10682_s23 = smov %s7228_s10  ;;  %s10683_s24 = smov %s7121_s25 }
 0x548   : > { %s10684_s25 = smov %s10686_s29  ;;  %19 = sbr.rel (!%p17_p3) target bundleno = 4 (0x4), region = 105 }
 0x54f   :  { %5957 = vsyncpa [#allocation5], 1 }
 0x550   :  { %5959 = vsyncpa [#allocation5 + $0x1], 1 }

</bundles_post_ra>
